<compile_context>
chip_gen: v7x
topology: tpu7x:2x2x1
jax: 0.10.0
libtpu: 0.0.40
codegen_flags: <defaults>
</compile_context>

<pallas_src>
import functools
from math import pi as PI, log as _log

import jax
import jax.numpy as jnp
from jax.experimental import pallas as pl
from jax.experimental.pallas import tpu as pltpu

SHIFT = _log(2.0)   # ShiftedSoftplus shift
LANE = 128


def _ssp(v):
    # softplus(v) - log(2), numerically stable
    return jnp.logaddexp(v, 0.0) - SHIFT


def _round_up(x, m):
    return (x + m - 1) // m * m


def _pad_to(a, shape):
    pads = [(0, t - s) for s, t in zip(a.shape, shape)]
    return jnp.pad(a, pads)


def interaction_block_kernel(
    # scalar-prefetch (SMEM) int32 [E_pad]
    src_ref, tgt_ref,
    # tensor inputs
    x_ref, ew_ref, ea_ref,
    w_mlp1_ref, b_mlp1_ref, w_mlp2_ref, b_mlp2_ref,
    w_lin1_ref, w_lin2_ref, b_lin2_ref, w_lin_ref, b_lin_ref,
    # output
    out_ref,
    # VMEM scratch
    x1_scr, agg_scr, w_scr,
    *, cutoff, n_edges, edge_tile):
    k = pl.program_id(0)

    # ---- once: node projection lin1 (no bias) + zero aggregation buffer -----
    @pl.when(k == 0)
    def _init():
        x1_scr[...] = jnp.dot(x_ref[...], w_lin1_ref[...],
                              preferred_element_type=jnp.float32)
        agg_scr[...] = jnp.zeros_like(agg_scr)

    # ---- per edge-tile: filter network W = mlp(edge_attr) * cosine_cutoff ---
    h = jnp.dot(ea_ref[...], w_mlp1_ref[...],
                preferred_element_type=jnp.float32) + b_mlp1_ref[...]
    h = _ssp(h)
    W = jnp.dot(h.astype(jnp.bfloat16), w_mlp2_ref[...],
                preferred_element_type=jnp.float32) + b_mlp2_ref[...]
    C = 0.5 * (jnp.cos(ew_ref[...] * (PI / cutoff)) + 1.0)            # [tE, 1]
    eid = k * edge_tile + jax.lax.broadcasted_iota(jnp.int32, (edge_tile, 1), 0)
    valid = (eid < n_edges).astype(jnp.float32)                       # mask padded edges
    w_scr[...] = W * (C * valid)                                      # [tE, F_pad]

    # ---- gather source rows, modulate, scatter-add into agg accumulator -----
    def edge_body(i, carry):
        e = k * edge_tile + i
        s = src_ref[e]
        t = tgt_ref[e]
        msg = x1_scr[pl.ds(s, 1), :] * w_scr[pl.ds(i, 1), :]          # [1, F_pad]
        agg_scr[pl.ds(t, 1), :] = agg_scr[pl.ds(t, 1), :] + msg
        return carry

    jax.lax.fori_loop(0, edge_tile, edge_body, 0)

    # ---- last step: lin2 (+bias) -> ssp -> lin (+bias), lane-dense store ----
    @pl.when(k == pl.num_programs(0) - 1)
    def _finalize():
        y = jnp.dot(agg_scr[...].astype(jnp.bfloat16), w_lin2_ref[...],
                    preferred_element_type=jnp.float32) + b_lin2_ref[...]
        y = _ssp(y)
        out = jnp.dot(y.astype(jnp.bfloat16), w_lin_ref[...],
                      preferred_element_type=jnp.float32) + b_lin_ref[...]
        out_ref[...] = out.astype(out_ref.dtype)


def interaction_block(x, edge_index, edge_weight, edge_attr, params, cutoff,
                      *, edge_tile=128):
    N, H = x.shape
    E, G = edge_attr.shape
    F = params["w_mlp1"].shape[1]

    N_pad = _round_up(N, 8)
    H_pad = _round_up(H, LANE)
    G_pad = _round_up(G, LANE)
    F_pad = _round_up(F, LANE)
    E_pad = _round_up(E, edge_tile)
    nk = E_pad // edge_tile

    f32, bf16 = jnp.float32, jnp.bfloat16

    # ---- pad + cast inputs (zero padding keeps the math exact; padded edges
    # ---- are masked in-kernel, padded node rows are sliced off at the end)
    x_p = _pad_to(x.astype(f32), (N_pad, H_pad)).astype(bf16)
    ea_p = _pad_to(edge_attr.astype(f32), (E_pad, G_pad)).astype(bf16)
    ew_p = _pad_to(edge_weight.reshape(E, 1).astype(f32), (E_pad, 1))
    src_p = _pad_to(edge_index[0].astype(jnp.int32), (E_pad,))
    tgt_p = _pad_to(edge_index[1].astype(jnp.int32), (E_pad,))

    w_mlp1 = _pad_to(params["w_mlp1"].astype(f32), (G_pad, F_pad)).astype(bf16)
    b_mlp1 = _pad_to(params["b_mlp1"].astype(f32), (1, F_pad))
    w_mlp2 = _pad_to(params["w_mlp2"].astype(f32), (F_pad, F_pad)).astype(bf16)
    b_mlp2 = _pad_to(params["b_mlp2"].astype(f32), (1, F_pad))
    w_lin1 = _pad_to(params["w_lin1"].astype(f32), (H_pad, F_pad)).astype(bf16)
    w_lin2 = _pad_to(params["w_lin2"].astype(f32), (F_pad, H_pad)).astype(bf16)
    b_lin2 = _pad_to(params["b_lin2"].astype(f32), (1, H_pad))
    w_lin = _pad_to(params["w_lin"].astype(f32), (H_pad, H_pad)).astype(bf16)
    b_lin = _pad_to(params["b_lin"].astype(f32), (1, H_pad))

    # constant index maps -> fetched once, VMEM-resident across the edge axis
    def full(shape):
        return pl.BlockSpec(shape, lambda k, s, t, _n=len(shape): (0,) * _n)

    def edge_spec(shape):
        return pl.BlockSpec(shape, lambda k, s, t: (k, 0))

    grid_spec = pltpu.PrefetchScalarGridSpec(
        num_scalar_prefetch=2,                    # src, tgt indices -> SMEM
        grid=(nk,),
        in_specs=[
            full((N_pad, H_pad)),                 # x
            edge_spec((edge_tile, 1)),            # edge_weight tile
            edge_spec((edge_tile, G_pad)),        # edge_attr tile
            full((G_pad, F_pad)), full((1, F_pad)),   # mlp linear 1
            full((F_pad, F_pad)), full((1, F_pad)),   # mlp linear 2
            full((H_pad, F_pad)),                     # lin1 (no bias)
            full((F_pad, H_pad)), full((1, H_pad)),   # lin2
            full((H_pad, H_pad)), full((1, H_pad)),   # final lin
        ],
        out_specs=pl.BlockSpec((N_pad, H_pad), lambda k, s, t: (0, 0)),
        scratch_shapes=[
            pltpu.VMEM((N_pad, F_pad), jnp.float32),      # x1 = lin1(x)
            pltpu.VMEM((N_pad, F_pad), jnp.float32),      # agg accumulator
            pltpu.VMEM((edge_tile, F_pad), jnp.float32),  # per-tile edge filter W
        ],
    )

    out_pad = pl.pallas_call(
        functools.partial(interaction_block_kernel, cutoff=float(cutoff),
                          n_edges=E, edge_tile=edge_tile),
        out_shape=jax.ShapeDtypeStruct((N_pad, H_pad), jnp.float32),
        grid_spec=grid_spec,
        compiler_params=pltpu.CompilerParams(
            dimension_semantics=("arbitrary",),   # edge axis reduces into agg
            vmem_limit_bytes=32 * 1024 * 1024,
        ),
    )(src_p, tgt_p, x_p, ew_p, ea_p,
      w_mlp1, b_mlp1, w_mlp2, b_mlp2, w_lin1, w_lin2, b_lin2, w_lin, b_lin)

    return out_pad[:N, :H]


def _reference(x, edge_index, edge_weight, edge_attr, params, cutoff):
    # pure-JAX f32 reference mirroring the PyTorch forward
    h = edge_attr @ params["w_mlp1"] + params["b_mlp1"]
    h = _ssp(h)
    W = h @ params["w_mlp2"] + params["b_mlp2"]
    C = 0.5 * (jnp.cos(edge_weight * PI / cutoff) + 1.0)
    W = W * C[:, None]
    x1 = x @ params["w_lin1"]
    msg = x1[edge_index[0]] * W
    agg = jnp.zeros_like(x1).at[edge_index[1]].add(msg)
    y = agg @ params["w_lin2"] + params["b_lin2"]
    y = _ssp(y)
    return y @ params["w_lin"] + params["b_lin"]


if __name__ == "__main__":
    hidden_channels = 32
    num_gaussians = 16
    num_filters = 32
    cutoff = 10.0
    N = 8    # nodes
    E = 16   # edges

    key = jax.random.PRNGKey(0)
    keys = jax.random.split(key, 16)

    def init(k, shape, scale=0.1):
        return (scale * jax.random.normal(k, shape)).astype(jnp.float32)

    params = {
        # mlp: Linear(G, F) -> ShiftedSoftplus -> Linear(F, F)  (weights stored [in, out])
        "w_mlp1": init(keys[0], (num_gaussians, num_filters)),
        "b_mlp1": init(keys[1], (1, num_filters)),
        "w_mlp2": init(keys[2], (num_filters, num_filters)),
        "b_mlp2": init(keys[3], (1, num_filters)),
        # CFConv lin1 (no bias), lin2 (bias)
        "w_lin1": init(keys[4], (hidden_channels, num_filters)),
        "w_lin2": init(keys[5], (num_filters, hidden_channels)),
        "b_lin2": init(keys[6], (1, hidden_channels)),
        # final lin (bias)
        "w_lin": init(keys[7], (hidden_channels, hidden_channels)),
        "b_lin": init(keys[8], (1, hidden_channels)),
    }

    x = init(keys[9], (N, hidden_channels), scale=1.0)
    edge_attr = init(keys[10], (E, num_gaussians), scale=1.0)
    edge_weight = jax.random.uniform(keys[11], (E,), minval=0.5, maxval=cutoff)
    src = jax.random.randint(keys[12], (E,), 0, N)
    tgt = jax.random.randint(keys[13], (E,), 0, N)
    edge_index = jnp.stack([src, tgt], axis=0)

    out = interaction_block(x, edge_index, edge_weight, edge_attr, params, cutoff)
    out = jax.block_until_ready(out)

    ref = _reference(x, edge_index, edge_weight, edge_attr, params, cutoff)
    assert out.shape == (N, hidden_channels)
    # bf16 matmul operands (f32 accumulation) -> loosened tolerance vs f32 ref
    assert jnp.allclose(out, ref, atol=2e-2, rtol=2e-2), (
        "mismatch vs reference, max abs diff = %f" % float(jnp.max(jnp.abs(out - ref))))
    print("KERNEL_OK")
</pallas_src>

<mosaic_0001>
module attributes {stable_mosaic.version = 11 : i64} {
  func.func @interaction_block_kernel(%arg0: i32, %arg1: memref<128xi32, #tpu.memory_space<smem>>, %arg2: memref<128xi32, #tpu.memory_space<smem>>, %arg3: memref<8x128xbf16, #tpu.memory_space<vmem>>, %arg4: memref<128x1xf32, #tpu.memory_space<vmem>>, %arg5: memref<128x128xbf16, #tpu.memory_space<vmem>>, %arg6: memref<128x128xbf16, #tpu.memory_space<vmem>>, %arg7: memref<1x128xf32, #tpu.memory_space<vmem>>, %arg8: memref<128x128xbf16, #tpu.memory_space<vmem>>, %arg9: memref<1x128xf32, #tpu.memory_space<vmem>>, %arg10: memref<128x128xbf16, #tpu.memory_space<vmem>>, %arg11: memref<128x128xbf16, #tpu.memory_space<vmem>>, %arg12: memref<1x128xf32, #tpu.memory_space<vmem>>, %arg13: memref<128x128xbf16, #tpu.memory_space<vmem>>, %arg14: memref<1x128xf32, #tpu.memory_space<vmem>>, %arg15: memref<8x128xf32, #tpu.memory_space<vmem>>, %arg16: memref<8x128xf32, #tpu.memory_space<vmem>>, %arg17: memref<8x128xf32, #tpu.memory_space<vmem>>, %arg18: memref<128x128xf32, #tpu.memory_space<vmem>>) attributes {dimension_semantics = [#tpu.dimension_semantics<arbitrary>], iteration_bounds = array<i64: 1>, scalar_prefetch = 2 : i64, scratch_operands = 3 : i64, tpu.core_type = #tpu.core_type<tc>, window_params = [{pipeline_mode = #tpu.pipeline_mode<synchronous>, transform_indices = @transform_0, window_bounds = array<i64: 8, 128>}, {transform_indices = @transform_1, window_bounds = array<i64: 128, 1>}, {transform_indices = @transform_2, window_bounds = array<i64: 128, 128>}, {pipeline_mode = #tpu.pipeline_mode<synchronous>, transform_indices = @transform_3, window_bounds = array<i64: 128, 128>}, {pipeline_mode = #tpu.pipeline_mode<synchronous>, transform_indices = @transform_4, window_bounds = array<i64: 1, 128>}, {pipeline_mode = #tpu.pipeline_mode<synchronous>, transform_indices = @transform_5, window_bounds = array<i64: 128, 128>}, {pipeline_mode = #tpu.pipeline_mode<synchronous>, transform_indices = @transform_6, window_bounds = array<i64: 1, 128>}, {pipeline_mode = #tpu.pipeline_mode<synchronous>, transform_indices = @transform_7, window_bounds = array<i64: 128, 128>}, {pipeline_mode = #tpu.pipeline_mode<synchronous>, transform_indices = @transform_8, window_bounds = array<i64: 128, 128>}, {pipeline_mode = #tpu.pipeline_mode<synchronous>, transform_indices = @transform_9, window_bounds = array<i64: 1, 128>}, {pipeline_mode = #tpu.pipeline_mode<synchronous>, transform_indices = @transform_10, window_bounds = array<i64: 128, 128>}, {pipeline_mode = #tpu.pipeline_mode<synchronous>, transform_indices = @transform_11, window_bounds = array<i64: 1, 128>}, {pipeline_mode = #tpu.pipeline_mode<synchronous>, transform_indices = @transform_12, window_bounds = array<i64: 8, 128>}]} {
    %c0_i32 = arith.constant 0 : i32
    %0 = arith.cmpi eq, %arg0, %c0_i32 : i32
    %1 = arith.extui %0 : i1 to i32
    %c0_i32_0 = arith.constant 0 : i32
    %2 = arith.cmpi ne, %1, %c0_i32_0 : i32
    scf.if %2 {
      %c0_26 = arith.constant 0 : index
      %c0_27 = arith.constant 0 : index
      %55 = vector.load %arg3[%c0_26, %c0_27] : memref<8x128xbf16, #tpu.memory_space<vmem>>, vector<8x128xbf16>
      %c0_28 = arith.constant 0 : index
      %c0_29 = arith.constant 0 : index
      %56 = vector.load %arg10[%c0_28, %c0_29] : memref<128x128xbf16, #tpu.memory_space<vmem>>, vector<128x128xbf16>
      %cst_30 = arith.constant dense<0.000000e+00> : vector<8x128xf32>
      %57 = tpu.matmul %55, %56, %cst_30 {dimension_numbers = #tpu.dot_dimension_numbers<[1], [0], [0], [1], [0, 0, 1, 1], [], []>} : vector<8x128xbf16>, vector<128x128xbf16>, vector<8x128xf32> -> vector<8x128xf32>
      %c0_31 = arith.constant 0 : index
      %c0_32 = arith.constant 0 : index
      %58 = vector.load %arg16[%c0_31, %c0_32] : memref<8x128xf32, #tpu.memory_space<vmem>>, vector<8x128xf32>
      tpu.vector_store %arg16[%c0_31, %c0_32], %57 {strides = array<i32>} : memref<8x128xf32, #tpu.memory_space<vmem>>, vector<8x128xf32>,
      %cst_33 = arith.constant 0.000000e+00 : f32
      %59 = vector.broadcast %cst_33 : f32 to vector<8x128xf32>
      %c0_34 = arith.constant 0 : index
      %c0_35 = arith.constant 0 : index
      %60 = vector.load %arg17[%c0_34, %c0_35] : memref<8x128xf32, #tpu.memory_space<vmem>>, vector<8x128xf32>
      tpu.vector_store %arg17[%c0_34, %c0_35], %59 {strides = array<i32>} : memref<8x128xf32, #tpu.memory_space<vmem>>, vector<8x128xf32>,
    } else {
    }
    %c0 = arith.constant 0 : index
    %c0_1 = arith.constant 0 : index
    %3 = vector.load %arg5[%c0, %c0_1] : memref<128x128xbf16, #tpu.memory_space<vmem>>, vector<128x128xbf16>
    %c0_2 = arith.constant 0 : index
    %c0_3 = arith.constant 0 : index
    %4 = vector.load %arg6[%c0_2, %c0_3] : memref<128x128xbf16, #tpu.memory_space<vmem>>, vector<128x128xbf16>
    %cst = arith.constant dense<0.000000e+00> : vector<128x128xf32>
    %5 = tpu.matmul %3, %4, %cst {dimension_numbers = #tpu.dot_dimension_numbers<[1], [0], [0], [1], [0, 0, 1, 1], [], []>} : vector<128x128xbf16>, vector<128x128xbf16>, vector<128x128xf32> -> vector<128x128xf32>
    %c0_4 = arith.constant 0 : index
    %c0_5 = arith.constant 0 : index
    %6 = vector.load %arg7[%c0_4, %c0_5] : memref<1x128xf32, #tpu.memory_space<vmem>>, vector<1x128xf32>
    %7 = vector.broadcast %6 : vector<1x128xf32> to vector<128x128xf32>
    %8 = arith.addf %5, %7 : vector<128x128xf32>
    %cst_6 = arith.constant 0.000000e+00 : f32
    %9 = vector.broadcast %cst_6 : f32 to vector<128x128xf32>
    %10 = arith.maximumf %8, %9 : vector<128x128xf32>
    %11 = vector.broadcast %cst_6 : f32 to vector<128x128xf32>
    %12 = arith.subf %8, %11 : vector<128x128xf32>
    %13 = arith.cmpf one, %12, %12 : vector<128x128xf32>
    %14 = vector.broadcast %cst_6 : f32 to vector<128x128xf32>
    %15 = arith.addf %8, %14 : vector<128x128xf32>
    %16 = math.absf %12 : vector<128x128xf32>
    %cst_7 = arith.constant 0.000000e+00 : f32
    %17 = vector.broadcast %cst_7 : f32 to vector<128x128xf32>
    %18 = arith.subf %17, %16 : vector<128x128xf32>
    %19 = math.exp %18 : vector<128x128xf32>
    %20 = math.log1p %19 : vector<128x128xf32>
    %21 = arith.addf %10, %20 : vector<128x128xf32>
    %22 = arith.select %13, %15, %21 : vector<128x128xi1>, vector<128x128xf32>
    %cst_8 = arith.constant 0.693147182 : f32
    %23 = vector.broadcast %cst_8 : f32 to vector<128x128xf32>
    %24 = arith.subf %22, %23 : vector<128x128xf32>
    %25 = arith.truncf %24 : vector<128x128xf32> to vector<128x128xbf16>
    %c0_9 = arith.constant 0 : index
    %c0_10 = arith.constant 0 : index
    %26 = vector.load %arg8[%c0_9, %c0_10] : memref<128x128xbf16, #tpu.memory_space<vmem>>, vector<128x128xbf16>
    %cst_11 = arith.constant dense<0.000000e+00> : vector<128x128xf32>
    %27 = tpu.matmul %25, %26, %cst_11 {dimension_numbers = #tpu.dot_dimension_numbers<[1], [0], [0], [1], [0, 0, 1, 1], [], []>} : vector<128x128xbf16>, vector<128x128xbf16>, vector<128x128xf32> -> vector<128x128xf32>
    %c0_12 = arith.constant 0 : index
    %c0_13 = arith.constant 0 : index
    %28 = vector.load %arg9[%c0_12, %c0_13] : memref<1x128xf32, #tpu.memory_space<vmem>>, vector<1x128xf32>
    %29 = vector.broadcast %28 : vector<1x128xf32> to vector<128x128xf32>
    %30 = arith.addf %27, %29 : vector<128x128xf32>
    %c0_14 = arith.constant 0 : index
    %c0_15 = arith.constant 0 : index
    %31 = vector.load %arg4[%c0_14, %c0_15] : memref<128x1xf32, #tpu.memory_space<vmem>>, vector<128x1xf32>
    %cst_16 = arith.constant 0.314159274 : f32
    %32 = vector.broadcast %cst_16 : f32 to vector<128x1xf32>
    %33 = arith.mulf %31, %32 : vector<128x1xf32>
    %34 = math.cos %33 : vector<128x1xf32>
    %cst_17 = arith.constant 1.000000e+00 : f32
    %35 = vector.broadcast %cst_17 : f32 to vector<128x1xf32>
    %36 = arith.addf %34, %35 : vector<128x1xf32>
    %cst_18 = arith.constant 5.000000e-01 : f32
    %37 = vector.broadcast %cst_18 : f32 to vector<128x1xf32>
    %38 = arith.mulf %37, %36 : vector<128x1xf32>
    %c128_i32 = arith.constant 128 : i32
    %39 = arith.muli %arg0, %c128_i32 : i32
    %40 = tpu.iota {dimensions = array<i32: 0>} : vector<128x1xi32>
    %41 = vector.broadcast %39 : i32 to vector<128x1xi32>
    %42 = arith.addi %41, %40 : vector<128x1xi32>
    %c16_i32 = arith.constant 16 : i32
    %43 = vector.broadcast %c16_i32 : i32 to vector<128x1xi32>
    %44 = arith.cmpi slt, %42, %43 : vector<128x1xi32>
    %45 = arith.extui %44 : vector<128x1xi1> to vector<128x1xi32>
    %46 = arith.sitofp %45 : vector<128x1xi32> to vector<128x1xf32>
    %47 = arith.mulf %38, %46 : vector<128x1xf32>
    %48 = vector.broadcast %47 : vector<128x1xf32> to vector<128x128xf32>
    %49 = arith.mulf %30, %48 : vector<128x128xf32>
    %c0_19 = arith.constant 0 : index
    %c0_20 = arith.constant 0 : index
    %50 = vector.load %arg18[%c0_19, %c0_20] : memref<128x128xf32, #tpu.memory_space<vmem>>, vector<128x128xf32>
    tpu.vector_store %arg18[%c0_19, %c0_20], %49 {strides = array<i32>} : memref<128x128xf32, #tpu.memory_space<vmem>>, vector<128x128xf32>,
    %c0_i32_21 = arith.constant 0 : i32
    %c128_i32_22 = arith.constant 128 : i32
    %51 = arith.addi %c0_i32_21, %c128_i32_22 : i32
    %c1_i32 = arith.constant 1 : i32
    scf.for %arg19 = %c0_i32_21 to %51 step %c1_i32  : i32 {
      %c128_i32_26 = arith.constant 128 : i32
      %55 = arith.muli %arg0, %c128_i32_26 : i32
      %56 = arith.addi %55, %arg19 : i32
      %57 = arith.index_cast %56 : i32 to index
      %58 = memref.load %arg1[%57] : memref<128xi32, #tpu.memory_space<smem>>
      %59 = arith.index_cast %56 : i32 to index
      %60 = memref.load %arg2[%59] : memref<128xi32, #tpu.memory_space<smem>>
      %61 = arith.index_cast %58 : i32 to index
      %c0_27 = arith.constant 0 : index
      %62 = vector.load %arg16[%61, %c0_27] : memref<8x128xf32, #tpu.memory_space<vmem>>, vector<1x128xf32>
      %63 = arith.index_cast %arg19 : i32 to index
      %c0_28 = arith.constant 0 : index
      %64 = vector.load %arg18[%63, %c0_28] : memref<128x128xf32, #tpu.memory_space<vmem>>, vector<1x128xf32>
      %65 = arith.mulf %62, %64 : vector<1x128xf32>
      %66 = arith.index_cast %60 : i32 to index
      %c0_29 = arith.constant 0 : index
      %67 = vector.load %arg17[%66, %c0_29] : memref<8x128xf32, #tpu.memory_space<vmem>>, vector<1x128xf32>
      %68 = arith.addf %67, %65 : vector<1x128xf32>
      %69 = arith.index_cast %60 : i32 to index
      %c0_30 = arith.constant 0 : index
      %70 = vector.load %arg17[%69, %c0_30] : memref<8x128xf32, #tpu.memory_space<vmem>>, vector<1x128xf32>
      tpu.vector_store %arg17[%69, %c0_30], %68 {strides = array<i32>} : memref<8x128xf32, #tpu.memory_space<vmem>>, vector<1x128xf32>,
    }
    %c128_i32_23 = arith.constant 128 : i32
    %c0_i32_24 = arith.constant 0 : i32
    %52 = arith.cmpi eq, %arg0, %c0_i32_24 : i32
    %53 = arith.extui %52 : i1 to i32
    %c0_i32_25 = arith.constant 0 : i32
    %54 = arith.cmpi ne, %53, %c0_i32_25 : i32
    scf.if %54 {
      %c0_26 = arith.constant 0 : index
      %c0_27 = arith.constant 0 : index
      %55 = vector.load %arg17[%c0_26, %c0_27] : memref<8x128xf32, #tpu.memory_space<vmem>>, vector<8x128xf32>
      %56 = arith.truncf %55 : vector<8x128xf32> to vector<8x128xbf16>
      %c0_28 = arith.constant 0 : index
      %c0_29 = arith.constant 0 : index
      %57 = vector.load %arg11[%c0_28, %c0_29] : memref<128x128xbf16, #tpu.memory_space<vmem>>, vector<128x128xbf16>
      %cst_30 = arith.constant dense<0.000000e+00> : vector<8x128xf32>
      %58 = tpu.matmul %56, %57, %cst_30 {dimension_numbers = #tpu.dot_dimension_numbers<[1], [0], [0], [1], [0, 0, 1, 1], [], []>} : vector<8x128xbf16>, vector<128x128xbf16>, vector<8x128xf32> -> vector<8x128xf32>
      %c0_31 = arith.constant 0 : index
      %c0_32 = arith.constant 0 : index
      %59 = vector.load %arg12[%c0_31, %c0_32] : memref<1x128xf32, #tpu.memory_space<vmem>>, vector<1x128xf32>
      %60 = vector.broadcast %59 : vector<1x128xf32> to vector<8x128xf32>
      %61 = arith.addf %58, %60 : vector<8x128xf32>
      %cst_33 = arith.constant 0.000000e+00 : f32
      %62 = vector.broadcast %cst_33 : f32 to vector<8x128xf32>
      %63 = arith.maximumf %61, %62 : vector<8x128xf32>
      %64 = vector.broadcast %cst_33 : f32 to vector<8x128xf32>
      %65 = arith.subf %61, %64 : vector<8x128xf32>
      %66 = arith.cmpf one, %65, %65 : vector<8x128xf32>
      %67 = vector.broadcast %cst_33 : f32 to vector<8x128xf32>
      %68 = arith.addf %61, %67 : vector<8x128xf32>
      %69 = math.absf %65 : vector<8x128xf32>
      %cst_34 = arith.constant 0.000000e+00 : f32
      %70 = vector.broadcast %cst_34 : f32 to vector<8x128xf32>
      %71 = arith.subf %70, %69 : vector<8x128xf32>
      %72 = math.exp %71 : vector<8x128xf32>
      %73 = math.log1p %72 : vector<8x128xf32>
      %74 = arith.addf %63, %73 : vector<8x128xf32>
      %75 = arith.select %66, %68, %74 : vector<8x128xi1>, vector<8x128xf32>
      %cst_35 = arith.constant 0.693147182 : f32
      %76 = vector.broadcast %cst_35 : f32 to vector<8x128xf32>
      %77 = arith.subf %75, %76 : vector<8x128xf32>
      %78 = arith.truncf %77 : vector<8x128xf32> to vector<8x128xbf16>
      %c0_36 = arith.constant 0 : index
      %c0_37 = arith.constant 0 : index
      %79 = vector.load %arg13[%c0_36, %c0_37] : memref<128x128xbf16, #tpu.memory_space<vmem>>, vector<128x128xbf16>
      %cst_38 = arith.constant dense<0.000000e+00> : vector<8x128xf32>
      %80 = tpu.matmul %78, %79, %cst_38 {dimension_numbers = #tpu.dot_dimension_numbers<[1], [0], [0], [1], [0, 0, 1, 1], [], []>} : vector<8x128xbf16>, vector<128x128xbf16>, vector<8x128xf32> -> vector<8x128xf32>
      %c0_39 = arith.constant 0 : index
      %c0_40 = arith.constant 0 : index
      %81 = vector.load %arg14[%c0_39, %c0_40] : memref<1x128xf32, #tpu.memory_space<vmem>>, vector<1x128xf32>
      %82 = vector.broadcast %81 : vector<1x128xf32> to vector<8x128xf32>
      %83 = arith.addf %80, %82 : vector<8x128xf32>
      %c0_41 = arith.constant 0 : index
      %c0_42 = arith.constant 0 : index
      %84 = vector.load %arg15[%c0_41, %c0_42] : memref<8x128xf32, #tpu.memory_space<vmem>>, vector<8x128xf32>
      tpu.vector_store %arg15[%c0_41, %c0_42], %83 {strides = array<i32>} : memref<8x128xf32, #tpu.memory_space<vmem>>, vector<8x128xf32>,
    } else {
    }
    return
  }
  func.func @transform_0(%arg0: i32, %arg1: memref<128xi32, #tpu.memory_space<smem>>, %arg2: memref<128xi32, #tpu.memory_space<smem>>) -> (i32, i32) {
    %c0_i32 = arith.constant 0 : i32
    %c0_i32_0 = arith.constant 0 : i32
    %c0_i32_1 = arith.constant 0 : i32
    return %c0_i32, %c0_i32_0 : i32, i32
  }
  func.func @transform_1(%arg0: i32, %arg1: memref<128xi32, #tpu.memory_space<smem>>, %arg2: memref<128xi32, #tpu.memory_space<smem>>) -> (i32, i32) {
    %c0_i32 = arith.constant 0 : i32
    %c0_i32_0 = arith.constant 0 : i32
    return %arg0, %c0_i32 : i32, i32
  }
  func.func @transform_2(%arg0: i32, %arg1: memref<128xi32, #tpu.memory_space<smem>>, %arg2: memref<128xi32, #tpu.memory_space<smem>>) -> (i32, i32) {
    %c0_i32 = arith.constant 0 : i32
    %c0_i32_0 = arith.constant 0 : i32
    return %arg0, %c0_i32 : i32, i32
  }
  func.func @transform_3(%arg0: i32, %arg1: memref<128xi32, #tpu.memory_space<smem>>, %arg2: memref<128xi32, #tpu.memory_space<smem>>) -> (i32, i32) {
    %c0_i32 = arith.constant 0 : i32
    %c0_i32_0 = arith.constant 0 : i32
    %c0_i32_1 = arith.constant 0 : i32
    return %c0_i32, %c0_i32_0 : i32, i32
  }
  func.func @transform_4(%arg0: i32, %arg1: memref<128xi32, #tpu.memory_space<smem>>, %arg2: memref<128xi32, #tpu.memory_space<smem>>) -> (i32, i32) {
    %c0_i32 = arith.constant 0 : i32
    %c0_i32_0 = arith.constant 0 : i32
    %c0_i32_1 = arith.constant 0 : i32
    return %c0_i32, %c0_i32_0 : i32, i32
  }
  func.func @transform_5(%arg0: i32, %arg1: memref<128xi32, #tpu.memory_space<smem>>, %arg2: memref<128xi32, #tpu.memory_space<smem>>) -> (i32, i32) {
    %c0_i32 = arith.constant 0 : i32
    %c0_i32_0 = arith.constant 0 : i32
    %c0_i32_1 = arith.constant 0 : i32
    return %c0_i32, %c0_i32_0 : i32, i32
  }
  func.func @transform_6(%arg0: i32, %arg1: memref<128xi32, #tpu.memory_space<smem>>, %arg2: memref<128xi32, #tpu.memory_space<smem>>) -> (i32, i32) {
    %c0_i32 = arith.constant 0 : i32
    %c0_i32_0 = arith.constant 0 : i32
    %c0_i32_1 = arith.constant 0 : i32
    return %c0_i32, %c0_i32_0 : i32, i32
  }
  func.func @transform_7(%arg0: i32, %arg1: memref<128xi32, #tpu.memory_space<smem>>, %arg2: memref<128xi32, #tpu.memory_space<smem>>) -> (i32, i32) {
    %c0_i32 = arith.constant 0 : i32
    %c0_i32_0 = arith.constant 0 : i32
    %c0_i32_1 = arith.constant 0 : i32
    return %c0_i32, %c0_i32_0 : i32, i32
  }
  func.func @transform_8(%arg0: i32, %arg1: memref<128xi32, #tpu.memory_space<smem>>, %arg2: memref<128xi32, #tpu.memory_space<smem>>) -> (i32, i32) {
    %c0_i32 = arith.constant 0 : i32
    %c0_i32_0 = arith.constant 0 : i32
    %c0_i32_1 = arith.constant 0 : i32
    return %c0_i32, %c0_i32_0 : i32, i32
  }
  func.func @transform_9(%arg0: i32, %arg1: memref<128xi32, #tpu.memory_space<smem>>, %arg2: memref<128xi32, #tpu.memory_space<smem>>) -> (i32, i32) {
    %c0_i32 = arith.constant 0 : i32
    %c0_i32_0 = arith.constant 0 : i32
    %c0_i32_1 = arith.constant 0 : i32
    return %c0_i32, %c0_i32_0 : i32, i32
  }
  func.func @transform_10(%arg0: i32, %arg1: memref<128xi32, #tpu.memory_space<smem>>, %arg2: memref<128xi32, #tpu.memory_space<smem>>) -> (i32, i32) {
    %c0_i32 = arith.constant 0 : i32
    %c0_i32_0 = arith.constant 0 : i32
    %c0_i32_1 = arith.constant 0 : i32
    return %c0_i32, %c0_i32_0 : i32, i32
  }
  func.func @transform_11(%arg0: i32, %arg1: memref<128xi32, #tpu.memory_space<smem>>, %arg2: memref<128xi32, #tpu.memory_space<smem>>) -> (i32, i32) {
    %c0_i32 = arith.constant 0 : i32
    %c0_i32_0 = arith.constant 0 : i32
    %c0_i32_1 = arith.constant 0 : i32
    return %c0_i32, %c0_i32_0 : i32, i32
  }
  func.func @transform_12(%arg0: i32, %arg1: memref<128xi32, #tpu.memory_space<smem>>, %arg2: memref<128xi32, #tpu.memory_space<smem>>) -> (i32, i32) {
    %c0_i32 = arith.constant 0 : i32
    %c0_i32_0 = arith.constant 0 : i32
    %c0_i32_1 = arith.constant 0 : i32
    return %c0_i32, %c0_i32_0 : i32, i32
  }
}

</mosaic_0001>

<bundles_post_ra>
// kernel: tpu_custom_call.1
= control target key start
LH: loop header
LB: loop body
LE: loop exit
PB: predicated region body
PF: predicated region fallthrough
CT: control target
= control target key end

     0   :  { %s5921_s0 = inlined_call_operand.hbm [shape: s32[128], index: 0, kind: input, shape index: {}]   ;;  %s5922_s2 = inlined_call_operand.vmem [shape: bf16[8,128], index: 2, kind: input, shape index: {}]   ;;  %s5923_s3 = inlined_call_operand.vmem [shape: f32[128,1], index: 3, kind: input, shape index: {}]   ;;  %s5924_s4 = inlined_call_operand.vmem [shape: bf16[128,128], index: 4, kind: input, shape index: {}]   ;;  %s5925_s5 = inlined_call_operand.vmem [shape: bf16[128,128], index: 5, kind: input, shape index: {}]   ;;  %s5926_s6 = inlined_call_operand.vmem [shape: f32[1,128], index: 6, kind: input, shape index: {}]   ;;  %s5927_s7 = inlined_call_operand.hbm [shape: bf16[128,128], index: 7, kind: input, shape index: {}]   ;;  %s5928_s8 = inlined_call_operand.vmem [shape: f32[1,128], index: 8, kind: input, shape index: {}]   ;;  %s5929_s9 = inlined_call_operand.hbm [shape: bf16[128,128], index: 9, kind: input, shape index: {}]   ;;  %s5930_s10 = inlined_call_operand.hbm [shape: bf16[128,128], index: 10, kind: input, shape index: {}]   ;;  %s5931_s11 = inlined_call_operand.vmem [shape: f32[1,128], index: 11, kind: input, shape index: {}]   ;;  %s5932_s12 = inlined_call_operand.hbm [shape: bf16[128,128], index: 12, kind: input, shape index: {}]   ;;  %s5933_s13 = inlined_call_operand.vmem [shape: f32[1,128], index: 13, kind: input, shape index: {}]   ;;  %s5934_s14 = inlined_call_operand.hbm [shape: f32[8,128], index: 14, kind: output, shape index: {}]   ;;  %s5935_s1 = inlined_call_operand.hbm [shape: s32[128], index: 1, kind: input, shape index: {}]  }
   0x1   :  { %s3731_s15 = scalar_lea.hbm %s5921_s0, 16 }
   0x2   :  { %p3732_p0 = scmp.ne.s32.totalorder %s5921_s0, %s3731_s15  ;;  %p3735_p1 = scmp.lt.u32.totalorder %s3731_s15, %s5921_s0 }
   0x4   :  { %p3737_p2 = pnand %p3735_p1, %p3732_p0 }
   0x6   :  { %3740 = shalt.err (!%p3737_p2)  }
   0x7   :  { %s3879_s20 = smov [#allocation6]   ;;  %s3741_s25 = scalar_lea.hbm %s5935_s1, 16 }
   0x8   :  { %20 = dma.hbm_to_smem %s5921_s0, 16, %s3879_s20, [#allocation5] }
   0x9   :  { %p3742_p3 = scmp.ne.s32.totalorder %s5935_s1, %s3741_s25  ;;  %p3745_p4 = scmp.lt.u32.totalorder %s3741_s25, %s5935_s1 }
   0xb   :  { %p3747_p5 = pnand %p3745_p4, %p3742_p3 }
   0xd   :  { %3750 = shalt.err (!%p3747_p5)  }
   0xe   :  { %s3880_s30 = smov [#allocation7]  }
   0xf   :  { %22 = dma.hbm_to_smem %s5935_s1, 16, %s3880_s30, [#allocation5] }
  0x10   :  { %3865 = dma.done.wait [#allocation5], 32 }
  0x11   :  { %3866 = vsyncadd [#allocation5], 4294967264 }
  0x12   :  { %24 = sfence }
  0x13   :  { %25 = vsyncpa [#allocation9], 0 }
  0x14   :  { %26 = vsyncpa [#allocation12], 0 }
  0x15   :  { %27 = vsyncpa [#allocation15], 0 }
  0x16   :  { %28 = vsyncpa [#allocation10], 0  ;;  %s3881_s0 = smov [#allocation11]   ;;  %s3882_s18 = smov [#allocation8]  }
  0x17   :  { %s58_s17 = sshll.u32 %s3881_s0, 4  ;;  %s44_s19 = sshll.u32 %s3882_s18, 4  ;;  %s59_s17 = int_to_ptr.vmem [resolvable:$true] %s58_s17  ;;  %s3996_s19 = int_to_ptr.vmem [resolvable:$true] %s44_s19 }
  0x18   :  { %s3751_s22 = scalar_lea.hbm %s5929_s9, 1024 }
  0x19   :  { %p3752_p6 = scmp.ne.s32.totalorder %s5929_s9, %s3751_s22  ;;  %p3755_p7 = scmp.lt.u32.totalorder %s3751_s22, %s5929_s9 }
  0x1b   :  { %p3757_p8 = pnand %p3755_p7, %p3752_p6 }
  0x1d   :  { %3760 = shalt.err (!%p3757_p8)
}
  0x1e   :  { %s3761_s26 = scalar_lea.vmem %s59_s17, 1024  ;;  %p3766_p10 = scmp.lt.s32.totalorder %s59_s17, %s59_s17 }
  0x1f   :  { %p3762_p9 = scmp.ne.s32.totalorder %s59_s17, %s3761_s26  ;;  %p3767_p11 = scmp.lt.s32.totalorder %s3761_s26, %s3761_s26 }
  0x21   :  { %p3768_p12 = por %p3767_p11, %p3766_p10 }
  0x23   :  { %p3769_p13 = pnand %p3768_p12, %p3762_p9 }
  0x25   :  { %3772 = shalt.err (!%p3769_p13)
}
  0x26   :  { %s3883_s27 = smov 64   ;;  %s3884_s28 = smov 4  }
  0x27   :  { %64 = dma.hbm_to_vmem [thread:$0]  %s5929_s9, 1024, %s59_s17, [#allocation12], %s3883_s27, %s3883_s27, %s3884_s28  }
  0x28   :  { %s3773_s0 = scalar_lea.hbm %s5927_s7, 1024 }
  0x29   :  { %p3774_p0 = scmp.ne.s32.totalorder %s5927_s7, %s3773_s0  ;;  %p3777_p1 = scmp.lt.u32.totalorder %s3773_s0, %s5927_s7 }
  0x2b   :  { %p3779_p2 = pnand %p3777_p1, %p3774_p0 }
  0x2d   :  { %3782 = shalt.err (!%p3779_p2)
}
  0x2e   :  { %s3783_s23 = scalar_lea.vmem %s3996_s19, 1024  ;;  %p3788_p4 = scmp.lt.s32.totalorder %s3996_s19, %s3996_s19 }
  0x2f   :  { %p3784_p3 = scmp.ne.s32.totalorder %s3996_s19, %s3783_s23  ;;  %p3789_p5 = scmp.lt.s32.totalorder %s3783_s23, %s3783_s23 }
  0x31   :  { %p3790_p6 = por %p3789_p5, %p3788_p4 }
  0x33   :  { %p3791_p7 = pnand %p3790_p6, %p3784_p3 }
  0x35   :  { %3794 = shalt.err (!%p3791_p7)
}
  0x36   :  { %50 = dma.hbm_to_vmem [thread:$0]  %s5927_s7, 1024, %s3996_s19, [#allocation9], %s3883_s27, %s3883_s27, %s3884_s28  }
  0x37   :  { %s3885_s1 = smov [#allocation13]   ;;  %s3886_s25 = smov [#allocation14]  }
  0x38   :  { %s70_s24 = sshll.u32 %s3885_s1, 4  ;;  %s84_s26 = sshll.u32 %s3886_s25, 4  ;;  %s71_s24 = int_to_ptr.vmem [resolvable:$true] %s70_s24  ;;  %s4033_s26 = int_to_ptr.vmem [resolvable:$true] %s84_s26 }
  0x39   :  { %s3795_s15 = scalar_lea.hbm %s5930_s10, 1024 }
  0x3a   :  { %p3796_p8 = scmp.ne.s32.totalorder %s5930_s10, %s3795_s15  ;;  %p3799_p9 = scmp.lt.u32.totalorder %s3795_s15, %s5930_s10 }
  0x3c   :  { %p3801_p10 = pnand %p3799_p9, %p3796_p8 }
  0x3e   :  { %3804 = shalt.err (!%p3801_p10)
}
  0x3f   :  { %s3805_s7 = scalar_lea.vmem %s71_s24, 1024  ;;  %p3810_p12 = scmp.lt.s32.totalorder %s71_s24, %s71_s24 }
  0x40   :  { %p3806_p11 = scmp.ne.s32.totalorder %s71_s24, %s3805_s7  ;;  %p3811_p13 = scmp.lt.s32.totalorder %s3805_s7, %s3805_s7 }
  0x42   :  { %p3812_p0 = por %p3811_p13, %p3810_p12 }
  0x44   :  { %p3813_p1 = pnand %p3812_p0, %p3806_p11 }
  0x46   :  { %3816 = shalt.err (!%p3813_p1)
}
  0x47   :  { %76 = dma.hbm_to_vmem [thread:$0]  %s5930_s10, 1024, %s71_s24, [#allocation12], %s3883_s27, %s3883_s27, %s3884_s28  }
  0x48   :  { %s3817_s9 = scalar_lea.hbm %s5932_s12, 1024 }
  0x49   :  { %p3818_p2 = scmp.ne.s32.totalorder %s5932_s12, %s3817_s9  ;;  %p3821_p3 = scmp.lt.u32.totalorder %s3817_s9, %s5932_s12 }
  0x4b   :  { %p3823_p4 = pnand %p3821_p3, %p3818_p2 }
  0x4d   :  { %3826 = shalt.err (!%p3823_p4)
}
  0x4e   :  { %s3827_s30 = scalar_lea.vmem %s4033_s26, 1024  ;;  %p3832_p6 = scmp.lt.s32.totalorder %s4033_s26, %s4033_s26 }
  0x4f   :  { %p3828_p5 = scmp.ne.s32.totalorder %s4033_s26, %s3827_s30  ;;  %p3833_p7 = scmp.lt.s32.totalorder %s3827_s30, %s3827_s30 }
  0x51   :  { %p3834_p8 = por %p3833_p7, %p3832_p6 }
  0x53   :  { %p3835_p9 = pnand %p3834_p8, %p3828_p5 }
  0x55   :  { %3838 = shalt.err (!%p3835_p9)
}
  0x56   :  { %90 = dma.hbm_to_vmem [thread:$0]  %s5932_s12, 1024, %s4033_s26, [#allocation15], %s3883_s27, %s3883_s27, %s3884_s28  }
  0x57   :  { %3867 = dma.done.wait [#allocation9], 1024  }
  0x58   :  { %3868 = vsyncadd [#allocation9], 4294966272 }
  0x59   :  { %3869 = dma.done.wait [#allocation12], 2048  }
  0x5a   :  { %3870 = vsyncadd [#allocation12], 4294965248 }
  0x5b   :  { %3871 = dma.done.wait [#allocation15], 1024  }
  0x5c   :  { %3872 = vsyncadd [#allocation15], 4294966272  ;;  %v5936_v0 = vmov 0.0   ;;  %v3551_v1 = vld [vmem:[%s5925_s5] sm:$0xff]   ;;  %v3552_v2 = vld [vmem:[%s5925_s5 + $0x8] sm:$0xff]   ;;  %vm3888_vm0 = vmmov 0  }
  0x5d   :  { %3335 = vmatprep.subr.bf16.mxu0 %v5936_v0  ;;  %216 = vst [vmem:[#allocation3] sm:$0xff] %v5936_v0  ;;  %3355 = vmatprep.subr.bf16.mxu1 %v3551_v1  ;;  %v3553_v3 = vld [vmem:[%s5925_s5 + $0x10] sm:$0xff]   ;;  %v3554_v4 = vld [vmem:[%s5925_s5 + $0x18] sm:$0xff]   ;;  %v3559_v5 = vld [vmem:[%s5924_s4] sm:$0xff]   ;;  %v5945_v55 = vmov 2102212464  }
  0x5e   :  { %3356 = vmatpush3.bf16.msra.mxu1 %v3551_v1  ;;  %3371 = vmatprep.mubr.bf16.mxu1 %v3559_v5  ;;  %v3555_v6 = vld [vmem:[%s5925_s5 + $0x20] sm:$0xff]   ;;  %v3556_v7 = vld [vmem:[%s5925_s5 + $0x28] sm:$0xff]   ;;  %v3567_v8 = vld [vmem:[#allocation11] sm:$0xff]   ;;  %v5941_v59 = vmov 683565275  }
  0x5f   :  { %3357 = vmatprep.subr.bf16.mxu1 %v3552_v2  ;;  %3336 = vmatpush3.bf16.msra.mxu0 %v3567_v8  ;;  %v3568_v9 = vld [vmem:[#allocation11 + $0x8] sm:$0xff]   ;;  %v3557_v10 = vld [vmem:[%s5925_s5 + $0x30] sm:$0xff]   ;;  %v3569_v11 = vld [vmem:[#allocation11 + $0x10] sm:$0xff]   ;;  %v5949_v61 = vmov 2475754826  }
  0x60   :  { %3337 = vmatprep.subr.bf16.mxu0 %v5936_v0  ;;  %v3558_v12 = vld [vmem:[%s5925_s5 + $0x38] sm:$0xff]   ;;  %v3570_v13 = vld [vmem:[#allocation11 + $0x18] sm:$0xff]   ;;  %v3571_v15 = vld [vmem:[#allocation11 + $0x20] sm:$0xff]   ;;  %3351 = vmatprep.mubr.msk.bf16.mxu0 %vm3888_vm0, %v5936_v0  ;;  %v5947_v1 = vmov 2131351028  }
  0x61   :  { %v3560_v14 = vld [vmem:[%s5924_s4 + $0x8] sm:$0xff]   ;;  %v3561_v16 = vld [vmem:[%s5924_s4 + $0x10] sm:$0xff]   ;;  %v3562_v17 = vld [vmem:[%s5924_s4 + $0x18] sm:$0xff]  }
  0x62   :  { %3358 = vmatpush3.bf16.msra.mxu1 %v3552_v2  ;;  %v3563_v18 = vld [vmem:[%s5924_s4 + $0x20] sm:$0xff]   ;;  %v3564_v19 = vld [vmem:[%s5924_s4 + $0x28] sm:$0xff]   ;;  %v3565_v20 = vld [vmem:[%s5924_s4 + $0x30] sm:$0xff]  }
  0x63   :  { %3359 = vmatprep.subr.bf16.mxu1 %v3553_v3  ;;  %3338 = vmatpush3.bf16.msra.mxu0 %v3568_v9  ;;  %v3566_v21 = vld [vmem:[%s5924_s4 + $0x38] sm:$0xff]   ;;  %v3573_v23 = vld [vmem:[#allocation11 + $0x30] sm:$0xff]   ;;  %v3574_v24 = vld [vmem:[#allocation11 + $0x38] sm:$0xff]  }
  0x64   :  { %3339 = vmatprep.subr.bf16.mxu0 %v5936_v0  ;;  %v3572_v22 = vld [vmem:[#allocation11 + $0x28] sm:$0xff]   ;;  %v110_v25 = vld [vmem:[%s5922_s2] sm:$0xf]  ;;  %v3575_v26 = vld [vmem:[#allocation8] sm:$0xff]  }
  0x65   :  { %v3576_v27 = vld [vmem:[#allocation8 + $0x8] sm:$0xff]   ;;  %v3577_v28 = vld [vmem:[#allocation8 + $0x10] sm:$0xff]   ;;  %v3578_v29 = vld [vmem:[#allocation8 + $0x18] sm:$0xff]  }
  0x66   :  { %3360 = vmatpush3.bf16.msra.mxu1 %v3553_v3  ;;  %v3579_v30 = vld [vmem:[#allocation8 + $0x20] sm:$0xff]   ;;  %v3580_v31 = vld [vmem:[#allocation8 + $0x28] sm:$0xff]   ;;  %v3581_v32 = vld [vmem:[#allocation8 + $0x30] sm:$0xff]  }
  0x67   :  { %3361 = vmatprep.subr.bf16.mxu1 %v3554_v4  ;;  %3340 = vmatpush3.bf16.msra.mxu0 %v3569_v11  ;;  %v931_v33 = vld [vmem:[%s5923_s3 + $0x10] sm:$0xff]  ;;  %v929_v35 = vld [vmem:[%s5923_s3] sm:$0xff]  ;;  %v3582_v36 = vld [vmem:[#allocation8 + $0x38] sm:$0xff]   ;;  %v5939_v11 = vmov 1326507024  }
  0x68   :  { %3341 = vmatprep.subr.bf16.mxu0 %v5936_v0  ;;  %v4135_v34 = vmul.f32 0.31415927, %v931_v33  ;;  %v4141_v38 = vmul.f32 0.31415927, %v929_v35  ;;  %v932_v39 = vld [vmem:[%s5923_s3 + $0x18] sm:$0xff] }
  0x69   :  { %v4147_v44 = vmul.f32 0.31415927, %v932_v39 }
  0x6a   :  { %3362 = vmatpush3.bf16.msra.mxu1 %v3554_v4  ;;  %v1170_v37 = vand.u32 2139095040, %v4135_v34  ;;  %v964_v41 = vand.u32 2139095040, %v4141_v38  ;;  %v1167_v54 = vand.u32 2147483647, %v4135_v34  ;;  %v961_v35 = vand.u32 2147483647, %v4141_v38 }
  0x6b   :  { %3363 = vmatprep.subr.bf16.mxu1 %v3555_v6  ;;  %3342 = vmatpush3.bf16.msra.mxu0 %v3570_v13  ;;  %5960 = vst [vmem:[#allocation22_spill] sm:$0xff] %v4147_v44  ;;  %v1273_v48 = vand.u32 2139095040, %v4147_v44  ;;  %vm1169_vm15 = vcmp.lt.s32.totalorder %v4135_v34, 0 }
  0x6c   :  { %3343 = vmatprep.subr.bf16.mxu0 %v5936_v0  ;;  %v1171_v40 = vshrl.u32 %v1170_v37, 23  ;;  %v965_v43 = vshrl.u32 %v964_v41, 23  ;;  %v1174_v57 = vand.u32 8388607, %v1167_v54  ;;  %vm4223_vm14 = vcmp.le.f32.partialorder %v1167_v54, 0.7853982 }
  0x6d   :  { %v1274_v53 = vshrl.u32 %v1273_v48, 23 }
  0x6e   :  { %3364 = vmatpush3.bf16.msra.mxu1 %v3555_v6  ;;  %v3201_v42 = vadd.s32 4294967169, %v1171_v40  ;;  %v3193_v46 = vadd.s32 4294967169, %v965_v43  ;;  %v1175_v4 = vor.u32 8388608, %v1174_v57  ;;  %v5943_v6 = vmov 920167782  }
  0x6f   :  { %3365 = vmatprep.subr.bf16.mxu1 %v3556_v7  ;;  %3344 = vmatpush3.bf16.msra.mxu0 %v3571_v15 }
  0x70   :  { %3345 = vmatprep.subr.bf16.mxu0 %v5936_v0  ;;  %v1177_v45 = vadd.s32 1, %v3201_v42  ;;  %v971_v47 = vadd.s32 1, %v3193_v46 }
  0x72   :  { %3366 = vmatpush3.bf16.msra.mxu1 %v3556_v7  ;;  %vm1178_vm1 = vcmp.gt.s32.totalorder %v1177_v45, 0  ;;  %vm972_vm2 = vcmp.gt.s32.totalorder %v971_v47, 0 }
  0x73   :  { %3367 = vmatprep.subr.bf16.mxu1 %v3557_v10  ;;  %3346 = vmatpush3.bf16.msra.mxu0 %v3572_v22  ;;  %v1179_v49 = vsel %vm1178_vm1, %v1177_v45, 0  ;;  %v973_v52 = vsel %vm972_vm2, %v971_v47, 0 }
  0x74   :  { %3347 = vmatprep.subr.bf16.mxu0 %v5936_v0  ;;  %v1181_v50 = vand.u32 31, %v1179_v49  ;;  %v1180_v58 = vshrl.u32 %v1179_v49, 5  ;;  %v975_v15 = vand.u32 31, %v973_v52 }
  0x76   :  { %3368 = vmatpush3.bf16.msra.mxu1 %v3557_v10  ;;  %v1182_v51 = vsub.s32 32, %v1181_v50  ;;  %v1193_v56 = vshll.u32 %v5945_v55, %v1181_v50  ;;  %v1184_v60 = vshll.u32 %v5941_v59, %v1181_v50  ;;  %v1187_v63 = vshll.u32 %v5949_v61, %v1181_v50 }
  0x77   :  { %3369 = vmatprep.subr.bf16.mxu1 %v3558_v12  ;;  %3348 = vmatpush3.bf16.msra.mxu0 %v3573_v23  ;;  %v1190_v3 = vshll.u32 %v5947_v1, %v1181_v50  ;;  %v1196_v8 = vshll.u32 %v5943_v6, %v1181_v50  ;;  %vm1199_vm3 = vcmp.lt.s32.totalorder %v1180_v58, 1  ;;  %vm1201_vm4 = vcmp.lt.s32.totalorder %v1180_v58, 3 }
  0x78   :  { %3349 = vmatprep.subr.bf16.mxu0 %v5936_v0  ;;  %v1185_v62 = vshrl.u32 %v5949_v61, %v1182_v51  ;;  %v1188_v2 = vshrl.u32 %v5947_v1, %v1182_v51  ;;  %v1191_v5 = vshrl.u32 %v5945_v55, %v1182_v51  ;;  %v1194_v7 = vshrl.u32 %v5943_v6, %v1182_v51 }
  0x79   :  { %vm1200_vm5 = vcmp.lt.s32.totalorder %v1180_v58, 2  ;;  %vm1202_vm6 = vcmp.lt.s32.totalorder %v1180_v58, 4  ;;  %v978_v41 = vshll.u32 %v5941_v59, %v975_v15  ;;  %v981_v43 = vshll.u32 %v5949_v61, %v975_v15 }
  0x7a   :  { %3370 = vmatpush3.bf16.msra.mxu1 %v3558_v12  ;;  %v1186_v9 = vor.u32 %v1185_v62, %v1184_v60  ;;  %v1189_v10 = vor.u32 %v1188_v2, %v1187_v63  ;;  %v1197_v12 = vshrl.u32 %v5939_v11, %v1182_v51  ;;  %v1192_v13 = vor.u32 %v1191_v5, %v1190_v3 }
  0x7b   :  { %3350 = vmatpush3.bf16.msra.mxu0 %v3574_v24  ;;  %v984_v46 = vshll.u32 %v5947_v1, %v975_v15  ;;  %v987_v48 = vshll.u32 %v5945_v55, %v975_v15  ;;  %v990_v50 = vshll.u32 %v5943_v6, %v975_v15  ;;  %v3895_v60 = vmov 0  }
  0x7c   :  { %3387 = vmatprep.subr.bf16.mxu0 %v3575_v26  ;;  %v1204_v24 = vsel %vm1202_vm6, %v1192_v13, 2102212464  ;;  %3550 = vset.pattern.permute.xlu1 %v3895_v60 }
  0x7d   :  { %3372 = vmatmul.mubr.bf16.vlgmr.msra.gmra.mrb[0].mxu1 %v3560_v14  ;;  %v1195_v14 = vor.u32 %v1194_v7, %v1193_v56  ;;  %3549 = vset.pattern.permute.xlu0 %v3895_v60 }
  0x7e   :  { %3375 = vmatprep.mubr.bf16.mxu1 %v3561_v16  ;;  %3352 = vmatmul.mubr.bf16.vlgmr.msra.gmra.mrb[0].mxu0 %v110_v25  ;;  %v1198_v16 = vor.u32 %v1197_v12, %v1196_v8 }
  0x7f   :  { %3388 = vmatpush3.bf16.msra.mxu0 %v3575_v26 }
  0x80   :  { %3389 = vmatprep.subr.bf16.mxu0 %v3576_v27  ;;  %v1212_v23 = vsel %vm1202_vm6, %v1198_v16, 1326507024 }
  0x81   :  { %v1213_v26 = vsel %vm1201_vm4, %v1195_v14, %v1212_v23 }
  0x83   :  { %3390 = vmatpush3.bf16.msra.mxu0 %v3576_v27  ;;  %v976_v27 = vsub.s32 32, %v975_v15 }
  0x84   :  { %3391 = vmatprep.subr.bf16.mxu0 %v3577_v28 }
  0x85   :  { %3376 = vmatmul.mubr.bf16.gmra.mrb[4].mxu1 %v3562_v17  ;;  %v1207_v17 = vsel %vm1199_vm3, %v1186_v9, %v1189_v10  ;;  %v979_v42 = vshrl.u32 %v5949_v61, %v976_v27  ;;  %v982_v45 = vshrl.u32 %v5947_v1, %v976_v27  ;;  %v985_v47 = vshrl.u32 %v5945_v55, %v976_v27 }
  0x86   :  { %3379 = vmatprep.mubr.bf16.mxu1 %v3563_v18  ;;  %v1208_v18 = vsel %vm1202_vm6, %v1195_v14, 920167782  ;;  %v988_v49 = vshrl.u32 %v5943_v6, %v976_v27  ;;  %v991_v56 = vshrl.u32 %v5939_v11, %v976_v27  ;;  %v977_v63 = vshrl.u32 %v5941_v59, %v976_v27 }
  0x87   :  { %3392 = vmatpush3.bf16.msra.mxu0 %v3577_v28  ;;  %v1209_v22 = vsel %vm1201_vm4, %v1192_v13, %v1208_v18  ;;  %v980_v57 = vor.u32 %v979_v42, %v978_v41  ;;  %v983_v58 = vor.u32 %v982_v45, %v981_v43 }
  0x88   :  { %3393 = vmatprep.subr.bf16.mxu0 %v3578_v29  ;;  %v1210_v25 = vsel %vm1200_vm5, %v1207_v17, %v1209_v22  ;;  %v989_v5 = vor.u32 %v988_v49, %v987_v48  ;;  %v992_v7 = vor.u32 %v991_v56, %v990_v50 }
  0x8b   :  { %3394 = vmatpush3.bf16.msra.mxu0 %v3578_v29  ;;  %v1205_v29 = vsel %vm1201_vm4, %v1189_v10, %v1204_v24  ;;  %vm4252_vm4 = vcmp.le.f32.partialorder %v961_v35, 0.7853982 }
  0x8c   :  { %3395 = vmatprep.subr.bf16.mxu0 %v3579_v30 }
  0x8d   :  { %3380 = vmatmul.mubr.bf16.gmra.mrb[8].mxu1 %v3564_v19  ;;  %v1211_v19 = vsel %vm1199_vm3, %v1189_v10, %v1192_v13 }
  0x8e   :  { %3383 = vmatprep.mubr.bf16.mxu1 %v3565_v20  ;;  %v1215_v20 = vshll.u32 %v1175_v4, 8  ;;  %v986_v4 = vor.u32 %v985_v47, %v984_v46 }
  0x8f   :  { %3396 = vmatpush3.bf16.msra.mxu0 %v3579_v30  ;;  %v1214_v30 = vsel %vm1200_vm5, %v1211_v19, %v1213_v26 }
  0x90   :  { %3397 = vmatprep.subr.bf16.mxu0 %v3580_v31  ;;  %v4177_v39 = vmul.u32.u64.low %v1215_v20, %v1210_v25  ;;  %v4178_v40 = vmul.u32.u64.high %v1215_v20, %v1210_v25, %v4177_v39 }
  0x92   :  { %v1225_v62 = vadd.s32 1, %v4178_v40 }
  0x93   :  { %3398 = vmatpush3.bf16.msra.mxu0 %v3580_v31  ;;  %v3205_v31 = vadd.s32 4294967169, %v1274_v53  ;;  %v968_v53 = vand.u32 8388607, %v961_v35 }
  0x94   :  { %3399 = vmatprep.subr.bf16.mxu0 %v3581_v32 }
  0x95   :  { %3384 = vmatmul.mubr.bf16.gmra.mrb[12].mxu1 %v3566_v21  ;;  %v1183_v21 = vshrl.u32 %v5941_v59, %v1182_v51  ;;  %v930_v51 = vld [vmem:[%s5923_s3 + $0x8] sm:$0xff]  ;;  %v1280_v2 = vadd.s32 1, %v3205_v31 }
  0x96   :  { %v4200_v3 = vmul.f32 0.31415927, %v930_v51  ;;  %v5938_v51 = vand.u32 2147483647, %v4147_v44 }
  0x97   :  { %3400 = vmatpush3.bf16.msra.mxu0 %v3581_v32  ;;  %v1203_v28 = vsel %vm1199_vm3, %v1183_v21, %v1186_v9  ;;  %v4172_v32 = vmul.u32.u64.low %v1215_v20, %v1214_v30  ;;  %v4173_v33 = vmul.u32.u64.high %v1215_v20, %v1214_v30, %v4172_v32  ;;  %v969_v9 = vor.u32 8388608, %v968_v53 }
  0x98   :  { %3401 = vmatprep.subr.bf16.mxu0 %v3582_v36  ;;  %v1206_v37 = vsel %vm1200_vm5, %v1203_v28, %v1205_v29  ;;  %5961 = vst [vmem:[#allocation23_spill] sm:$0xff] %v4200_v3  ;;  %v1067_v17 = vand.u32 2139095040, %v4200_v3  ;;  %vm1281_vm12 = vcmp.gt.s32.totalorder %v1280_v2, 0  ;;  %vm963_vm3 = vcmp.lt.s32.totalorder %v4141_v38, 0 }
  0x99   :  { %vm1224_vm7 = vc.u32 %v4173_v33, %v4177_v39  ;;  %v1009_v25 = vshll.u32 %v969_v9, 8  ;;  %v1282_v41 = vsel %vm1281_vm12, %v1280_v2, 0  ;;  %v4232_v2 = vand.u32 8388607, %v5938_v51 }
  0x9a   :  { %v1226_v8 = vsel %vm1224_vm7, %v1225_v62, %v4178_v40  ;;  %v1284_v47 = vand.u32 31, %v1282_v41 }
  0x9b   :  { %3402 = vmatpush3.bf16.msra.mxu0 %v3582_v36  ;;  %v974_v36 = vshrl.u32 %v973_v52, 5  ;;  %v1222_v52 = vmul.u32 %v1215_v20, %v1206_v37  ;;  %v1068_v37 = vshrl.u32 %v1067_v17, 23 }
  0x9c   :  { %v1285_v53 = vsub.s32 32, %v1284_v47  ;;  %v1293_v54 = vshll.u32 %v5947_v1, %v1284_v47  ;;  %v1296_v17 = vshll.u32 %v5945_v55, %v1284_v47 }
  0x9d   :  { %vm993_vm8 = vcmp.lt.s32.totalorder %v974_v36, 1  ;;  %vm995_vm9 = vcmp.lt.s32.totalorder %v974_v36, 3  ;;  %vm996_vm10 = vcmp.lt.s32.totalorder %v974_v36, 4  ;;  %v1227_v10 = vadd.s32 %v1226_v8, %v1222_v52 }
  0x9e   :  { %vm994_vm11 = vcmp.lt.s32.totalorder %v974_v36, 2  ;;  %v998_v12 = vsel %vm996_vm10, %v986_v4, 2102212464  ;;  %v1001_v13 = vsel %vm993_vm8, %v980_v57, %v983_v58  ;;  %v1002_v14 = vsel %vm996_vm10, %v989_v5, 920167782 }
  0x9f   :  { %v1005_v15 = vsel %vm993_vm8, %v983_v58, %v986_v4  ;;  %v1006_v16 = vsel %vm996_vm10, %v992_v7, 1326507024  ;;  %v1228_v18 = vadd.s32 536870912, %v1227_v10  ;;  %v997_v19 = vsel %vm993_vm8, %v977_v63, %v980_v57 }
  0xa0   :  { %v1003_v20 = vsel %vm995_vm9, %v986_v4, %v1002_v14  ;;  %v1007_v21 = vsel %vm995_vm9, %v989_v5, %v1006_v16  ;;  %v999_v22 = vsel %vm995_vm9, %v983_v58, %v998_v12  ;;  %v3197_v48 = vadd.s32 4294967169, %v1068_v37 }
  0xa1   :  { %v1004_v23 = vsel %vm994_vm11, %v1001_v13, %v1003_v20  ;;  %v1008_v24 = vsel %vm994_vm11, %v1005_v15, %v1007_v21  ;;  %v1229_v26 = vshrl.u32 %v1228_v18, 30  ;;  %v1000_v32 = vsel %vm994_vm11, %v997_v19, %v999_v22 }
  0xa2   :  { %v4206_v27 = vmul.u32.u64.low %v1009_v25, %v1008_v24  ;;  %v4207_v28 = vmul.u32.u64.high %v1009_v25, %v1008_v24, %v4206_v27  ;;  %v4209_v29 = vmul.u32.u64.low %v1009_v25, %v1004_v23  ;;  %v4210_v30 = vmul.u32.u64.high %v1009_v25, %v1004_v23, %v4209_v29 }
  0xa3   :  { %v1230_v31 = vshll.u32 %v1229_v26, 30  ;;  %v1016_v42 = vmul.u32 %v1009_v25, %v1000_v32  ;;  %v1074_v56 = vadd.s32 1, %v3197_v48  ;;  %v1253_v60 = vsub.s32 4, %v1229_v26 }
  0xa4   :  { %vm1018_vm13 = vc.u32 %v4207_v28, %v4209_v29  ;;  %v1019_v43 = vadd.s32 1, %v4210_v30  ;;  %v1223_v63 = vadd.s32 %v4177_v39, %v4173_v33  ;;  %v1294_v7 = vshrl.u32 %v5945_v55, %v1285_v53 }
  0xa5   :  { %v4213_v40 = vsub.s32 %v1227_v10, %v1230_v31  ;;  %vm1075_vm2 = vcmp.gt.s32.totalorder %v1074_v56, 0  ;;  %v1299_v10 = vshll.u32 %v5943_v6, %v1284_v47  ;;  %v1300_v33 = vshrl.u32 %v5939_v11, %v1285_v53 }
  0xa6   :  { %v1020_v46 = vsel %vm1018_vm13, %v1019_v43, %v4210_v30  ;;  %v1254_v39 = vsel %vm1169_vm15, %v1253_v60, %v1229_v26  ;;  %v4242_v12 = vshrl.u32 %v1282_v41, 5  ;;  %v1287_v13 = vshll.u32 %v5941_v59, %v1284_v47  ;;  %v4274_v43 = vld [vmem:[%s5926_s6] ss:$0 sm:$0xff] }
  0xa7   :  { %v1233_v45 = vsub.s32 0, %v4213_v40  ;;  %v1021_v50 = vadd.s32 %v1020_v46, %v1016_v42  ;;  %v1290_v14 = vshll.u32 %v5949_v61, %v1284_v47  ;;  %v1288_v15 = vshrl.u32 %v5949_v61, %v1285_v53 }
  0xa8   :  { %v1291_v16 = vshrl.u32 %v5947_v1, %v1285_v53  ;;  %v1297_v18 = vshrl.u32 %v5943_v6, %v1285_v53  ;;  %v1278_v22 = vor.u32 8388608, %v4232_v2  ;;  %v4258_v23 = vsel %vm1075_vm2, %v1074_v56, 0 }
  0xa9   :  { %v3202_v49 = vmin.u32 %v1233_v45, %v4213_v40  ;;  %v1022_v52 = vadd.s32 536870912, %v1021_v50  ;;  %5966 = vst [vmem:[#allocation24_spill] sm:$0xff] %v4258_v23  ;;  %v1256_v24 = vsel %vm4223_vm14, 0, %v1254_v39  ;;  %v1295_v26 = vor.u32 %v1294_v7, %v1293_v54 }
  0xaa   :  { %v1301_v27 = vor.u32 %v1300_v33, %v1299_v10  ;;  %v4265_v30 = vadd.s32 %v4209_v29, %v4207_v28  ;;  %v1286_v35 = vshrl.u32 %v5941_v59, %v1285_v53  ;;  %vm1305_vm5 = vcmp.lt.s32.totalorder %v4242_v12, 4 }
  0xab   :  { %v1235_v36 = vclz %v3202_v49  ;;  %v1023_v62 = vshrl.u32 %v1022_v52, 30  ;;  %v1289_v32 = vor.u32 %v1288_v15, %v1287_v13  ;;  %v1292_v37 = vor.u32 %v1291_v16, %v1290_v14 }
  0xac   :  { %v1298_v41 = vor.u32 %v1297_v18, %v1296_v17  ;;  %v1307_v42 = vsel %vm1305_vm5, %v1295_v26, 2102212464  ;;  %vm1302_vm6 = vcmp.lt.s32.totalorder %v4242_v12, 1  ;;  %v4278_v46 = vand.u32 3, %v1256_v24 }
  0xad   :  { %v3203_v57 = vadd.s32 4294967294, %v1235_v36  ;;  %v1024_v9 = vshll.u32 %v1023_v62, 30  ;;  %v1047_v31 = vsub.s32 4, %v1023_v62  ;;  %vm1304_vm7 = vcmp.lt.s32.totalorder %v4242_v12, 3 }
  0xae   :  { %v1315_v48 = vsel %vm1305_vm5, %v1301_v27, 1326507024  ;;  %vm1303_vm8 = vcmp.lt.s32.totalorder %v4242_v12, 2  ;;  %v1308_v36 = vsel %vm1304_vm7, %v1292_v37, %v1307_v42  ;;  %v1310_v56 = vsel %vm1302_vm6, %v1289_v32, %v1292_v37 }
  0xaf   :  { %vm3204_vm1 = vcmp.lt.s32.totalorder %v3203_v57, 0  ;;  %v4262_v25 = vsub.s32 %v1021_v50, %v1024_v9  ;;  %v1048_v50 = vsel %vm963_vm3, %v1047_v31, %v1023_v62  ;;  %v1314_v60 = vsel %vm1302_vm6, %v1292_v37, %v1295_v26 }
  0xb0   :  { %v1238_v5 = vsel %vm3204_vm1, 0, %v3203_v57  ;;  %v1311_v57 = vsel %vm1305_vm5, %v1298_v41, 920167782  ;;  %v1316_v54 = vsel %vm1304_vm7, %v1298_v41, %v1315_v48  ;;  %v1050_v33 = vsel %vm4252_vm4, 0, %v1048_v50 }
  0xb1   :  { %v1243_v8 = vsub.s32 4294967266, %v1238_v5  ;;  %v1239_v19 = vsub.s32 32, %v1238_v5  ;;  %v1240_v45 = vshll.u32 %v4213_v40, %v1238_v5  ;;  %v1027_v47 = vsub.s32 0, %v4262_v25 }
  0xb2   :  { %v1306_v40 = vsel %vm1302_vm6, %v1286_v35, %v1289_v32  ;;  %v1312_v14 = vsel %vm1304_vm7, %v1295_v26, %v1311_v57  ;;  %v4312_v15 = vshll.u32 %v1278_v22, 8 }
  0xb3   :  { %v1244_v20 = vadd.s32 127, %v1243_v8  ;;  %v1241_v28 = vshrl.u32 %v1223_v63, %v1239_v19  ;;  %v3194_v10 = vmin.u32 %v1027_v47, %v4262_v25  ;;  %v4317_v18 = vsel %vm1303_vm8, %v1306_v40, %v1308_v36 }
  0xb4   :  { %v4321_v19 = vsel %vm1303_vm8, %v1314_v60, %v1316_v54  ;;  %v4326_v32 = vsel %vm1303_vm8, %v1310_v56, %v1312_v14 }
  0xb5   :  { %v1245_v29 = vshll.u32 %v1244_v20, 23  ;;  %v1242_v62 = vor.u32 %v1241_v28, %v1240_v45  ;;  %v1029_v22 = vclz %v3194_v10 }
  0xb6   :  { %v4330_v45 = vmul.u32.u64.low %v4312_v15, %v4321_v19  ;;  %v4331_v28 = vmul.u32.u64.high %v4312_v15, %v4321_v19, %v4330_v45 }
  0xb7   :  { %v1246_v5 = vor.u32 4788187, %v1245_v29  ;;  %v1249_v31 = vcvt.s32.f32 %v1242_v62  ;;  %v3195_v60 = vadd.s32 4294967294, %v1029_v22 }
  0xb9   :  { %v1247_v27 = vand.u32 2147483647, %v1246_v5  ;;  %v4351_v5 = vand.u32 3, %v1050_v33  ;;  %vm3196_vm9 = vcmp.lt.s32.totalorder %v3195_v60, 0 }
  0xbb   :  { %v1250_v36 = vmul.f32 %v1249_v31, %v1247_v27  ;;  %5968 = vst [vmem:[#allocation26_spill] sm:$0xff] %v4351_v5 }
 0x150   :  { %v3373_v49 = vpop.f32.mrb[0].mxu1 }
 0x151   :  { %v4290_v52 = vadd.f32 %v3373_v49, %v4274_v43  ;;  %v386_v53 = vpop.f32.mrb[1].mxu1  ;;  %v4338_v49 = vand.u32 31, %v4258_v23 }
 0x152   :  { %v4295_v63 = vadd.f32 %v4274_v43, %v386_v53  ;;  %v3374_v2 = vpop.f32.mrb[2].mxu1 }
 0x153   :  { %v499_v7 = vand.u32 2147483647, %v4290_v52  ;;  %v4301_v8 = vadd.f32 %v3374_v2, %v4274_v43  ;;  %v389_v9 = vpop.f32.mrb[3].mxu1  ;;  %5967 = vst [vmem:[#allocation25_spill] sm:$0xff] %v4338_v49  ;;  %v4364_v33 = vsub.s32 32, %v4338_v49  ;;  %vm467_vm13 = vcmp.ne.f32.partialorder %v4290_v52, %v4290_v52 }
 0x154   :  { %v497_v39 = vand.u32 2147483647, %v4295_v63  ;;  %v4308_v13 = vadd.f32 %v4274_v43, %v389_v9  ;;  %v4356_v9 = vmul.u32.u64.low %v4312_v15, %v4326_v32  ;;  %v4357_v10 = vmul.u32.u64.high %v4312_v15, %v4326_v32, %v4356_v9 }
 0x155   :  { %v515_v16 = vsub.f32 0.0, %v499_v7  ;;  %v500_v17 = vand.u32 2147483647, %v4301_v8  ;;  %5969 = vst [vmem:[#allocation27_spill] sm:$0xff] %v4364_v33  ;;  %vm465_vm7 = vcmp.ne.f32.partialorder %v4295_v63, %v4295_v63 }
 0x156   :  { %v513_v20 = vsub.f32 0.0, %v497_v39  ;;  %v498_v24 = vand.u32 2147483647, %v4308_v13  ;;  %vm466_vm8 = vcmp.ne.f32.partialorder %v4308_v13, %v4308_v13 }
 0x157   :  { %v533_v35 = vmul.f32 1.442695, %v515_v16  ;;  %v516_v26 = vsub.f32 0.0, %v500_v17  ;;  %v1251_v16 = vxor.u32 2147483648, %v1250_v36 }
 0x158   :  { %v529_v37 = vmul.f32 1.442695, %v513_v20  ;;  %v514_v41 = vsub.f32 0.0, %v498_v24  ;;  %v3377_v42 = vpop.f32.mrb[4].mxu1 }
 0x159   :  { %3583 = vpow2.f32 %v533_v35  ;;  %v535_v29 = vmul.f32 1.442695, %v516_v26  ;;  %v4335_v47 = vadd.f32 %v3377_v42, %v4274_v43  ;;  %v402_v48 = vpop.f32.mrb[5].mxu1  ;;  %v4369_v26 = vshll.u32 %v5941_v59, %v4338_v49 }
 0x15a   :  { %3585 = vpow2.f32 %v529_v37  ;;  %v531_v12 = vmul.f32 1.442695, %v514_v41  ;;  %v4341_v50 = vadd.f32 %v4274_v43, %v402_v48  ;;  %v3378_v40 = vpop.f32.mrb[6].mxu1  ;;  %v4378_v48 = vsel %vm3196_vm9, 0, %v3195_v60 }
 0x15b   :  { %3587 = vpow2.f32 %v535_v29  ;;  %v503_v53 = vand.u32 2147483647, %v4335_v47  ;;  %v4345_v56 = vadd.f32 %v3378_v40, %v4274_v43  ;;  %v405_v57 = vpop.f32.mrb[7].mxu1  ;;  %5970 = vst [vmem:[#allocation28_spill] sm:$0xff] %v4369_v26  ;;  %v1252_v29 = vsel %vm1169_vm15, %v1251_v16, %v1250_v36 }
 0x15c   :  { %3589 = vpow2.f32 %v531_v12  ;;  %v501_v2 = vand.u32 2147483647, %v4341_v50  ;;  %v4349_v62 = vadd.f32 %v4274_v43, %v405_v57  ;;  %v1034_v36 = vshll.u32 %v4262_v25, %v4378_v48 }
 0x15d   :  { %v519_v54 = vsub.f32 0.0, %v503_v53  ;;  %v504_v7 = vand.u32 2147483647, %v4345_v56  ;;  %vm469_vm9 = vcmp.ne.f32.partialorder %v4341_v50, %v4341_v50 }
 0x15e   :  { %v517_v39 = vsub.f32 0.0, %v501_v2  ;;  %v502_v14 = vand.u32 2147483647, %v4349_v62  ;;  %v1033_v2 = vsub.s32 32, %v4378_v48 }
 0x15f   :  { %v541_v19 = vmul.f32 1.442695, %v519_v54  ;;  %v520_v20 = vsub.f32 0.0, %v504_v7 }
 0x160   :  { %v537_v27 = vmul.f32 1.442695, %v517_v39  ;;  %v518_v31 = vsub.f32 0.0, %v502_v14  ;;  %v3381_v35 = vpop.f32.mrb[8].mxu1  ;;  %v1035_v0 = vshrl.u32 %v4265_v30, %v1033_v2 }
 0x161   :  { %3591 = vpow2.f32 %v541_v19  ;;  %v543_v32 = vmul.f32 1.442695, %v520_v20  ;;  %v4373_v37 = vadd.f32 %v3381_v35, %v4274_v43  ;;  %v418_v41 = vpop.f32.mrb[9].mxu1  ;;  %v4394_v20 = vsel %vm4223_vm14, %v4135_v34, %v1252_v29 }
 0x162   :  { %3593 = vpow2.f32 %v537_v27  ;;  %v539_v42 = vmul.f32 1.442695, %v518_v31  ;;  %v3382_v45 = vpop.f32.mrb[10].mxu1  ;;  %v4412_v2 = vadd.f32 %v4274_v43, %v418_v41  ;;  %v4420_v17 = vor.u32 %v1035_v0, %v1034_v36 }
 0x163   :  { %v3584_v12 = vpop.eup %3583  ;;  %3595 = vpow2.f32 %v543_v32  ;;  %v507_v53 = vand.u32 2147483647, %v4373_v37  ;;  %v4382_v57 = vpop.f32.mrb[11].mxu1  ;;  %v4427_v41 = vadd.f32 %v3382_v45, %v4274_v43  ;;  %vm468_vm14 = vcmp.ne.f32.partialorder %v4301_v8, %v4301_v8 }
 0x164   :  { %v3586_v54 = vpop.eup %3585  ;;  %v579_v7 = vadd.f32 1.0, %v3584_v12  ;;  %3597 = vpow2.f32 %v539_v42  ;;  %v582_v14 = vmul.f32 -0.5, %v3584_v12  ;;  %v585_v51 = vand.u32 2147483647, %v3584_v12 }
 0x165   :  { %v4388_v60 = vpop.eup %3587  ;;  %v561_v16 = vadd.f32 1.0, %v3586_v54  ;;  %v564_v31 = vmul.f32 -0.5, %v3586_v54  ;;  %v523_v32 = vsub.f32 0.0, %v507_v53  ;;  %v567_v4 = vand.u32 2147483647, %v3586_v54 }
 0x166   :  { %v4396_v27 = vpop.eup %3589  ;;  %3599 = vlog2.f32 %v579_v7  ;;  %v588_v35 = vadd.f32 1.0, %v4388_v60  ;;  %v583_v7 = vadd.f32 1.0, %v582_v14  ;;  %v591_v59 = vmul.f32 -0.5, %v4388_v60 }
 0x167   :  { %3601 = vlog2.f32 %v561_v16  ;;  %v570_v58 = vadd.f32 1.0, %v4396_v27  ;;  %v565_v16 = vadd.f32 1.0, %v564_v31  ;;  %v549_v30 = vmul.f32 1.442695, %v523_v32 }
 0x168   :  { %3603 = vlog2.f32 %v588_v35  ;;  %v4404_v11 = vpop.f32.mrb[12].mxu1  ;;  %v594_v14 = vand.u32 2147483647, %v4388_v60  ;;  %vm4422_vm10 = vcmp.lt.f32.partialorder %v585_v51, 0.0004427343  ;;  %v584_v53 = vmul.f32 %v3584_v12, %v583_v7 }
 0x169   :  { %v4407_v6 = vpop.f32.mrb[13].mxu1  ;;  %3605 = vcosq.f32 %v4394_v20  ;;  %v592_v29 = vadd.f32 1.0, %v591_v59  ;;  %v573_v1 = vmul.f32 -0.5, %v4396_v27  ;;  %v4434_v0 = vmul.f32 %v3586_v54, %v565_v16 }
 0x16a   :  { %3607 = vlog2.f32 %v570_v58  ;;  %v4414_v35 = vpop.f32.mrb[14].mxu1  ;;  %vm4437_vm11 = vcmp.lt.f32.partialorder %v567_v4, 0.0004427343  ;;  %vm4441_vm12 = vcmp.lt.f32.partialorder %v594_v14, 0.0004427343 }
 0x16b   :  { %v3592_v55 = vpop.eup %3591  ;;  %v4418_v61 = vpop.f32.mrb[15].mxu1  ;;  %3609 = vpow2.f32 %v549_v30  ;;  %v576_v59 = vand.u32 2147483647, %v4396_v27  ;;  %v593_v22 = vmul.f32 %v4388_v60, %v592_v29  ;;  %v574_v40 = vadd.f32 1.0, %v573_v1 }
 0x16c   :  { %v3594_v42 = vpop.eup %3593  ;;  %v615_v32 = vadd.f32 1.0, %v3592_v55  ;;  %v618_v51 = vmul.f32 -0.5, %v3592_v55  ;;  %v621_v44 = vand.u32 2147483647, %v3592_v55  ;;  %v508_v30 = vand.u32 2147483647, %v4427_v41 }
 0x16d   :  { %v4429_v58 = vpop.eup %3595  ;;  %v597_v25 = vadd.f32 1.0, %v3594_v42  ;;  %v600_v12 = vmul.f32 -0.5, %v3594_v42  ;;  %v603_v26 = vand.u32 2147483647, %v3594_v42  ;;  %vm4460_vm15 = vcmp.lt.f32.partialorder %v576_v59, 0.0004427343 }
 0x16e   :  { %v4432_v19 = vpop.eup %3597  ;;  %3611 = vlog2.f32 %v615_v32  ;;  %v624_v36 = vadd.f32 1.0, %v4429_v58  ;;  %v627_v54 = vmul.f32 -0.5, %v4429_v58  ;;  %v505_v32 = vand.u32 2147483647, %v4412_v2 }
 0x16f   :  { %3613 = vlog2.f32 %v597_v25  ;;  %v606_v16 = vadd.f32 1.0, %v4432_v19  ;;  %v619_v24 = vadd.f32 1.0, %v618_v51  ;;  %v601_v3 = vadd.f32 1.0, %v600_v12 }
 0x170   :  { %v3600_v7 = vpop.eup %3599  ;;  %3615 = vlog2.f32 %v624_v36  ;;  %v628_v51 = vadd.f32 1.0, %v627_v54  ;;  %v521_v36 = vsub.f32 0.0, %v505_v32  ;;  %v612_v31 = vand.u32 2147483647, %v4432_v19 }
 0x171   :  { %v3602_v14 = vpop.eup %3601  ;;  %v581_v39 = vmul.f32 0.6931472, %v3600_v7  ;;  %3617 = vlog2.f32 %v606_v16  ;;  %v609_v7 = vmul.f32 -0.5, %v4432_v19  ;;  %v5979_v16 = vmax.f32 %v4290_v52, 0.0 }
 0x172   :  { %v3604_v25 = vpop.eup %3603  ;;  %v563_v1 = vmul.f32 0.6931472, %v3602_v14  ;;  %vm4472_vm1 = vcmp.lt.f32.partialorder %v621_v44, 0.0004427343  ;;  %v630_v54 = vand.u32 2147483647, %v4429_v58  ;;  %v620_v14 = vmul.f32 %v3592_v55, %v619_v24 }
 0x173   :  { %v4453_v23 = vpop.eup %3605  ;;  %v587_v5 = vsel %vm4422_vm10, %v584_v53, %v581_v39  ;;  %v590_v4 = vmul.f32 0.6931472, %v3604_v25  ;;  %v575_v25 = vmul.f32 %v4396_v27, %v574_v40  ;;  %v545_v32 = vmul.f32 1.442695, %v521_v36 }
 0x174   :  { %v3608_v60 = vpop.eup %3607  ;;  %v707_v49 = vadd.f32 %v587_v5, %v5979_v16  ;;  %v602_v33 = vmul.f32 %v3594_v42, %v601_v3  ;;  %vm4477_vm2 = vcmp.lt.f32.partialorder %v603_v26, 0.0004427343  ;;  %v569_v44 = vsel %vm4437_vm11, %v4434_v0, %v563_v1 }
 0x175   :  { %v596_v39 = vsel %vm4441_vm12, %v593_v22, %v590_v4  ;;  %v572_v53 = vmul.f32 0.6931472, %v3608_v60  ;;  %v4469_v12 = vpop.eup %3609  ;;  %v610_v22 = vadd.f32 1.0, %v609_v7  ;;  %v5984_v40 = vmax.f32 %v4301_v8, 0.0 }
 0x176   :  { %v651_v45 = vadd.f32 1.0, %v4469_v12  ;;  %v4488_v60 = vmul.f32 %v4429_v58, %v628_v51  ;;  %3619 = vpow2.f32 %v545_v32  ;;  %v723_v3 = vsel %vm467_vm13, %v4290_v52, %v707_v49 }
 0x177   :  { %v708_v27 = vadd.f32 %v596_v39, %v5984_v40  ;;  %v578_v24 = vsel %vm4460_vm15, %v575_v25, %v572_v53  ;;  %vm4496_vm5 = vcmp.lt.f32.partialorder %v612_v31, 0.0004427343  ;;  %v654_v42 = vmul.f32 -0.5, %v4469_v12 }
 0x178   :  { %v3612_v4 = vpop.eup %3611  ;;  %vm4501_vm6 = vcmp.lt.f32.partialorder %v630_v54, 0.0004427343  ;;  %3621 = vlog2.f32 %v651_v45  ;;  %v4508_v52 = vadd.f32 %v4274_v43, %v4382_v57  ;;  %v5989_v7 = vmax.f32 %v4295_v63, 0.0 }
 0x179   :  { %v3614_v55 = vpop.eup %3613  ;;  %v617_v0 = vmul.f32 0.6931472, %v3612_v4  ;;  %v611_v29 = vmul.f32 %v4432_v19, %v610_v22  ;;  %v460_v51 = vmax.f32 %v4427_v41, 0.0  ;;  %v4516_v36 = vadd.f32 %v4404_v11, %v4274_v43 }
 0x17a   :  { %v3616_v49 = vpop.eup %3615  ;;  %v705_v1 = vadd.f32 %v569_v44, %v5989_v7  ;;  %v4520_v39 = vadd.f32 -0.6931472, %v723_v3  ;;  %v724_v57 = vsel %vm468_vm14, %v4301_v8, %v708_v27  ;;  %v599_v53 = vmul.f32 0.6931472, %v3614_v55 }
 0x17b   :  { %v3618_v16 = vpop.eup %3617  ;;  %v524_v31 = vsub.f32 0.0, %v508_v30  ;;  %v5990_v19 = vmax.f32 %v4308_v13, 0.0  ;;  %v655_v54 = vadd.f32 1.0, %v654_v42  ;;  %v657_v11 = vand.u32 2147483647, %v4469_v12 }
 0x17c   :  { %v506_v32 = vand.u32 2147483647, %v4508_v52  ;;  %v623_v22 = vsel %vm4472_vm1, %v620_v14, %v617_v0  ;;  %v608_v45 = vmul.f32 0.6931472, %v3618_v16  ;;  %v511_v8 = vand.u32 2147483647, %v4516_v36 }
 0x17d   :  { %v706_v25 = vadd.f32 %v578_v24, %v5990_v19  ;;  %v551_v4 = vmul.f32 1.442695, %v524_v31  ;;  %v626_v44 = vmul.f32 0.6931472, %v3616_v49  ;;  %v4537_v27 = vadd.f32 %v4274_v43, %v4407_v6 }
 0x17e   :  { %v522_v40 = vsub.f32 0.0, %v506_v32  ;;  %v4541_v55 = vadd.f32 %v4414_v35, %v4274_v43  ;;  %v4545_v3 = vadd.f32 -0.6931472, %v724_v57  ;;  %v605_v59 = vsel %vm4477_vm2, %v602_v33, %v599_v53 }
 0x17f   :  { %3623 = vpow2.f32 %v551_v4  ;;  %v527_v14 = vsub.f32 0.0, %v511_v8  ;;  %vm470_vm10 = vcmp.ne.f32.partialorder %v4349_v62, %v4349_v62  ;;  %v4552_v6 = vmul.f32 %v4469_v12, %v655_v54 }
 0x180   :  { %v547_v24 = vmul.f32 1.442695, %v522_v40  ;;  %v509_v35 = vand.u32 2147483647, %v4537_v27  ;;  %v4557_v42 = vadd.f32 %v4274_v43, %v4418_v61  ;;  %vm471_vm11 = vcmp.ne.f32.partialorder %v4335_v47, %v4335_v47  ;;  %v4563_v33 = vpop.eup %3619 }
 0x181   :  { %vm472_vm12 = vcmp.ne.f32.partialorder %v4345_v56, %v4345_v56  ;;  %v5991_v5 = vmax.f32 %v4335_v47, 0.0  ;;  %v614_v12 = vsel %vm4496_vm5, %v611_v29, %v608_v45  ;;  %v557_v30 = vmul.f32 1.442695, %v527_v14 }
 0x182   :  { %v512_v49 = vand.u32 2147483647, %v4541_v55  ;;  %v5992_v61 = vmax.f32 %v4341_v50, 0.0  ;;  %v632_v7 = vsel %vm4501_vm6, %v4488_v60, %v626_v44  ;;  %v633_v16 = vadd.f32 1.0, %v4563_v33  ;;  %v3622_v57 = vpop.eup %3621 }
 0x183   :  { %v711_v0 = vadd.f32 %v623_v22, %v5991_v5  ;;  %3625 = vpow2.f32 %v547_v24  ;;  %v525_v53 = vsub.f32 0.0, %v509_v35  ;;  %v721_v26 = vsel %vm465_vm7, %v4295_v63, %v705_v1 }
 0x184   :  { %v709_v43 = vadd.f32 %v605_v59, %v5992_v61  ;;  %3627 = vpow2.f32 %v557_v30  ;;  %v528_v31 = vsub.f32 0.0, %v512_v49  ;;  %v5993_v29 = vmax.f32 %v4349_v62, 0.0 }
 0x185   :  { %vm4582_vm13 = vcmp.lt.f32.partialorder %v657_v11, 0.0004427343  ;;  %3629 = vlog2.f32 %v633_v16  ;;  %v458_v60 = vmax.f32 %v4508_v52, 0.0  ;;  %v510_v58 = vand.u32 2147483647, %v4557_v42 }
 0x186   :  { %v710_v19 = vadd.f32 %v614_v12, %v5993_v29  ;;  %v5996_v32 = vmax.f32 %v4345_v56, 0.0  ;;  %v553_v45 = vmul.f32 1.442695, %v525_v53  ;;  %v559_v4 = vmul.f32 1.442695, %v528_v31 }
 0x187   :  { %v722_v63 = vsel %vm466_vm8, %v4308_v13, %v706_v25  ;;  %v653_v1 = vmul.f32 0.6931472, %v3622_v57  ;;  %v636_v11 = vmul.f32 -0.5, %v4563_v33  ;;  %v526_v8 = vsub.f32 0.0, %v510_v58 }
 0x188   :  { %v712_v22 = vadd.f32 %v632_v7, %v5996_v32  ;;  %v3168_v44 = vadd.f32 -0.6931472, %v721_v26  ;;  %3631 = vpow2.f32 %v553_v45  ;;  %v3169_v40 = vadd.f32 -0.6931472, %v722_v63 }
 0x189   :  { %v754_v59 = vpack.c.bf16 %v4545_v3, %v4520_v39  ;;  %v725_v14 = vsel %vm469_vm9, %v4341_v50, %v709_v43  ;;  %3633 = vpow2.f32 %v559_v4  ;;  %v555_v24 = vmul.f32 1.442695, %v526_v8  ;;  %v3624_v35 = vpop.eup %3623 }
 0x18a   :  { %v726_v13 = vsel %vm470_vm10, %v4349_v62, %v710_v19  ;;  %v3172_v25 = vadd.f32 -0.6931472, %v725_v14  ;;  %v753_v5 = vpack.c.bf16 %v3169_v40, %v3168_v44  ;;  %v727_v39 = vsel %vm471_vm11, %v4335_v47, %v711_v0 }
 0x18b   :  { %v3173_v12 = vadd.f32 -0.6931472, %v726_v13  ;;  %v728_v50 = vsel %vm472_vm12, %v4345_v56, %v712_v22  ;;  %v637_v3 = vadd.f32 1.0, %v636_v11  ;;  %v660_v30 = vadd.f32 1.0, %v3624_v35 }
 0x18c   :  { %v663_v49 = vmul.f32 -0.5, %v3624_v35  ;;  %3635 = vpow2.f32 %v555_v24  ;;  %v463_v62 = vmax.f32 %v4516_v36, 0.0  ;;  %3403 = vmatprep.mubr.bf16.mxu0 %v753_v5  ;;  %v3174_v43 = vadd.f32 -0.6931472, %v727_v39 }
 0x18d   :  { %v755_v61 = vpack.c.bf16 %v3173_v12, %v3172_v25  ;;  %v3175_v7 = vadd.f32 -0.6931472, %v728_v50  ;;  %v3626_v16 = vpop.eup %3625  ;;  %v639_v57 = vand.u32 2147483647, %v4563_v33  ;;  %3637 = vlog2.f32 %v660_v30  ;;  %3404 = vmatmul.mubr.bf16.vlgmr.msra.gmra.mrb[4].mxu0 %v754_v59 }
 0x18e   :  { %v461_v47 = vmax.f32 %v4537_v27, 0.0  ;;  %v464_v0 = vmax.f32 %v4541_v55, 0.0  ;;  %v3628_v56 = vpop.eup %3627  ;;  %v659_v53 = vsel %vm4582_vm13, %v4552_v6, %v653_v1  ;;  %v666_v31 = vand.u32 2147483647, %v3624_v35 }
 0x18f   :  { %v642_v26 = vadd.f32 1.0, %v3626_v16  ;;  %3407 = vmatprep.mubr.bf16.mxu0 %v755_v61  ;;  %v756_v29 = vpack.c.bf16 %v3175_v7, %v3174_v43  ;;  %v3630_v19 = vpop.eup %3629  ;;  %v638_v58 = vmul.f32 %v4563_v33, %v637_v3  ;;  %v664_v32 = vadd.f32 1.0, %v663_v49 }
 0x190   :  { %v645_v22 = vmul.f32 -0.5, %v3626_v16  ;;  %v687_v45 = vadd.f32 1.0, %v3628_v56  ;;  %v635_v4 = vmul.f32 0.6931472, %v3630_v19  ;;  %v648_v63 = vand.u32 2147483647, %v3626_v16 }
 0x191   :  { %3639 = vlog2.f32 %v642_v26  ;;  %v690_v11 = vmul.f32 -0.5, %v3628_v56  ;;  %vm640_vm14 = vcmp.lt.f32.partialorder %v639_v57, 0.0004427343  ;;  %v693_v8 = vand.u32 2147483647, %v3628_v56 }
 0x192   :  { %3641 = vlog2.f32 %v687_v45  ;;  %v462_v54 = vmax.f32 %v4557_v42, 0.0  ;;  %v3632_v6 = vpop.eup %3631  ;;  %v5997_v1 = vmax.f32 %v4373_v37, 0.0  ;;  %v641_v40 = vsel %vm640_vm14, %v638_v58, %v635_v4 }
 0x193   :  { %vm4624_vm15 = vcmp.lt.f32.partialorder %v666_v31, 0.0004427343  ;;  %vm473_vm1 = vcmp.ne.f32.partialorder %v4412_v2, %v4412_v2  ;;  %v3634_v33 = vpop.eup %3633  ;;  %v665_v14 = vmul.f32 %v3624_v35, %v664_v32  ;;  %v646_v24 = vadd.f32 1.0, %v645_v22 }
 0x194   :  { %v715_v44 = vadd.f32 %v659_v53, %v5997_v1  ;;  %v669_v13 = vadd.f32 1.0, %v3632_v6  ;;  %v672_v25 = vmul.f32 -0.5, %v3632_v6  ;;  %v6000_v5 = vmax.f32 %v4412_v2, 0.0 }
 0x195   :  { %vm4632_vm2 = vcmp.lt.f32.partialorder %v648_v63, 0.0004427343  ;;  %v691_v50 = vadd.f32 1.0, %v690_v11  ;;  %v696_v3 = vadd.f32 1.0, %v3634_v33  ;;  %v699_v30 = vmul.f32 -0.5, %v3634_v33  ;;  %3408 = vmatmul.mubr.bf16.gmra.mrb[8].mxu0 %v756_v29 }
 0x196   :  { %v713_v12 = vadd.f32 %v641_v40, %v6000_v5  ;;  %v4636_v49 = vpop.eup %3635  ;;  %vm4638_vm5 = vcmp.lt.f32.partialorder %v693_v8, 0.0004427343  ;;  %3643 = vlog2.f32 %v669_v13  ;;  %v675_v35 = vand.u32 2147483647, %v3632_v6 }
 0x197   :  { %vm475_vm6 = vcmp.ne.f32.partialorder %v4373_v37, %v4373_v37  ;;  %v673_v43 = vadd.f32 1.0, %v672_v25  ;;  %3645 = vlog2.f32 %v696_v3  ;;  %v702_v7 = vand.u32 2147483647, %v3634_v33  ;;  %v3638_v53 = vpop.eup %3637 }
 0x198   :  { %v731_v57 = vsel %vm475_vm6, %v4373_v37, %v715_v44  ;;  %v647_v31 = vmul.f32 %v3626_v16, %v646_v24  ;;  %v700_v26 = vadd.f32 1.0, %v699_v30  ;;  %v678_v19 = vadd.f32 1.0, %v4636_v49 }
 0x199   :  { %vm474_vm7 = vcmp.ne.f32.partialorder %v4508_v52, %v4508_v52  ;;  %vm476_vm8 = vcmp.ne.f32.partialorder %v4427_v41, %v4427_v41  ;;  %v662_v29 = vmul.f32 0.6931472, %v3638_v53  ;;  %v692_v58 = vmul.f32 %v3628_v56, %v691_v50 }
 0x19a   :  { %v681_v32 = vmul.f32 -0.5, %v4636_v49  ;;  %v729_v37 = vsel %vm473_vm1, %v4412_v2, %v713_v12  ;;  %vm4655_vm9 = vcmp.lt.f32.partialorder %v675_v35, 0.0004427343  ;;  %3647 = vlog2.f32 %v678_v19 }
 0x19b   :  { %v684_v22 = vand.u32 2147483647, %v4636_v49  ;;  %v4660_v45 = vadd.f32 -0.6931472, %v731_v57  ;;  %v3640_v4 = vpop.eup %3639  ;;  %v668_v56 = vsel %vm4624_vm15, %v665_v14, %v662_v29  ;;  %v674_v63 = vmul.f32 %v3632_v6, %v673_v43 }
 0x19c   :  { %vm4664_vm10 = vcmp.lt.f32.partialorder %v702_v7, 0.0004427343  ;;  %3649 = vsinq.f32 %v4394_v20  ;;  %vm1265_vm11 = vcmp.eq.s32.totalorder %v4278_v46, 2  ;;  %v3642_v2 = vpop.eup %3641  ;;  %v716_v8 = vadd.f32 %v668_v56, %v460_v51 }
 0x19d   :  { %v644_v1 = vmul.f32 0.6931472, %v3640_v4  ;;  %v701_v44 = vmul.f32 %v3634_v33, %v700_v26  ;;  %v3176_v40 = vadd.f32 -0.6931472, %v729_v37  ;;  %v689_v24 = vmul.f32 0.6931472, %v3642_v2 }
 0x19e   :  { %v682_v13 = vadd.f32 1.0, %v681_v32  ;;  %vm477_vm12 = vcmp.ne.f32.partialorder %v4537_v27, %v4537_v27  ;;  %vm1262_vm13 = vcmp.eq.s32.totalorder %v4278_v46, 0  ;;  %v6009_v6 = vsub.s32 4294967266, %v4378_v48 }
 0x19f   :  { %v650_v20 = vsel %vm4632_vm2, %v647_v31, %v644_v1  ;;  %vm4679_vm14 = vcmp.lt.f32.partialorder %v684_v22, 0.0004427343  ;;  %v732_v51 = vsel %vm476_vm8, %v4427_v41, %v716_v8  ;;  %vm1261_vm15 = vcmp.lt.s32.totalorder %v4278_v46, 2  ;;  %v6013_v46 = vld [vmem:[#allocation27_spill] sm:$0xff] }
 0x1a0   :  { %v1038_v59 = vadd.s32 127, %v6009_v6  ;;  %vm1327_vm1 = vc.u32 %v4331_v28, %v4356_v9  ;;  %v1328_v48 = vadd.s32 1, %v4357_v10  ;;  %v714_v33 = vadd.f32 %v650_v20, %v458_v60  ;;  %v3644_v39 = vpop.eup %3643 }
 0x1a1   :  { %v695_v25 = vsel %vm4638_vm5, %v692_v58, %v689_v24  ;;  %v3179_v5 = vadd.f32 -0.6931472, %v732_v51  ;;  %vm1259_vm2 = vweird.f32 %v4135_v34  ;;  %vm479_vm6 = vcmp.ne.f32.partialorder %v4516_v36, %v4516_v36  ;;  %v3646_v30 = vpop.eup %3645  ;;  %v6015_v51 = vld [vmem:[#allocation25_spill] sm:$0xff] }
 0x1a2   :  { %v1039_v12 = vshll.u32 %v1038_v59, 23  ;;  %v719_v41 = vadd.f32 %v695_v25, %v463_v62  ;;  %v1043_v50 = vcvt.s32.f32 %v4420_v17  ;;  %v1329_v3 = vsel %vm1327_vm1, %v1328_v48, %v4357_v10 }
 0x1a3   :  { %v671_v60 = vmul.f32 0.6931472, %v3644_v39  ;;  %v730_v61 = vsel %vm474_vm7, %v4508_v52, %v714_v33  ;;  %v758_v35 = vpack.c.bf16 %v3179_v5, %v4660_v45  ;;  %v698_v7 = vmul.f32 0.6931472, %v3646_v30  ;;  %v6017_v5 = vld [vmem:[#allocation23_spill] sm:$0xff] }
 0x1a4   :  { %v1040_v43 = vor.u32 4788187, %v1039_v12  ;;  %v3177_v57 = vadd.f32 -0.6931472, %v730_v61  ;;  %v1266_v62 = vxor.u32 2147483648, %v4453_v23  ;;  %v6012_v53 = vmul.u32 %v4312_v15, %v4317_v18  ;;  %v3648_v26 = vpop.eup %3647 }
 0x1a5   :  { %v677_v10 = vsel %vm4655_vm9, %v674_v63, %v671_v60  ;;  %vm480_vm5 = vcmp.ne.f32.partialorder %v4541_v55, %v4541_v55  ;;  %v735_v31 = vsel %vm479_vm6, %v4516_v36, %v719_v41  ;;  %v704_v29 = vsel %vm4664_vm10, %v701_v44, %v698_v7  ;;  %v6019_v41 = vld [vmem:[#allocation26_spill] sm:$0xff] }
 0x1a6   :  { %v1330_v17 = vadd.s32 %v1329_v3, %v6012_v53  ;;  %v1041_v52 = vand.u32 2147483647, %v1040_v43  ;;  %v717_v19 = vadd.f32 %v677_v10, %v461_v47  ;;  %v757_v58 = vpack.c.bf16 %v3177_v57, %v3176_v40  ;;  %v3650_v15 = vpop.eup %3649  ;;  %v6024_v10 = vld [vmem:[#allocation28_spill] sm:$0xff] }
 0x1a7   :  { %v720_v18 = vadd.f32 %v704_v29, %v464_v0  ;;  %v680_v37 = vmul.f32 0.6931472, %v3648_v26  ;;  %v683_v16 = vmul.f32 %v4636_v49, %v682_v13  ;;  %v1263_v47 = vxor.u32 2147483648, %v3650_v15 }
 0x1a8   :  { %v1331_v32 = vadd.s32 536870912, %v1330_v17  ;;  %v1044_v22 = vmul.f32 %v1043_v50, %v1041_v52  ;;  %3411 = vmatprep.mubr.bf16.mxu0 %v757_v58  ;;  %v733_v36 = vsel %vm477_vm12, %v4537_v27, %v717_v19  ;;  %v1267_v45 = vsel %vm1265_vm11, %v1266_v62, %v3650_v15  ;;  %v6020_v50 = vld [vmem:[#allocation24_spill] sm:$0xff] }
 0x1a9   :  { %v686_v56 = vsel %vm4679_vm14, %v683_v16, %v680_v37  ;;  %3412 = vmatmul.mubr.bf16.gmra.mrb[12].mxu0 %v758_v35  ;;  %v736_v0 = vsel %vm480_vm5, %v4541_v55, %v720_v18  ;;  %v3182_v49 = vadd.f32 -0.6931472, %v735_v31  ;;  %v1264_v2 = vsel %vm1262_vm13, %v4453_v23, %v1263_v47 }
 0x1aa   :  { %v4729_v4 = vshrl.u32 %v1331_v32, 30  ;;  %v1045_v63 = vxor.u32 2147483648, %v1044_v22  ;;  %v718_v27 = vadd.f32 %v686_v56, %v462_v54  ;;  %v3183_v11 = vadd.f32 -0.6931472, %v736_v0 }
 0x1ab   :  { %vm478_vm7 = vcmp.ne.f32.partialorder %v4557_v42, %v4557_v42  ;;  %v3180_v1 = vadd.f32 -0.6931472, %v733_v36  ;;  %v1268_v44 = vsel %vm1261_vm15, %v1264_v2, %v1267_v45  ;;  %v6014_v20 = vmov 2475754826  }
 0x1ac   :  { %v1333_v8 = vshll.u32 %v4729_v4, 30  ;;  %v1046_v55 = vsel %vm963_vm3, %v1045_v63, %v1044_v22  ;;  %v734_v40 = vsel %vm478_vm7, %v4557_v42, %v718_v27  ;;  %v760_v54 = vpack.c.bf16 %v3183_v11, %v3182_v49 }
 0x1ad   :  { %v1269_v24 = vsel %vm1259_vm2, nan, %v1268_v44  ;;  %v1049_v23 = vsel %vm4252_vm4, %v4141_v38, %v1046_v55  ;;  %v3181_v13 = vadd.f32 -0.6931472, %v734_v40  ;;  %v1082_v14 = vshrl.u32 %v6014_v20, %v6013_v46 }
 0x1ae   :  { %v2611_v6 = vadd.f32 1.0, %v1269_v24  ;;  %3651 = vcosq.f32 %v1049_v23  ;;  %v4755_v59 = vsub.s32 %v1330_v17, %v1333_v8  ;;  %v1084_v42 = vshll.u32 %v6014_v20, %v6015_v51 }
 0x1af   :  { %3653 = vsinq.f32 %v1049_v23  ;;  %v6016_v48 = vmov 2131351028   ;;  %v759_v33 = vpack.c.bf16 %v3181_v13, %v3180_v1  ;;  %v6018_v12 = vand.u32 2147483647, %v6017_v5  ;;  %v934_v1 = vld [vmem:[%s5923_s3 + $0x28] sm:$0xff] }
 0x1b0   :  { %v1085_v34 = vshrl.u32 %v6016_v48, %v6013_v46  ;;  %v2627_v25 = vmul.f32 0.5, %v2611_v6  ;;  %v1336_v21 = vsub.s32 0, %v4755_v59  ;;  %vm1056_vm3 = vcmp.eq.s32.totalorder %v6019_v41, 0 }
 0x1b1   :  { %v1071_v39 = vand.u32 8388607, %v6018_v12  ;;  %vm1059_vm4 = vcmp.eq.s32.totalorder %v6019_v41, 2  ;;  %v4769_v3 = vshrl.u32 %v6020_v50, 5  ;;  %v1087_v30 = vshll.u32 %v6016_v48, %v6015_v51  ;;  %3415 = vmatprep.mubr.bf16.mxu0 %v759_v33 }
 0x1b2   :  { %v6021_v60 = vmov 2102212464   ;;  %v2726_v35 = vmul.f32 0.0, %v2627_v25  ;;  %vm1055_vm8 = vcmp.lt.s32.totalorder %v6019_v41, 2  ;;  %v3206_v43 = vmin.u32 %v1336_v21, %v4755_v59  ;;  %3416 = vmatmul.mubr.bf16.gmra.mrb[16].mxu0 %v760_v54  ;;  %v933_v41 = vld [vmem:[%s5923_s3 + $0x20] sm:$0xff] }
 0x1b3   :  { %v1088_v61 = vshrl.u32 %v6021_v60, %v6013_v46  ;;  %v1090_v7 = vshll.u32 %v6021_v60, %v6015_v51  ;;  %v6022_v57 = vmov 920167782   ;;  %vm1053_vm9 = vweird.f32 %v4141_v38 }
 0x1b4   :  { %v1091_v62 = vshrl.u32 %v6022_v57, %v6013_v46  ;;  %v6023_v53 = vmov 683565275   ;;  %v1083_v31 = vor.u32 %v1082_v14, %v6024_v10  ;;  %v1086_v52 = vor.u32 %v1085_v34, %v1084_v42  ;;  %2752 = vperm.xlu1 %3550, %v2726_v35  }
 0x1b5   :  { %v1080_v17 = vshrl.u32 %v6023_v53, %v6013_v46  ;;  %v1089_v26 = vor.u32 %v1088_v61, %v1087_v30  ;;  %v1338_v19 = vclz %v3206_v43  ;;  %v1093_v58 = vshll.u32 %v6022_v57, %v6015_v51  ;;  %v6026_v43 = vld [vmem:[#allocation22_spill] sm:$0xff] }
 0x1b6   :  { %v1092_v29 = vor.u32 %v1091_v62, %v1090_v7  ;;  %v6025_v32 = vmov 1326507024   ;;  %v1072_v18 = vor.u32 8388608, %v1071_v39  ;;  %vm1096_vm10 = vcmp.lt.s32.totalorder %v4769_v3, 1 }
 0x1b7   :  { %v1094_v15 = vshrl.u32 %v6025_v32, %v6013_v46  ;;  %vm1098_vm11 = vcmp.lt.s32.totalorder %v4769_v3, 3  ;;  %vm1099_vm12 = vcmp.lt.s32.totalorder %v4769_v3, 4  ;;  %v1326_v37 = vadd.s32 %v4356_v9, %v4331_v28 }
 0x1b8   :  { %v3207_v16 = vadd.s32 4294967294, %v1338_v19  ;;  %v1101_v36 = vsel %vm1099_vm12, %v1089_v26, 2102212464  ;;  %vm1097_vm13 = vcmp.lt.s32.totalorder %v4769_v3, 2  ;;  %v1100_v47 = vsel %vm1096_vm10, %v1080_v17, %v1083_v31  ;;  %v3652_v0 = vpop.eup %3651 }
 0x1b9   :  { %v1095_v22 = vor.u32 %v1094_v15, %v1093_v58  ;;  %v1104_v45 = vsel %vm1096_vm10, %v1083_v31, %v1086_v52  ;;  %v1105_v56 = vsel %vm1099_vm12, %v1092_v29, 920167782  ;;  %v1108_v63 = vsel %vm1096_vm10, %v1086_v52, %v1089_v26  ;;  %v3654_v11 = vpop.eup %3653 }
 0x1ba   :  { %vm3208_vm14 = vcmp.lt.s32.totalorder %v3207_v16, 0  ;;  %v1106_v49 = vsel %vm1098_vm11, %v1089_v26, %v1105_v56  ;;  %v1060_v2 = vxor.u32 2147483648, %v3652_v0  ;;  %v1102_v28 = vsel %vm1098_vm11, %v1086_v52, %v1101_v36 }
 0x1bb   :  { %v1109_v27 = vsel %vm1099_vm12, %v1095_v22, 1326507024  ;;  %v1341_v8 = vsel %vm3208_vm14, 0, %v3207_v16  ;;  %v1057_v44 = vxor.u32 2147483648, %v3654_v11  ;;  %v1107_v23 = vsel %vm1097_vm13, %v1104_v45, %v1106_v49 }
 0x1bc   :  { %v1110_v9 = vsel %vm1098_vm11, %v1092_v29, %v1109_v27  ;;  %v1342_v55 = vsub.s32 32, %v1341_v8  ;;  %v1343_v40 = vshll.u32 %v4755_v59, %v1341_v8  ;;  %v1346_v54 = vsub.s32 4294967266, %v1341_v8 }
 0x1bd   :  { %v1061_v24 = vsel %vm1059_vm4, %v1060_v2, %v3654_v11  ;;  %v1111_v13 = vsel %vm1097_vm13, %v1108_v63, %v1110_v9  ;;  %v1112_v6 = vshll.u32 %v1072_v18, 8  ;;  %v1058_v46 = vsel %vm1056_vm3, %v3652_v0, %v1057_v44  ;;  %v936_v63 = vld [vmem:[%s5923_s3 + $0x38] sm:$0xff] }
 0x1be   :  { %v1344_v14 = vshrl.u32 %v1326_v37, %v1342_v55  ;;  %v1347_v51 = vadd.s32 127, %v1346_v54  ;;  %v4813_v42 = vmul.f32 0.31415927, %v934_v1  ;;  %v1062_v59 = vsel %vm1055_vm8, %v1058_v46, %v1061_v24 }
 0x1bf   :  { %v1356_v34 = vsub.s32 4, %v4729_v4  ;;  %v4818_v33 = vmul.u32.u64.low %v1112_v6, %v1111_v13  ;;  %v4819_v25 = vmul.u32.u64.high %v1112_v6, %v1111_v13, %v4818_v33  ;;  %v1063_v21 = vsel %vm1053_vm9, nan, %v1062_v59 }
 0x1c0   :  { %v1345_v12 = vor.u32 %v1344_v14, %v1343_v40  ;;  %v1348_v39 = vshll.u32 %v1347_v51, 23  ;;  %v1103_v50 = vsel %vm1097_vm13, %v1100_v47, %v1102_v28  ;;  %v2609_v30 = vadd.f32 1.0, %v1063_v21 }
 0x1c1   :  { %v4825_v61 = vmul.u32.u64.low %v1112_v6, %v1107_v23  ;;  %v4826_v35 = vmul.u32.u64.high %v1112_v6, %v1107_v23, %v4825_v61  ;;  %vm1272_vm15 = vcmp.lt.s32.totalorder %v6026_v43, 0  ;;  %v1479_v38 = vand.u32 2139095040, %v4813_v42 }
 0x1c2   :  { %v1349_v7 = vor.u32 4788187, %v1348_v39  ;;  %v1352_v62 = vcvt.s32.f32 %v1345_v12  ;;  %v2625_v17 = vmul.f32 0.5, %v2609_v30  ;;  %v1357_v3 = vsel %vm1272_vm15, %v1356_v34, %v4729_v4 }
 0x1c3   :  { %v1119_v10 = vmul.u32 %v1112_v6, %v1103_v50  ;;  %v1476_v31 = vand.u32 2147483647, %v4813_v42  ;;  %vm1121_vm1 = vc.u32 %v4819_v25, %v4825_v61  ;;  %v1480_v26 = vshrl.u32 %v1479_v38, 23 }
 0x1c4   :  { %v1350_v52 = vand.u32 2147483647, %v1349_v7  ;;  %v4838_v19 = vmul.f32 0.31415927, %v933_v41  ;;  %2742 = vperm.xlu0 %3549, %v2625_v17   ;;  %v1122_v29 = vadd.s32 1, %v4826_v35  ;;  %v4858_v1 = vadd.s32 %v4825_v61, %v4819_v25 }
 0x1c5   :  { %v6027_v58 = vand.u32 2147483647, %v6026_v43  ;;  %v3213_v18 = vadd.s32 4294967169, %v1480_v26  ;;  %v1483_v16 = vand.u32 8388607, %v1476_v31  ;;  %vm1362_vm4 = vweird.f32 %v6026_v43 }
 0x1c6   :  { %v1353_v15 = vmul.f32 %v1352_v62, %v1350_v52  ;;  %v1123_v4 = vsel %vm1121_vm1, %v1122_v29, %v4826_v35  ;;  %v1376_v45 = vand.u32 2139095040, %v4838_v19  ;;  %v4860_v44 = vmul.f32 0.31415927, %v936_v63 }
 0x1c7   :  { %vm1271_vm2 = vcmp.le.f32.partialorder %v6027_v58, 0.7853982  ;;  %v1124_v36 = vadd.s32 %v1123_v4, %v1119_v10  ;;  %v1486_v47 = vadd.s32 1, %v3213_v18  ;;  %v1484_v11 = vor.u32 8388608, %v1483_v16 }
 0x1c8   :  { %v1359_v37 = vsel %vm1271_vm2, 0, %v1357_v3  ;;  %v1354_v22 = vxor.u32 2147483648, %v1353_v15  ;;  %v1377_v9 = vshrl.u32 %v1376_v45, 23  ;;  %v1373_v24 = vand.u32 2147483647, %v4838_v19 }
 0x1c9   :  { %v4849_v0 = vand.u32 3, %v1359_v37  ;;  %v1125_v49 = vadd.s32 536870912, %v1124_v36  ;;  %vm1487_vm6 = vcmp.gt.s32.totalorder %v1486_v47, 0  ;;  %v4869_v46 = vshll.u32 %v1484_v11, 8 }
 0x1ca   :  { %v1355_v56 = vsel %vm1272_vm15, %v1354_v22, %v1353_v15  ;;  %v1488_v2 = vsel %vm1487_vm6, %v1486_v47, 0  ;;  %v3209_v34 = vadd.s32 4294967169, %v1377_v9  ;;  %v1380_v7 = vand.u32 8388607, %v1373_v24 }
 0x1cb   :  { %v1358_v27 = vsel %vm1271_vm2, %v6026_v43, %v1355_v56  ;;  %v4855_v8 = vshrl.u32 %v1125_v49, 30  ;;  %v1490_v28 = vand.u32 31, %v1488_v2  ;;  %vm1368_vm5 = vcmp.eq.s32.totalorder %v4849_v0, 2 }
 0x1cc   :  { %3655 = vcosq.f32 %v1358_v27  ;;  %vm1365_vm7 = vcmp.eq.s32.totalorder %v4849_v0, 0  ;;  %v1489_v23 = vshrl.u32 %v1488_v2, 5  ;;  %vm1364_vm3 = vcmp.lt.s32.totalorder %v4849_v0, 2 }
 0x1cd   :  { %3657 = vsinq.f32 %v1358_v27  ;;  %v1127_v55 = vshll.u32 %v4855_v8, 30  ;;  %v1491_v40 = vsub.s32 32, %v1490_v28  ;;  %v1493_v54 = vshll.u32 %v6023_v53, %v1490_v28 }
 0x1ce   :  { %v1496_v13 = vshll.u32 %v6014_v20, %v1490_v28  ;;  %v1502_v6 = vshll.u32 %v6021_v60, %v1490_v28  ;;  %v1499_v59 = vshll.u32 %v6016_v48, %v1490_v28  ;;  %v1505_v12 = vshll.u32 %v6022_v57, %v1490_v28 }
 0x1cf   :  { %v4872_v14 = vsub.s32 %v1124_v36, %v1127_v55  ;;  %v1494_v51 = vshrl.u32 %v6014_v20, %v1491_v40  ;;  %v1497_v33 = vshrl.u32 %v6016_v48, %v1491_v40  ;;  %v1500_v25 = vshrl.u32 %v6021_v60, %v1491_v40 }
 0x1d0   :  { %v1503_v21 = vshrl.u32 %v6022_v57, %v1491_v40  ;;  %v1492_v50 = vshrl.u32 %v6023_v53, %v1491_v40  ;;  %v1506_v61 = vshrl.u32 %v6025_v32, %v1491_v40  ;;  %vm1508_vm8 = vcmp.lt.s32.totalorder %v1489_v23, 1 }
 0x1d1   :  { %v1130_v39 = vsub.s32 0, %v4872_v14  ;;  %v1495_v30 = vor.u32 %v1494_v51, %v1493_v54  ;;  %v1498_v35 = vor.u32 %v1497_v33, %v1496_v13  ;;  %v1501_v38 = vor.u32 %v1500_v25, %v1499_v59 }
 0x1d2   :  { %v1504_v41 = vor.u32 %v1503_v21, %v1502_v6  ;;  %v1383_v17 = vadd.s32 1, %v3209_v34  ;;  %v1682_v3 = vand.u32 2147483647, %v4860_v44  ;;  %v1507_v10 = vor.u32 %v1506_v61, %v1505_v12 }
 0x1d3   :  { %v3198_v62 = vmin.u32 %v1130_v39, %v4872_v14  ;;  %vm1509_vm9 = vcmp.lt.s32.totalorder %v1489_v23, 2  ;;  %vm1510_vm10 = vcmp.lt.s32.totalorder %v1489_v23, 3  ;;  %vm1511_vm11 = vcmp.lt.s32.totalorder %v1489_v23, 4 }
 0x1d4   :  { %v1512_v29 = vsel %vm1508_vm8, %v1492_v50, %v1495_v30  ;;  %v1513_v58 = vsel %vm1511_vm11, %v1501_v38, 2102212464  ;;  %v1516_v15 = vsel %vm1508_vm8, %v1495_v30, %v1498_v35  ;;  %v1517_v16 = vsel %vm1511_vm11, %v1504_v41, 920167782 }
 0x1d5   :  { %v1132_v26 = vclz %v3198_v62  ;;  %v1514_v4 = vsel %vm1510_vm10, %v1498_v35, %v1513_v58  ;;  %v1381_v22 = vor.u32 8388608, %v1380_v7  ;;  %v1518_v45 = vsel %vm1510_vm10, %v1501_v38, %v1517_v16 }
 0x1d6   :  { %v3656_v52 = vpop.eup %3655  ;;  %v1520_v56 = vsel %vm1508_vm8, %v1498_v35, %v1501_v38  ;;  %v1515_v63 = vsel %vm1509_vm9, %v1512_v29, %v1514_v4  ;;  %v1519_v27 = vsel %vm1509_vm9, %v1516_v15, %v1518_v45  ;;  %v1521_v11 = vsel %vm1511_vm11, %v1507_v10, 1326507024 }
 0x1d7   :  { %v3658_v18 = vpop.eup %3657  ;;  %v1369_v37 = vxor.u32 2147483648, %v3656_v52  ;;  %v3199_v47 = vadd.s32 4294967294, %v1132_v26  ;;  %v1522_v28 = vsel %vm1510_vm10, %v1504_v41, %v1521_v11  ;;  %vm1384_vm13 = vcmp.gt.s32.totalorder %v1383_v17, 0 }
 0x1d8   :  { %v1366_v36 = vxor.u32 2147483648, %v3658_v18  ;;  %v1523_v40 = vsel %vm1509_vm9, %v1520_v56, %v1522_v28  ;;  %v1385_v54 = vsel %vm1384_vm13, %v1383_v17, 0  ;;  %vm1066_vm14 = vcmp.lt.s32.totalorder %v6017_v5, 0 }
 0x1d9   :  { %v1370_v49 = vsel %vm1368_vm5, %v1369_v37, %v3658_v18  ;;  %vm3200_vm12 = vcmp.lt.s32.totalorder %v3199_v47, 0  ;;  %v4910_v33 = vmul.u32.u64.low %v4869_v46, %v1523_v40  ;;  %v4911_v25 = vmul.u32.u64.high %v4869_v46, %v1523_v40, %v4910_v33 }
 0x1da   :  { %v1367_v2 = vsel %vm1365_vm7, %v3656_v52, %v1366_v36  ;;  %v1135_v55 = vsel %vm3200_vm12, 0, %v3199_v47  ;;  %v4913_v21 = vshrl.u32 %v1385_v54, 5  ;;  %v4922_v50 = vshll.u32 %v1381_v22, 8 }
 0x1db   :  { %v1371_v9 = vsel %vm1364_vm3, %v1367_v2, %v1370_v49  ;;  %v1136_v6 = vsub.s32 32, %v1135_v55  ;;  %v1137_v51 = vshll.u32 %v4872_v14, %v1135_v55  ;;  %v1140_v59 = vsub.s32 4294967266, %v1135_v55 }
 0x1dc   :  { %v1372_v13 = vsel %vm1362_vm4, nan, %v1371_v9  ;;  %v4918_v12 = vmul.u32.u64.low %v4869_v46, %v1519_v27  ;;  %v4919_v43 = vmul.u32.u64.high %v4869_v46, %v1519_v27, %v4918_v12  ;;  %v1387_v14 = vand.u32 31, %v1385_v54 }
 0x1dd   :  { %v2612_v34 = vadd.f32 1.0, %v1372_v13  ;;  %v1138_v0 = vshrl.u32 %v4858_v1, %v1136_v6  ;;  %v1141_v23 = vadd.s32 127, %v1140_v59  ;;  %v1685_v30 = vand.u32 2139095040, %v4860_v44 }
 0x1de   :  { %v6028_v61 = vand.u32 2147483647, %v6017_v5  ;;  %v1150_v7 = vsub.s32 4, %v4855_v8  ;;  %v1531_v62 = vmul.u32 %v4869_v46, %v1515_v63  ;;  %vm1533_vm1 = vc.u32 %v4911_v25, %v4918_v12 }
 0x1df   :  { %v2628_v39 = vmul.f32 0.5, %v2612_v34  ;;  %v1139_v41 = vor.u32 %v1138_v0, %v1137_v51  ;;  %v1142_v1 = vshll.u32 %v1141_v23, 23  ;;  %v1388_v17 = vsub.s32 32, %v1387_v14 }
 0x1e0   :  { %vm4927_vm15 = vcmp.le.f32.partialorder %v6028_v61, 0.7853982  ;;  %vm1405_vm2 = vcmp.lt.s32.totalorder %v4913_v21, 1  ;;  %v1534_v26 = vadd.s32 1, %v4919_v43  ;;  %v1390_v29 = vshll.u32 %v6023_v53, %v1387_v14 }
 0x1e1   :  { %v2727_v38 = vmul.f32 0.0, %v2628_v39  ;;  %v1143_v10 = vor.u32 4788187, %v1142_v1  ;;  %v1146_v52 = vcvt.s32.f32 %v1139_v41  ;;  %v1389_v58 = vshrl.u32 %v6023_v53, %v1388_v17 }
 0x1e2   :  { %v1391_v15 = vshrl.u32 %v6014_v20, %v1388_v17  ;;  %v1393_v46 = vshll.u32 %v6014_v20, %v1387_v14  ;;  %v1394_v18 = vshrl.u32 %v6016_v48, %v1388_v17  ;;  %v1535_v4 = vsel %vm1533_vm1, %v1534_v26, %v4919_v43 }
 0x1e3   :  { %2757 = vperm.xlu1 %3550, %v2727_v38   ;;  %v1144_v37 = vand.u32 2147483647, %v1143_v10  ;;  %v1396_v16 = vshll.u32 %v6016_v48, %v1387_v14  ;;  %v1397_v22 = vshrl.u32 %v6021_v60, %v1388_v17  ;;  %v1536_v36 = vadd.s32 %v1535_v4, %v1531_v62 }
 0x1e4   :  { %v1392_v47 = vor.u32 %v1391_v15, %v1390_v29  ;;  %v1395_v45 = vor.u32 %v1394_v18, %v1393_v46  ;;  %v1399_v56 = vshll.u32 %v6021_v60, %v1387_v14  ;;  %v1400_v27 = vshrl.u32 %v6022_v57, %v1388_v17 }
 0x1e5   :  { %v1147_v49 = vmul.f32 %v1146_v52, %v1144_v37  ;;  %v1398_v63 = vor.u32 %v1397_v22, %v1396_v16  ;;  %v1402_v11 = vshll.u32 %v6022_v57, %v1387_v14  ;;  %v1151_v2 = vsel %vm1066_vm14, %v1150_v7, %v4855_v8 }
 0x1e6   :  { %v1537_v28 = vadd.s32 536870912, %v1536_v36  ;;  %v1403_v9 = vshrl.u32 %v6025_v32, %v1388_v17  ;;  %vm1408_vm6 = vcmp.lt.s32.totalorder %v4913_v21, 4  ;;  %v1401_v40 = vor.u32 %v1400_v27, %v1399_v56 }
 0x1e7   :  { %v1148_v55 = vxor.u32 2147483648, %v1147_v49  ;;  %vm1407_vm5 = vcmp.lt.s32.totalorder %v4913_v21, 3  ;;  %v1410_v54 = vsel %vm1408_vm6, %v1398_v63, 2102212464  ;;  %vm1406_vm7 = vcmp.lt.s32.totalorder %v4913_v21, 2  ;;  %v935_v21 = vld [vmem:[%s5923_s3 + $0x30] sm:$0xff] }
 0x1e8   :  { %v1538_v13 = vshrl.u32 %v1537_v28, 30  ;;  %v1404_v6 = vor.u32 %v1403_v9, %v1402_v11  ;;  %v1413_v51 = vsel %vm1405_vm2, %v1392_v47, %v1395_v45  ;;  %v1409_v59 = vsel %vm1405_vm2, %v1389_v58, %v1392_v47 }
 0x1e9   :  { %v1149_v8 = vsel %vm1066_vm14, %v1148_v55, %v1147_v49  ;;  %v1414_v34 = vsel %vm1408_vm6, %v1401_v40, 920167782  ;;  %v1417_v33 = vsel %vm1405_vm2, %v1395_v45, %v1398_v63  ;;  %v1411_v43 = vsel %vm1407_vm5, %v1395_v45, %v1410_v54 }
 0x1ea   :  { %v1152_v0 = vsel %vm4927_vm15, %v6017_v5, %v1149_v8  ;;  %v1539_v23 = vshll.u32 %v1538_v13, 30  ;;  %v1415_v39 = vsel %vm1407_vm5, %v1398_v63, %v1414_v34  ;;  %v1418_v61 = vsel %vm1408_vm6, %v1404_v6, 1326507024 }
 0x1eb   :  { %3659 = vcosq.f32 %v1152_v0  ;;  %v1416_v14 = vsel %vm1406_vm7, %v1413_v51, %v1415_v39  ;;  %v1686_v41 = vshrl.u32 %v1685_v30, 23  ;;  %v1153_v1 = vsel %vm4927_vm15, 0, %v1151_v2 }
 0x1ec   :  { %3661 = vsinq.f32 %v1152_v0  ;;  %v4980_v7 = vsub.s32 %v1536_v36, %v1539_v23  ;;  %v1419_v62 = vsel %vm1407_vm5, %v1401_v40, %v1418_v61  ;;  %v1412_v38 = vsel %vm1406_vm7, %v1409_v59, %v1411_v43 }
 0x1ed   :  { %v1420_v17 = vsel %vm1406_vm7, %v1417_v33, %v1419_v62  ;;  %v4989_v10 = vmul.u32.u64.low %v4922_v50, %v1416_v14  ;;  %v4990_v52 = vmul.u32.u64.high %v4922_v50, %v1416_v14, %v4989_v10  ;;  %v1157_v29 = vand.u32 3, %v1153_v1 }
 0x1ee   :  { %v1542_v30 = vsub.s32 0, %v4980_v7  ;;  %v4995_v35 = vmul.u32.u64.low %v4922_v50, %v1420_v17  ;;  %v4996_v26 = vmul.u32.u64.high %v4922_v50, %v1420_v17, %v4995_v35  ;;  %v3221_v58 = vadd.s32 4294967169, %v1686_v41 }
 0x1ef   :  { %v1562_v46 = vsub.s32 4, %v1538_v13  ;;  %v1428_v18 = vmul.u32 %v4922_v50, %v1412_v38  ;;  %vm1156_vm3 = vweird.f32 %v6017_v5  ;;  %v1431_v37 = vadd.s32 1, %v4990_v52 }
 0x1f0   :  { %v3214_v15 = vmin.u32 %v1542_v30, %v4980_v7  ;;  %v1689_v4 = vand.u32 8388607, %v1682_v3  ;;  %v1692_v16 = vadd.s32 1, %v3221_v58  ;;  %vm5009_vm4 = vcmp.le.f32.partialorder %v1476_v31, 0.7853982 }
 0x1f1   :  { %vm1478_vm8 = vcmp.lt.s32.totalorder %v4813_v42, 0  ;;  %vm1430_vm9 = vc.u32 %v4996_v26, %v4989_v10  ;;  %vm1158_vm10 = vcmp.lt.s32.totalorder %v1157_v29, 2  ;;  %v5017_v47 = vmul.f32 0.31415927, %v935_v21 }
 0x1f2   :  { %v1544_v50 = vclz %v3214_v15  ;;  %v1432_v36 = vsel %vm1430_vm9, %v1431_v37, %v4990_v52  ;;  %vm1693_vm11 = vcmp.gt.s32.totalorder %v1692_v16, 0  ;;  %v5021_v56 = vsel %vm1478_vm8, %v1562_v46, %v1538_v13 }
 0x1f3   :  { %v1433_v31 = vadd.s32 %v1432_v36, %v1428_v18  ;;  %v1694_v49 = vsel %vm1693_vm11, %v1692_v16, 0  ;;  %vm1159_vm12 = vcmp.eq.s32.totalorder %v1157_v29, 0  ;;  %vm1162_vm13 = vcmp.eq.s32.totalorder %v1157_v29, 2 }
 0x1f4   :  { %v3215_v45 = vadd.s32 4294967294, %v1544_v50  ;;  %v1690_v27 = vor.u32 8388608, %v1689_v4  ;;  %v1696_v11 = vand.u32 31, %v1694_v49  ;;  %v1532_v9 = vadd.s32 %v4918_v12, %v4911_v25 }
 0x1f5   :  { %v3660_v63 = vpop.eup %3659  ;;  %v1434_v55 = vadd.s32 536870912, %v1433_v31  ;;  %v1565_v13 = vsel %vm5009_vm4, 0, %v5021_v56  ;;  %v1579_v25 = vand.u32 2147483647, %v5017_v47  ;;  %v1582_v14 = vand.u32 2139095040, %v5017_v47 }
 0x1f6   :  { %v3662_v2 = vpop.eup %3661  ;;  %v1163_v28 = vxor.u32 2147483648, %v3660_v63  ;;  %vm3216_vm14 = vcmp.lt.s32.totalorder %v3215_v45, 0  ;;  %v1697_v6 = vsub.s32 32, %v1696_v11  ;;  %v5032_v23 = vshll.u32 %v1690_v27, 8 }
 0x1f7   :  { %v1160_v40 = vxor.u32 2147483648, %v3662_v2  ;;  %v1547_v54 = vsel %vm3216_vm14, 0, %v3215_v45  ;;  %v5030_v0 = vshrl.u32 %v1434_v55, 30  ;;  %v1699_v1 = vshll.u32 %v6023_v53, %v1696_v11 }
 0x1f8   :  { %v1164_v51 = vsel %vm1162_vm13, %v1163_v28, %v3662_v2  ;;  %v1548_v8 = vsub.s32 32, %v1547_v54  ;;  %v1549_v59 = vshll.u32 %v4980_v7, %v1547_v54  ;;  %v1552_v34 = vsub.s32 4294967266, %v1547_v54 }
 0x1f9   :  { %v1161_v33 = vsel %vm1159_vm12, %v3660_v63, %v1160_v40  ;;  %v1436_v41 = vshll.u32 %v5030_v0, 30  ;;  %v1700_v7 = vshrl.u32 %v6014_v20, %v1697_v6  ;;  %v1702_v52 = vshll.u32 %v6014_v20, %v1696_v11 }
 0x1fa   :  { %v1165_v12 = vsel %vm1158_vm10, %v1161_v33, %v1164_v51  ;;  %v1550_v43 = vshrl.u32 %v1532_v9, %v1548_v8  ;;  %v1553_v39 = vadd.s32 127, %v1552_v34  ;;  %v1703_v35 = vshrl.u32 %v6016_v48, %v1697_v6 }
 0x1fb   :  { %v1166_v61 = vsel %vm1156_vm3, nan, %v1165_v12  ;;  %v5043_v30 = vsub.s32 %v1433_v31, %v1436_v41  ;;  %v1705_v29 = vshll.u32 %v6016_v48, %v1696_v11  ;;  %v1706_v5 = vshrl.u32 %v6021_v60, %v1697_v6 }
 0x1fc   :  { %v2610_v62 = vadd.f32 1.0, %v1166_v61  ;;  %v1551_v38 = vor.u32 %v1550_v43, %v1549_v59  ;;  %v1554_v17 = vshll.u32 %v1553_v39, 23  ;;  %v1695_v18 = vshrl.u32 %v1694_v49, 5 }
 0x1fd   :  { %v1429_v21 = vadd.s32 %v4989_v10, %v4996_v26  ;;  %v1439_v37 = vsub.s32 0, %v5043_v30  ;;  %v1698_v4 = vshrl.u32 %v6023_v53, %v1697_v6  ;;  %v1583_v16 = vshrl.u32 %v1582_v14, 23 }
 0x1fe   :  { %v2626_v58 = vmul.f32 0.5, %v2610_v62  ;;  %v1555_v15 = vor.u32 4788187, %v1554_v17  ;;  %v1558_v46 = vcvt.s32.f32 %v1551_v38  ;;  %v1708_v36 = vshll.u32 %v6021_v60, %v1696_v11 }
 0x1ff   :  { %v1709_v45 = vshrl.u32 %v6022_v57, %v1697_v6  ;;  %v1711_v31 = vshll.u32 %v6022_v57, %v1696_v11  ;;  %v3210_v63 = vmin.u32 %v1439_v37, %v5043_v30  ;;  %v1701_v27 = vor.u32 %v1700_v7, %v1699_v1 }
 0x200   :  { %2747 = vperm.xlu0 %3549, %v2626_v58   ;;  %v1556_v50 = vand.u32 2147483647, %v1555_v15  ;;  %v1704_v49 = vor.u32 %v1703_v35, %v1702_v52  ;;  %v1707_v2 = vor.u32 %v1706_v5, %v1705_v29  ;;  %v1712_v26 = vshrl.u32 %v6025_v32, %v1697_v6 }
 0x201   :  { %v1710_v10 = vor.u32 %v1709_v45, %v1708_v36  ;;  %vm1714_vm15 = vcmp.lt.s32.totalorder %v1695_v18, 1  ;;  %v1441_v9 = vclz %v3210_v63  ;;  %vm1715_vm1 = vcmp.lt.s32.totalorder %v1695_v18, 2 }
 0x202   :  { %v1559_v28 = vmul.f32 %v1558_v46, %v1556_v50  ;;  %vm1716_vm2 = vcmp.lt.s32.totalorder %v1695_v18, 3  ;;  %vm1717_vm6 = vcmp.lt.s32.totalorder %v1695_v18, 4  ;;  %v1713_v40 = vor.u32 %v1712_v26, %v1711_v31 }
 0x203   :  { %v1718_v54 = vsel %vm1714_vm15, %v1698_v4, %v1701_v27  ;;  %v1719_v11 = vsel %vm1717_vm6, %v1707_v2, 2102212464  ;;  %v3211_v51 = vadd.s32 4294967294, %v1441_v9  ;;  %v1722_v59 = vsel %vm1714_vm15, %v1701_v27, %v1704_v49 }
 0x204   :  { %v1560_v55 = vxor.u32 2147483648, %v1559_v28  ;;  %v1720_v8 = vsel %vm1716_vm2, %v1704_v49, %v1719_v11  ;;  %v1723_v34 = vsel %vm1717_vm6, %v1710_v10, 920167782  ;;  %v1459_v33 = vsub.s32 4, %v5030_v0 }
 0x205   :  { %v1724_v12 = vsel %vm1716_vm2, %v1707_v2, %v1723_v34  ;;  %v1726_v43 = vsel %vm1714_vm15, %v1704_v49, %v1707_v2  ;;  %vm3212_vm5 = vcmp.lt.s32.totalorder %v3211_v51, 0  ;;  %v1727_v61 = vsel %vm1717_vm6, %v1713_v40, 1326507024 }
 0x206   :  { %v1561_v6 = vsel %vm1478_vm8, %v1560_v55, %v1559_v28  ;;  %v1725_v14 = vsel %vm1715_vm1, %v1722_v59, %v1724_v12  ;;  %v1444_v41 = vsel %vm3212_vm5, 0, %v3211_v51  ;;  %v1721_v1 = vsel %vm1715_vm1, %v1718_v54, %v1720_v8 }
 0x207   :  { %v1564_v39 = vsel %vm5009_vm4, %v4813_v42, %v1561_v6  ;;  %v1728_v7 = vsel %vm1716_vm2, %v1710_v10, %v1727_v61  ;;  %v1445_v62 = vsub.s32 32, %v1444_v41  ;;  %v1446_v38 = vshll.u32 %v5043_v30, %v1444_v41 }
 0x208   :  { %3663 = vcosq.f32 %v1564_v39  ;;  %v1449_v17 = vsub.s32 4294967266, %v1444_v41  ;;  %v1729_v52 = vsel %vm1715_vm1, %v1726_v43, %v1728_v7  ;;  %v3217_v5 = vadd.s32 4294967169, %v1583_v16  ;;  %v938_v16 = vld [vmem:[%s5923_s3 + $0x48] sm:$0xff] }
 0x209   :  { %3665 = vsinq.f32 %v1564_v39  ;;  %v5077_v35 = vmul.u32.u64.low %v5032_v23, %v1725_v14  ;;  %v5078_v29 = vmul.u32.u64.high %v5032_v23, %v1725_v14, %v5077_v35  ;;  %v1447_v58 = vshrl.u32 %v1429_v21, %v1445_v62 }
 0x20a   :  { %v1450_v15 = vadd.s32 127, %v1449_v17  ;;  %v5082_v46 = vmul.u32.u64.low %v5032_v23, %v1729_v52  ;;  %v5083_v37 = vmul.u32.u64.high %v5032_v23, %v1729_v52, %v5082_v46  ;;  %v1586_v4 = vand.u32 8388607, %v1579_v25 }
 0x20b   :  { %v1589_v50 = vadd.s32 1, %v3217_v5  ;;  %vm1375_vm7 = vcmp.lt.s32.totalorder %v4838_v19, 0  ;;  %v1448_v30 = vor.u32 %v1447_v58, %v1446_v38  ;;  %v1737_v36 = vmul.u32 %v5032_v23, %v1721_v1 }
 0x20c   :  { %v1451_v18 = vshll.u32 %v1450_v15, 23  ;;  %v1569_v21 = vand.u32 3, %v1565_v13  ;;  %v1460_v45 = vsel %vm1375_vm7, %v1459_v33, %v5030_v0  ;;  %v1740_v31 = vadd.s32 1, %v5078_v29 }
 0x20d   :  { %vm1590_vm3 = vcmp.gt.s32.totalorder %v1589_v50, 0  ;;  %vm5102_vm8 = vcmp.le.f32.partialorder %v1373_v24, 0.7853982  ;;  %v1455_v27 = vcvt.s32.f32 %v1448_v30  ;;  %vm1739_vm9 = vc.u32 %v5083_v37, %v5077_v35 }
 0x20e   :  { %v1452_v63 = vor.u32 4788187, %v1451_v18  ;;  %v1741_v22 = vsel %vm1739_vm9, %v1740_v31, %v5078_v29  ;;  %v1587_v56 = vor.u32 8388608, %v1586_v4  ;;  %v1591_v13 = vsel %vm1590_vm3, %v1589_v50, 0 }
 0x20f   :  { %v5109_v49 = vmul.f32 0.31415927, %v938_v16  ;;  %v1462_v2 = vsel %vm5102_vm8, 0, %v1460_v45  ;;  %v1742_v28 = vadd.s32 %v1741_v22, %v1737_v36  ;;  %v1593_v24 = vand.u32 31, %v1591_v13 }
 0x210   :  { %v1453_v0 = vand.u32 2147483647, %v1452_v63  ;;  %vm1568_vm4 = vweird.f32 %v4813_v42  ;;  %vm1570_vm10 = vcmp.lt.s32.totalorder %v1569_v21, 2  ;;  %vm1571_vm11 = vcmp.eq.s32.totalorder %v1569_v21, 0 }
 0x211   :  { %vm1574_vm12 = vcmp.eq.s32.totalorder %v1569_v21, 2  ;;  %v1743_v40 = vadd.s32 536870912, %v1742_v28  ;;  %v1594_v54 = vsub.s32 32, %v1593_v24  ;;  %v5114_v51 = vand.u32 3, %v1462_v2 }
 0x212   :  { %v3664_v10 = vpop.eup %3663  ;;  %v1456_v55 = vmul.f32 %v1455_v27, %v1453_v0  ;;  %v5116_v8 = vshll.u32 %v1587_v56, 8  ;;  %v1891_v59 = vand.u32 2139095040, %v5109_v49  ;;  %v1592_v12 = vshrl.u32 %v1591_v13, 5 }
 0x213   :  { %v3666_v26 = vpop.eup %3665  ;;  %v1575_v9 = vxor.u32 2147483648, %v3664_v10  ;;  %v5119_v33 = vshrl.u32 %v1743_v40, 30  ;;  %v1596_v39 = vshll.u32 %v6023_v53, %v1593_v24  ;;  %v1597_v14 = vshrl.u32 %v6014_v20, %v1594_v54 }
 0x214   :  { %v1572_v11 = vxor.u32 2147483648, %v3666_v26  ;;  %v1457_v6 = vxor.u32 2147483648, %v1456_v55  ;;  %v1599_v61 = vshll.u32 %v6014_v20, %v1593_v24  ;;  %v1600_v62 = vshrl.u32 %v6016_v48, %v1594_v54 }
 0x215   :  { %v1576_v34 = vsel %vm1574_vm12, %v1575_v9, %v3666_v26  ;;  %v1745_v7 = vshll.u32 %v5119_v33, 30  ;;  %v1602_v52 = vshll.u32 %v6016_v48, %v1593_v24  ;;  %v1603_v29 = vshrl.u32 %v6021_v60, %v1594_v54 }
 0x216   :  { %v1573_v43 = vsel %vm1571_vm11, %v3664_v10, %v1572_v11  ;;  %v1458_v1 = vsel %vm1375_vm7, %v1457_v6, %v1456_v55  ;;  %v1892_v15 = vshrl.u32 %v1891_v59, 23  ;;  %v1595_v46 = vshrl.u32 %v6023_v53, %v1594_v54 }
 0x217   :  { %v1577_v41 = vsel %vm1570_vm10, %v1573_v43, %v1576_v34  ;;  %v1461_v17 = vsel %vm5102_vm8, %v4838_v19, %v1458_v1  ;;  %v5136_v58 = vsub.s32 %v1742_v28, %v1745_v7  ;;  %v1598_v4 = vor.u32 %v1597_v14, %v1596_v39 }
 0x218   :  { %v1578_v38 = vsel %vm1568_vm4, nan, %v1577_v41  ;;  %3667 = vcosq.f32 %v1461_v17  ;;  %v1605_v42 = vshll.u32 %v6021_v60, %v1593_v24  ;;  %vm1471_vm13 = vcmp.eq.s32.totalorder %v5114_v51, 2 }
 0x219   :  { %v2614_v5 = vadd.f32 1.0, %v1578_v38  ;;  %3669 = vsinq.f32 %v1461_v17  ;;  %v1748_v30 = vsub.s32 0, %v5136_v58  ;;  %v1601_v18 = vor.u32 %v1600_v62, %v1599_v61 }
 0x21a   :  { %v1606_v36 = vshrl.u32 %v6022_v57, %v1594_v54  ;;  %vm1468_vm14 = vcmp.eq.s32.totalorder %v5114_v51, 0  ;;  %v1604_v16 = vor.u32 %v1603_v29, %v1602_v52  ;;  %v1608_v21 = vshll.u32 %v6022_v57, %v1593_v24 }
 0x21b   :  { %v2630_v50 = vmul.f32 0.5, %v2614_v5  ;;  %v1609_v45 = vshrl.u32 %v6025_v32, %v1594_v54  ;;  %vm1611_vm15 = vcmp.lt.s32.totalorder %v1592_v12, 1  ;;  %vm1467_vm1 = vcmp.lt.s32.totalorder %v5114_v51, 2 }
 0x21c   :  { %v3222_v23 = vmin.u32 %v1748_v30, %v5136_v58  ;;  %v1888_v63 = vand.u32 2147483647, %v5109_v49  ;;  %v3229_v27 = vadd.s32 4294967169, %v1892_v15  ;;  %v1607_v22 = vor.u32 %v1606_v36, %v1605_v42 }
 0x21d   :  { %v2729_v31 = vmul.f32 0.0, %v2630_v50  ;;  %v1610_v56 = vor.u32 %v1609_v45, %v1608_v21  ;;  %vm1612_vm2 = vcmp.lt.s32.totalorder %v1592_v12, 2  ;;  %vm1613_vm6 = vcmp.lt.s32.totalorder %v1592_v12, 3 }
 0x21e   :  { %v1750_v13 = vclz %v3222_v23  ;;  %vm1614_vm5 = vcmp.lt.s32.totalorder %v1592_v12, 4  ;;  %v1615_v0 = vsel %vm1611_vm15, %v1595_v46, %v1598_v4  ;;  %v1619_v2 = vsel %vm1611_vm15, %v1598_v4, %v1601_v18 }
 0x21f   :  { %2767 = vperm.xlu1 %3550, %v2729_v31   ;;  %v1616_v28 = vsel %vm1614_vm5, %v1604_v16, 2102212464  ;;  %v1620_v24 = vsel %vm1614_vm5, %v1607_v22, 920167782  ;;  %v1623_v10 = vsel %vm1611_vm15, %v1601_v18, %v1604_v16  ;;  %v1624_v26 = vsel %vm1614_vm5, %v1610_v56, 1326507024 }
 0x220   :  { %v3223_v9 = vadd.s32 4294967294, %v1750_v13  ;;  %v1617_v55 = vsel %vm1613_vm6, %v1601_v18, %v1616_v28  ;;  %v1621_v40 = vsel %vm1613_vm6, %v1604_v16, %v1620_v24  ;;  %v1625_v54 = vsel %vm1613_vm6, %v1607_v22, %v1624_v26 }
 0x221   :  { %v1738_v11 = vadd.s32 %v5077_v35, %v5083_v37  ;;  %v1622_v59 = vsel %vm1612_vm2, %v1619_v2, %v1621_v40  ;;  %v1626_v34 = vsel %vm1612_vm2, %v1623_v10, %v1625_v54  ;;  %v1898_v6 = vadd.s32 1, %v3229_v27 }
 0x222   :  { %v3668_v43 = vpop.eup %3667  ;;  %vm3224_vm7 = vcmp.lt.s32.totalorder %v3223_v9, 0  ;;  %v1618_v39 = vsel %vm1612_vm2, %v1615_v0, %v1617_v55  ;;  %v5158_v14 = vmul.u32.u64.low %v5116_v8, %v1626_v34  ;;  %v5159_v61 = vmul.u32.u64.high %v5116_v8, %v1626_v34, %v5158_v14 }
 0x223   :  { %v3670_v41 = vpop.eup %3669  ;;  %v1472_v1 = vxor.u32 2147483648, %v3668_v43  ;;  %v1753_v7 = vsel %vm3224_vm7, 0, %v3223_v9  ;;  %v5162_v62 = vmul.u32.u64.low %v5116_v8, %v1622_v59  ;;  %v5163_v38 = vmul.u32.u64.high %v5116_v8, %v1622_v59, %v5162_v62 }
 0x224   :  { %v1469_v35 = vxor.u32 2147483648, %v3670_v41  ;;  %v1754_v37 = vsub.s32 32, %v1753_v7  ;;  %v1755_v17 = vshll.u32 %v5136_v58, %v1753_v7  ;;  %v1758_v52 = vsub.s32 4294967266, %v1753_v7 }
 0x225   :  { %vm1465_vm3 = vweird.f32 %v4838_v19  ;;  %v1473_v12 = vsel %vm1471_vm13, %v1472_v1, %v3670_v41  ;;  %v1895_v29 = vand.u32 8388607, %v1888_v63  ;;  %vm1899_vm8 = vcmp.gt.s32.totalorder %v1898_v6, 0 }
 0x226   :  { %v1470_v5 = vsel %vm1468_vm14, %v3668_v43, %v1469_v35  ;;  %v1756_v15 = vshrl.u32 %v1738_v11, %v1754_v37  ;;  %v1759_v46 = vadd.s32 127, %v1758_v52  ;;  %v1634_v4 = vmul.u32 %v5116_v8, %v1618_v39 }
 0x227   :  { %v1474_v58 = vsel %vm1467_vm1, %v1470_v5, %v1473_v12  ;;  %vm1636_vm9 = vc.u32 %v5159_v61, %v5162_v62  ;;  %v1637_v19 = vadd.s32 1, %v5163_v38  ;;  %v1900_v42 = vsel %vm1899_vm8, %v1898_v6, 0 }
 0x228   :  { %v1475_v50 = vsel %vm1465_vm3, nan, %v1474_v58  ;;  %vm1684_vm4 = vcmp.lt.s32.totalorder %v4860_v44, 0  ;;  %v1757_v30 = vor.u32 %v1756_v15, %v1755_v17  ;;  %v1760_v18 = vshll.u32 %v1759_v46, 23 }
 0x229   :  { %v2613_v36 = vadd.f32 1.0, %v1475_v50  ;;  %v1638_v16 = vsel %vm1636_vm9, %v1637_v19, %v5163_v38  ;;  %v1896_v21 = vor.u32 8388608, %v1895_v29  ;;  %v1902_v45 = vand.u32 31, %v1900_v42 }
 0x22a   :  { %v1761_v8 = vor.u32 4788187, %v1760_v18  ;;  %v1764_v31 = vcvt.s32.f32 %v1757_v30  ;;  %v1768_v51 = vsub.s32 4, %v5119_v33  ;;  %v1639_v23 = vadd.s32 %v1638_v16, %v1634_v4 }
 0x22b   :  { %v2629_v27 = vmul.f32 0.5, %v2613_v36  ;;  %v1901_v22 = vshrl.u32 %v1900_v42, 5  ;;  %v1903_v56 = vsub.s32 32, %v1902_v45  ;;  %v1905_v13 = vshll.u32 %v6023_v53, %v1902_v45 }
 0x22c   :  { %v1762_v0 = vand.u32 2147483647, %v1761_v8  ;;  %v1640_v2 = vadd.s32 536870912, %v1639_v23  ;;  %v1908_v28 = vshll.u32 %v6014_v20, %v1902_v45  ;;  %v1911_v24 = vshll.u32 %v6016_v48, %v1902_v45 }
 0x22d   :  { %v2728_v10 = vmul.f32 0.0, %v2629_v27  ;;  %v1906_v26 = vshrl.u32 %v6014_v20, %v1903_v56  ;;  %v1909_v9 = vshrl.u32 %v6016_v48, %v1903_v56  ;;  %v1914_v55 = vshll.u32 %v6021_v60, %v1902_v45 }
 0x22e   :  { %v1765_v40 = vmul.f32 %v1764_v31, %v1762_v0  ;;  %v5189_v54 = vshrl.u32 %v1640_v2, 30  ;;  %v1912_v11 = vshrl.u32 %v6021_v60, %v1903_v56  ;;  %v1915_v59 = vshrl.u32 %v6022_v57, %v1903_v56 }
 0x22f   :  { %2762 = vperm.xlu0 %3549, %v2728_v10   ;;  %vm5195_vm10 = vcmp.le.f32.partialorder %v1682_v3, 0.7853982  ;;  %v1917_v6 = vshll.u32 %v6022_v57, %v1902_v45  ;;  %v1918_v43 = vshrl.u32 %v6025_v32, %v1903_v56  ;;  %v5201_v39 = vshll.u32 %v1896_v21, 8  ;;  %v937_v3 = vld [vmem:[%s5923_s3 + $0x40] sm:$0xff] }
 0x230   :  { %v1766_v14 = vxor.u32 2147483648, %v1765_v40  ;;  %v1769_v41 = vsel %vm1684_vm4, %v1768_v51, %v5119_v33  ;;  %v1642_v1 = vshll.u32 %v5189_v54, 30  ;;  %vm1920_vm11 = vcmp.lt.s32.totalorder %v1901_v22, 1 }
 0x231   :  { %v1907_v7 = vor.u32 %v1906_v26, %v1905_v13  ;;  %v1910_v38 = vor.u32 %v1909_v9, %v1908_v28  ;;  %v1913_v35 = vor.u32 %v1912_v11, %v1911_v24  ;;  %v1916_v37 = vor.u32 %v1915_v59, %v1914_v55 }
 0x232   :  { %v1767_v17 = vsel %vm1684_vm4, %v1766_v14, %v1765_v40  ;;  %v5212_v52 = vsub.s32 %v1639_v23, %v1642_v1  ;;  %v1904_v12 = vshrl.u32 %v6023_v53, %v1903_v56  ;;  %vm1923_vm12 = vcmp.lt.s32.totalorder %v1901_v22, 4  ;;  %v940_v23 = vld [vmem:[%s5923_s3 + $0x58] sm:$0xff] }
 0x233   :  { %v1770_v33 = vsel %vm5195_vm10, %v4860_v44, %v1767_v17  ;;  %v1919_v29 = vor.u32 %v1918_v43, %v1917_v6  ;;  %v1925_v5 = vsel %vm1923_vm12, %v1913_v35, 2102212464  ;;  %v5219_v15 = vmul.f32 0.31415927, %v937_v3 }
 0x234   :  { %v1771_v46 = vsel %vm5195_vm10, 0, %v1769_v41  ;;  %3671 = vcosq.f32 %v1770_v33  ;;  %v1645_v4 = vsub.s32 0, %v5212_v52  ;;  %vm1922_vm13 = vcmp.lt.s32.totalorder %v1901_v22, 3 }
 0x235   :  { %3673 = vsinq.f32 %v1770_v33  ;;  %vm1921_vm14 = vcmp.lt.s32.totalorder %v1901_v22, 2  ;;  %v1928_v58 = vsel %vm1920_vm11, %v1907_v7, %v1910_v38  ;;  %v1929_v19 = vsel %vm1923_vm12, %v1916_v37, 920167782 }
 0x236   :  { %v3218_v42 = vmin.u32 %v1645_v4, %v5212_v52  ;;  %v1924_v50 = vsel %vm1920_vm11, %v1904_v12, %v1907_v7  ;;  %v1926_v30 = vsel %vm1922_vm13, %v1910_v38, %v1925_v5  ;;  %v1775_v18 = vand.u32 3, %v1771_v46 }
 0x237   :  { %v1930_v36 = vsel %vm1922_vm13, %v1913_v35, %v1929_v19  ;;  %v1932_v16 = vsel %vm1920_vm11, %v1910_v38, %v1913_v35  ;;  %v1933_v21 = vsel %vm1923_vm12, %v1919_v29, 1326507024  ;;  %v1788_v51 = vand.u32 2139095040, %v5219_v15 }
 0x238   :  { %v1647_v45 = vclz %v3218_v42  ;;  %v1931_v8 = vsel %vm1921_vm14, %v1928_v58, %v1930_v36  ;;  %v1934_v31 = vsel %vm1922_vm13, %v1916_v37, %v1933_v21  ;;  %vm1774_vm15 = vweird.f32 %v4860_v44 }
 0x239   :  { %v1927_v27 = vsel %vm1921_vm14, %v1924_v50, %v1926_v30  ;;  %v1935_v56 = vsel %vm1921_vm14, %v1932_v16, %v1934_v31  ;;  %v5239_v13 = vmul.u32.u64.low %v5201_v39, %v1931_v8  ;;  %v5240_v0 = vmul.u32.u64.high %v5201_v39, %v1931_v8, %v5239_v13 }
 0x23a   :  { %v3219_v2 = vadd.s32 4294967294, %v1647_v45  ;;  %v5244_v28 = vmul.u32.u64.low %v5201_v39, %v1935_v56  ;;  %v5245_v24 = vmul.u32.u64.high %v5201_v39, %v1935_v56, %v5244_v28  ;;  %v1789_v10 = vshrl.u32 %v1788_v51, 23 }
 0x23b   :  { %vm1776_vm1 = vcmp.lt.s32.totalorder %v1775_v18, 2  ;;  %vm1581_vm2 = vcmp.lt.s32.totalorder %v5017_v47, 0  ;;  %v1665_v26 = vsub.s32 4, %v5189_v54  ;;  %v5249_v9 = vmul.f32 0.31415927, %v940_v23 }
 0x23c   :  { %vm1777_vm6 = vcmp.eq.s32.totalorder %v1775_v18, 0  ;;  %v1635_v22 = vadd.s32 %v5162_v62, %v5159_v61  ;;  %vm3220_vm5 = vcmp.lt.s32.totalorder %v3219_v2, 0  ;;  %v3225_v55 = vadd.s32 4294967169, %v1789_v10 }
 0x23d   :  { %v1650_v40 = vsel %vm3220_vm5, 0, %v3219_v2  ;;  %v1943_v11 = vmul.u32 %v5201_v39, %v1927_v27  ;;  %v1946_v59 = vadd.s32 1, %v5240_v0  ;;  %v1785_v34 = vand.u32 2147483647, %v5219_v15 }
 0x23e   :  { %v3672_v6 = vpop.eup %3671  ;;  %vm1780_vm7 = vcmp.eq.s32.totalorder %v1775_v18, 2  ;;  %v1651_v43 = vsub.s32 32, %v1650_v40  ;;  %v1652_v14 = vshll.u32 %v5212_v52, %v1650_v40  ;;  %v1655_v41 = vsub.s32 4294967266, %v1650_v40 }
 0x23f   :  { %v3674_v1 = vpop.eup %3673  ;;  %v1781_v3 = vxor.u32 2147483648, %v3672_v6  ;;  %v1666_v61 = vsel %vm1581_vm2, %v1665_v26, %v5189_v54  ;;  %vm1945_vm3 = vc.u32 %v5245_v24, %v5239_v13  ;;  %v1795_v62 = vadd.s32 1, %v3225_v55 }
 0x240   :  { %v1778_v39 = vxor.u32 2147483648, %v3674_v1  ;;  %v1653_v7 = vshrl.u32 %v1635_v22, %v1651_v43  ;;  %v1656_v38 = vadd.s32 127, %v1655_v41  ;;  %v1947_v35 = vsel %vm1945_vm3, %v1946_v59, %v5240_v0 }
 0x241   :  { %v1782_v37 = vsel %vm1780_vm7, %v1781_v3, %v3674_v1  ;;  %v1948_v17 = vadd.s32 %v1947_v35, %v1943_v11  ;;  %v1792_v52 = vand.u32 8388607, %v1785_v34  ;;  %vm1796_vm8 = vcmp.gt.s32.totalorder %v1795_v62, 0 }
 0x242   :  { %v1779_v12 = vsel %vm1777_vm6, %v3672_v6, %v1778_v39  ;;  %v1654_v33 = vor.u32 %v1653_v7, %v1652_v14  ;;  %v1657_v29 = vshll.u32 %v1656_v38, 23  ;;  %v1797_v54 = vsel %vm1796_vm8, %v1795_v62, 0 }
 0x243   :  { %v1783_v5 = vsel %vm1776_vm1, %v1779_v12, %v1782_v37  ;;  %vm5269_vm9 = vcmp.le.f32.partialorder %v1579_v25, 0.7853982  ;;  %v1949_v4 = vadd.s32 536870912, %v1948_v17  ;;  %v1799_v58 = vand.u32 31, %v1797_v54 }
 0x244   :  { %v1784_v19 = vsel %vm1774_vm15, nan, %v1783_v5  ;;  %v1658_v42 = vor.u32 4788187, %v1657_v29  ;;  %v1661_v50 = vcvt.s32.f32 %v1654_v33  ;;  %v1668_v30 = vsel %vm5269_vm9, 0, %v1666_v61 }
 0x245   :  { %v2616_v36 = vadd.f32 1.0, %v1784_v19  ;;  %v5277_v16 = vshrl.u32 %v1949_v4, 30  ;;  %v1793_v18 = vor.u32 8388608, %v1792_v52  ;;  %v1800_v21 = vsub.s32 32, %v1799_v58 }
 0x246   :  { %v1659_v45 = vand.u32 2147483647, %v1658_v42  ;;  %v5279_v25 = vshrl.u32 %v1797_v54, 5  ;;  %v1802_v8 = vshll.u32 %v6023_v53, %v1799_v58  ;;  %v2097_v31 = vand.u32 2139095040, %v5249_v9 }
 0x247   :  { %v2632_v51 = vmul.f32 0.5, %v2616_v36  ;;  %v1951_v44 = vshll.u32 %v5277_v16, 30  ;;  %v1805_v23 = vshll.u32 %v6014_v20, %v1799_v58  ;;  %v1808_v27 = vshll.u32 %v6016_v48, %v1799_v58 }
 0x248   :  { %v1662_v56 = vmul.f32 %v1661_v50, %v1659_v45  ;;  %v1803_v0 = vshrl.u32 %v6014_v20, %v1800_v21  ;;  %v1806_v2 = vshrl.u32 %v6016_v48, %v1800_v21  ;;  %v1811_v28 = vshll.u32 %v6021_v60, %v1799_v58 }
 0x249   :  { %v2731_v10 = vmul.f32 0.0, %v2632_v51  ;;  %v5289_v26 = vsub.s32 %v1948_v17, %v1951_v44  ;;  %v1809_v22 = vshrl.u32 %v6021_v60, %v1800_v21  ;;  %v1812_v55 = vshrl.u32 %v6022_v57, %v1800_v21 }
 0x24a   :  { %v1663_v40 = vxor.u32 2147483648, %v1662_v56  ;;  %v5293_v11 = vand.u32 3, %v1668_v30  ;;  %v5295_v59 = vshll.u32 %v1793_v18, 8  ;;  %v1804_v43 = vor.u32 %v1803_v0, %v1802_v8 }
 0x24b   :  { %2777 = vperm.xlu1 %3550, %v2731_v10   ;;  %v1954_v6 = vsub.s32 0, %v5289_v26  ;;  %v1807_v14 = vor.u32 %v1806_v2, %v1805_v23  ;;  %v2098_v41 = vshrl.u32 %v2097_v31, 23  ;;  %v1813_v3 = vor.u32 %v1812_v55, %v1811_v28 }
 0x24c   :  { %v1664_v1 = vsel %vm1581_vm2, %v1663_v40, %v1662_v56  ;;  %v1814_v61 = vshll.u32 %v6022_v57, %v1799_v58  ;;  %v1815_v62 = vshrl.u32 %v6025_v32, %v1800_v21  ;;  %v1810_v38 = vor.u32 %v1809_v22, %v1808_v27 }
 0x24d   :  { %v1667_v39 = vsel %vm5269_vm9, %v5017_v47, %v1664_v1  ;;  %v3230_v7 = vmin.u32 %v1954_v6, %v5289_v26  ;;  %vm1817_vm4 = vcmp.lt.s32.totalorder %v5279_v25, 1  ;;  %v1801_v35 = vshrl.u32 %v6023_v53, %v1800_v21 }
 0x24e   :  { %3675 = vcosq.f32 %v1667_v39  ;;  %v1816_v37 = vor.u32 %v1815_v62, %v1814_v61  ;;  %vm1818_vm10 = vcmp.lt.s32.totalorder %v5279_v25, 2  ;;  %vm1819_vm11 = vcmp.lt.s32.totalorder %v5279_v25, 3 }
 0x24f   :  { %3677 = vsinq.f32 %v1667_v39  ;;  %v1956_v17 = vclz %v3230_v7  ;;  %vm1820_vm12 = vcmp.lt.s32.totalorder %v5279_v25, 4  ;;  %v1825_v12 = vsel %vm1817_vm4, %v1804_v43, %v1807_v14 }
 0x250   :  { %v1822_v52 = vsel %vm1820_vm12, %v1810_v38, 2102212464  ;;  %v1826_v33 = vsel %vm1820_vm12, %v1813_v3, 920167782  ;;  %v3237_v29 = vadd.s32 4294967169, %v2098_v41  ;;  %v1944_v54 = vadd.s32 %v5239_v13, %v5245_v24 }
 0x251   :  { %v3231_v5 = vadd.s32 4294967294, %v1956_v17  ;;  %v1827_v46 = vsel %vm1819_vm11, %v1810_v38, %v1826_v33  ;;  %v1829_v4 = vsel %vm1817_vm4, %v1807_v14, %v1810_v38  ;;  %v1821_v58 = vsel %vm1817_vm4, %v1801_v35, %v1804_v43 }
 0x252   :  { %v1823_v19 = vsel %vm1819_vm11, %v1807_v14, %v1822_v52  ;;  %v1828_v42 = vsel %vm1818_vm10, %v1825_v12, %v1827_v46  ;;  %v1830_v50 = vsel %vm1820_vm12, %v1816_v37, 1326507024  ;;  %vm1671_vm13 = vweird.f32 %v5017_v47 }
 0x253   :  { %vm1890_vm14 = vcmp.lt.s32.totalorder %v5109_v49, 0  ;;  %vm3232_vm15 = vcmp.lt.s32.totalorder %v3231_v5, 0  ;;  %v1831_v13 = vsel %vm1819_vm11, %v1813_v3, %v1830_v50  ;;  %v2094_v21 = vand.u32 2147483647, %v5249_v9 }
 0x254   :  { %v5330_v24 = vmul.u32.u64.low %v5295_v59, %v1828_v42  ;;  %v5331_v30 = vmul.u32.u64.high %v5295_v59, %v1828_v42, %v5330_v24  ;;  %v1959_v36 = vsel %vm3232_vm15, 0, %v3231_v5  ;;  %v1832_v18 = vsel %vm1818_vm10, %v1829_v4, %v1831_v13  ;;  %v939_v5 = vld [vmem:[%s5923_s3 + $0x50] sm:$0xff] }
 0x255   :  { %v2104_v45 = vadd.s32 1, %v3237_v29  ;;  %v1960_v8 = vsub.s32 32, %v1959_v36  ;;  %v1961_v31 = vshll.u32 %v5289_v26, %v1959_v36  ;;  %v1964_v51 = vsub.s32 4294967266, %v1959_v36 }
 0x256   :  { %v1824_v44 = vsel %vm1818_vm10, %v1821_v58, %v1823_v19  ;;  %vm1677_vm1 = vcmp.eq.s32.totalorder %v5293_v11, 2  ;;  %v5342_v23 = vmul.u32.u64.low %v5295_v59, %v1832_v18  ;;  %v5343_v27 = vmul.u32.u64.high %v5295_v59, %v1832_v18, %v5342_v23 }
 0x257   :  { %vm2105_vm2 = vcmp.gt.s32.totalorder %v2104_v45, 0  ;;  %v1962_v56 = vshrl.u32 %v1944_v54, %v1960_v8  ;;  %v1965_v0 = vadd.s32 127, %v1964_v51  ;;  %v1843_v2 = vadd.s32 1, %v5331_v30 }
 0x258   :  { %v2106_v28 = vsel %vm2105_vm2, %v2104_v45, 0  ;;  %v3676_v10 = vpop.eup %3675  ;;  %v1974_v22 = vsub.s32 4, %v5277_v16  ;;  %v1840_v26 = vmul.u32 %v5295_v59, %v1824_v44  ;;  %v2101_v25 = vand.u32 8388607, %v2094_v21 }
 0x259   :  { %v2108_v55 = vand.u32 31, %v2106_v28  ;;  %v3678_v40 = vpop.eup %3677  ;;  %vm1674_vm6 = vcmp.eq.s32.totalorder %v5293_v11, 0  ;;  %v1678_v6 = vxor.u32 2147483648, %v3676_v10  ;;  %vm5353_vm5 = vcmp.le.f32.partialorder %v1888_v63, 0.7853982 }
 0x25a   :  { %v1963_v14 = vor.u32 %v1962_v56, %v1961_v31  ;;  %v1966_v41 = vshll.u32 %v1965_v0, 23  ;;  %vm1673_vm7 = vcmp.lt.s32.totalorder %v5293_v11, 2  ;;  %v1675_v1 = vxor.u32 2147483648, %v3678_v40 }
 0x25b   :  { %vm1842_vm3 = vc.u32 %v5343_v27, %v5330_v24  ;;  %v2109_v59 = vsub.s32 32, %v2108_v55  ;;  %v1679_v3 = vsel %vm1677_vm1, %v1678_v6, %v3678_v40  ;;  %v1975_v7 = vsel %vm1890_vm14, %v1974_v22, %v5277_v16 }
 0x25c   :  { %v1967_v61 = vor.u32 4788187, %v1966_v41  ;;  %v1970_v62 = vcvt.s32.f32 %v1963_v14  ;;  %v1844_v39 = vsel %vm1842_vm3, %v1843_v2, %v5331_v30  ;;  %v1676_v63 = vsel %vm1674_vm6, %v3676_v10, %v1675_v1 }
 0x25d   :  { %v1845_v38 = vadd.s32 %v1844_v39, %v1840_v26  ;;  %v2102_v35 = vor.u32 8388608, %v2101_v25  ;;  %v1680_v37 = vsel %vm1673_vm7, %v1676_v63, %v1679_v3  ;;  %v2107_v52 = vshrl.u32 %v2106_v28, 5 }
 0x25e   :  { %v1968_v17 = vand.u32 2147483647, %v1967_v61  ;;  %v2111_v12 = vshll.u32 %v6023_v53, %v2108_v55  ;;  %v1681_v11 = vsel %vm1671_vm13, nan, %v1680_v37  ;;  %v2112_v29 = vshrl.u32 %v6014_v20, %v2109_v59 }
 0x25f   :  { %v1846_v33 = vadd.s32 536870912, %v1845_v38  ;;  %v2114_v54 = vshll.u32 %v6014_v20, %v2108_v55  ;;  %v2615_v16 = vadd.f32 1.0, %v1681_v11  ;;  %v2115_v4 = vshrl.u32 %v6016_v48, %v2109_v59 }
 0x260   :  { %v1971_v46 = vmul.f32 %v1970_v62, %v1968_v17  ;;  %v2117_v58 = vshll.u32 %v6016_v48, %v2108_v55  ;;  %v2118_v47 = vshrl.u32 %v6021_v60, %v2109_v59  ;;  %v2120_v42 = vshll.u32 %v6021_v60, %v2108_v55 }
 0x261   :  { %v5376_v19 = vshrl.u32 %v1846_v33, 30  ;;  %v2121_v50 = vshrl.u32 %v6022_v57, %v2109_v59  ;;  %v2631_v13 = vmul.f32 0.5, %v2615_v16  ;;  %v2123_v36 = vshll.u32 %v6022_v57, %v2108_v55 }
 0x262   :  { %v1972_v30 = vxor.u32 2147483648, %v1971_v46  ;;  %v5382_v18 = vmul.f32 0.31415927, %v939_v5  ;;  %v2110_v8 = vshrl.u32 %v6023_v53, %v2109_v59  ;;  %v2113_v31 = vor.u32 %v2112_v29, %v2111_v12 }
 0x263   :  { %v1848_v45 = vshll.u32 %v5376_v19, 30  ;;  %v2124_v51 = vshrl.u32 %v6025_v32, %v2109_v59  ;;  %v2730_v44 = vmul.f32 0.0, %v2631_v13  ;;  %v2116_v56 = vor.u32 %v2115_v4, %v2114_v54 }
 0x264   :  { %v1973_v23 = vsel %vm1890_vm14, %v1972_v30, %v1971_v46  ;;  %v2122_v0 = vor.u32 %v2121_v50, %v2120_v42  ;;  %v2119_v10 = vor.u32 %v2118_v47, %v2117_v58  ;;  %vm2126_vm8 = vcmp.lt.s32.totalorder %v2107_v52, 1 }
 0x265   :  { %v1976_v2 = vsel %vm5353_vm5, %v5109_v49, %v1973_v23  ;;  %v5392_v28 = vsub.s32 %v1845_v38, %v1848_v45  ;;  %2772 = vperm.xlu0 %3549, %v2730_v44   ;;  %v1977_v22 = vsel %vm5353_vm5, 0, %v1975_v7  ;;  %v2125_v26 = vor.u32 %v2124_v51, %v2123_v36 }
 0x266   :  { %3679 = vcosq.f32 %v1976_v2  ;;  %vm2129_vm9 = vcmp.lt.s32.totalorder %v2107_v52, 4  ;;  %vm2128_vm4 = vcmp.lt.s32.totalorder %v2107_v52, 3  ;;  %v2142_v55 = vshll.u32 %v2102_v35, 8 }
 0x267   :  { %3681 = vsinq.f32 %v1976_v2  ;;  %v1851_v25 = vsub.s32 0, %v5392_v28  ;;  %vm2127_vm10 = vcmp.lt.s32.totalorder %v2107_v52, 2  ;;  %v2131_v40 = vsel %vm2129_vm9, %v2119_v10, 2102212464 }
 0x268   :  { %v2134_v6 = vsel %vm2126_vm8, %v2113_v31, %v2116_v56  ;;  %v2135_v14 = vsel %vm2129_vm9, %v2122_v0, 920167782  ;;  %v2130_v43 = vsel %vm2126_vm8, %v2110_v8, %v2113_v31  ;;  %v2138_v1 = vsel %vm2126_vm8, %v2116_v56, %v2119_v10 }
 0x269   :  { %v3226_v41 = vmin.u32 %v1851_v25, %v5392_v28  ;;  %v1994_v59 = vand.u32 2139095040, %v5382_v18  ;;  %v1981_v3 = vand.u32 3, %v1977_v22  ;;  %v2132_v61 = vsel %vm2128_vm4, %v2116_v56, %v2131_v40 }
 0x26a   :  { %v2136_v62 = vsel %vm2128_vm4, %v2119_v10, %v2135_v14  ;;  %v2139_v39 = vsel %vm2129_vm9, %v2125_v26, 1326507024  ;;  %v2133_v35 = vsel %vm2127_vm10, %v2130_v43, %v2132_v61  ;;  %vm1980_vm11 = vweird.f32 %v5109_v49 }
 0x26b   :  { %v1853_v63 = vclz %v3226_v41  ;;  %v2137_v7 = vsel %vm2127_vm10, %v2134_v6, %v2136_v62  ;;  %v2140_v38 = vsel %vm2128_vm4, %v2122_v0, %v2139_v39  ;;  %v1995_v54 = vshrl.u32 %v1994_v59, 23 }
 0x26c   :  { %v2141_v37 = vsel %vm2127_vm10, %v2138_v1, %v2140_v38  ;;  %v5411_v17 = vmul.u32.u64.low %v2142_v55, %v2137_v7  ;;  %v5412_v12 = vmul.u32.u64.high %v2142_v55, %v2137_v7, %v5411_v17  ;;  %vm1982_vm12 = vcmp.lt.s32.totalorder %v1981_v3, 2  ;;  %v942_v38 = vld [vmem:[%s5923_s3 + $0x68] sm:$0xff] }
 0x26d   :  { %v3227_v11 = vadd.s32 4294967294, %v1853_v63  ;;  %v5415_v33 = vmul.u32.u64.low %v2142_v55, %v2141_v37  ;;  %v5416_v29 = vmul.u32.u64.high %v2142_v55, %v2141_v37, %v5415_v33  ;;  %vm1983_vm13 = vcmp.eq.s32.totalorder %v1981_v3, 0 }
 0x26e   :  { %vm1787_vm14 = vcmp.lt.s32.totalorder %v5219_v15, 0  ;;  %vm1986_vm15 = vcmp.eq.s32.totalorder %v1981_v3, 2  ;;  %v1841_v52 = vadd.s32 %v5330_v24, %v5343_v27  ;;  %v3233_v5 = vadd.s32 4294967169, %v1995_v54 }
 0x26f   :  { %vm3228_vm1 = vcmp.lt.s32.totalorder %v3227_v11, 0  ;;  %v1871_v4 = vsub.s32 4, %v5376_v19  ;;  %v2149_v58 = vmul.u32 %v2142_v55, %v2133_v35  ;;  %v2152_v47 = vadd.s32 1, %v5412_v12 }
 0x270   :  { %v3680_v16 = vpop.eup %3679  ;;  %v1856_v46 = vsel %vm3228_vm1, 0, %v3227_v11  ;;  %vm2151_vm2 = vc.u32 %v5416_v29, %v5411_v17  ;;  %v1991_v24 = vand.u32 2147483647, %v5382_v18  ;;  %v2001_v27 = vadd.s32 1, %v3233_v5 }
 0x271   :  { %v3682_v42 = vpop.eup %3681  ;;  %v1987_v50 = vxor.u32 2147483648, %v3680_v16  ;;  %v1857_v13 = vsub.s32 32, %v1856_v46  ;;  %v1858_v30 = vshll.u32 %v5392_v28, %v1856_v46  ;;  %v1861_v36 = vsub.s32 4294967266, %v1856_v46 }
 0x272   :  { %v1984_v45 = vxor.u32 2147483648, %v3682_v42  ;;  %v2153_v44 = vsel %vm2151_vm2, %v2152_v47, %v5412_v12  ;;  %v1872_v56 = vsel %vm1787_vm14, %v1871_v4, %v5376_v19  ;;  %vm2002_vm6 = vcmp.gt.s32.totalorder %v2001_v27, 0 }
 0x273   :  { %v1988_v8 = vsel %vm1986_vm15, %v1987_v50, %v3682_v42  ;;  %v1859_v31 = vshrl.u32 %v1841_v52, %v1857_v13  ;;  %v1862_v51 = vadd.s32 127, %v1861_v36  ;;  %v2154_v0 = vadd.s32 %v2153_v44, %v2149_v58 }
 0x274   :  { %v1985_v23 = vsel %vm1983_vm13, %v3680_v16, %v1984_v45  ;;  %v2003_v22 = vsel %vm2002_vm6, %v2001_v27, 0  ;;  %vm5439_vm5 = vcmp.le.f32.partialorder %v1785_v34, 0.7853982  ;;  %v1998_v49 = vand.u32 8388607, %v1991_v24 }
 0x275   :  { %v1989_v2 = vsel %vm1982_vm12, %v1985_v23, %v1988_v8  ;;  %v1860_v28 = vor.u32 %v1859_v31, %v1858_v30  ;;  %v1863_v10 = vshll.u32 %v1862_v51, 23  ;;  %v2155_v25 = vadd.s32 536870912, %v2154_v0 }
 0x276   :  { %v1990_v26 = vsel %vm1980_vm11, nan, %v1989_v2  ;;  %v2005_v55 = vand.u32 31, %v2003_v22  ;;  %v1874_v41 = vsel %vm5439_vm5, 0, %v1872_v56  ;;  %v1999_v54 = vor.u32 8388608, %v1998_v49 }
 0x277   :  { %v2618_v40 = vadd.f32 1.0, %v1990_v26  ;;  %v1864_v19 = vor.u32 4788187, %v1863_v10  ;;  %v1867_v14 = vcvt.s32.f32 %v1860_v28  ;;  %v5445_v43 = vshrl.u32 %v2155_v25, 30 }
 0x278   :  { %v2006_v1 = vsub.s32 32, %v2005_v55  ;;  %v2008_v61 = vshll.u32 %v6023_v53, %v2005_v55  ;;  %v2011_v34 = vshll.u32 %v6014_v20, %v2005_v55  ;;  %v2014_v63 = vshll.u32 %v6016_v48, %v2005_v55 }
 0x279   :  { %v2634_v59 = vmul.f32 0.5, %v2618_v40  ;;  %v1865_v3 = vand.u32 2147483647, %v1864_v19  ;;  %v2157_v62 = vshll.u32 %v5445_v43, 30  ;;  %v2017_v7 = vshll.u32 %v6021_v60, %v2005_v55 }
 0x27a   :  { %v2009_v39 = vshrl.u32 %v6014_v20, %v2006_v1  ;;  %v2012_v12 = vshrl.u32 %v6016_v48, %v2006_v1  ;;  %v2015_v11 = vshrl.u32 %v6021_v60, %v2006_v1  ;;  %v2004_v52 = vshrl.u32 %v2003_v22, 5 }
 0x27b   :  { %v2733_v35 = vmul.f32 0.0, %v2634_v59  ;;  %v1868_v37 = vmul.f32 %v1867_v14, %v1865_v3  ;;  %v5460_v33 = vsub.s32 %v2154_v0, %v2157_v62  ;;  %v2018_v5 = vshrl.u32 %v6022_v57, %v2006_v1 }
 0x27c   :  { %v5463_v46 = vand.u32 3, %v1874_v41  ;;  %v2007_v4 = vshrl.u32 %v6023_v53, %v2006_v1  ;;  %v5466_v58 = vmul.f32 0.31415927, %v942_v38  ;;  %v2010_v42 = vor.u32 %v2009_v39, %v2008_v61  ;;  %v941_v39 = vld [vmem:[%s5923_s3 + $0x60] sm:$0xff] }
 0x27d   :  { %2787 = vperm.xlu1 %3550, %v2733_v35   ;;  %v1869_v16 = vxor.u32 2147483648, %v1868_v37  ;;  %v2160_v47 = vsub.s32 0, %v5460_v33  ;;  %v2013_v50 = vor.u32 %v2012_v12, %v2011_v34  ;;  %v2020_v13 = vshll.u32 %v6022_v57, %v2005_v55 }
 0x27e   :  { %v2016_v36 = vor.u32 %v2015_v11, %v2014_v63  ;;  %v2019_v45 = vor.u32 %v2018_v5, %v2017_v7  ;;  %v2021_v27 = vshrl.u32 %v6025_v32, %v2006_v1  ;;  %vm2023_vm7 = vcmp.lt.s32.totalorder %v2004_v52, 1 }
 0x27f   :  { %v1870_v30 = vsel %vm1787_vm14, %v1869_v16, %v1868_v37  ;;  %v3238_v31 = vmin.u32 %v2160_v47, %v5460_v33  ;;  %v2039_v51 = vshll.u32 %v1999_v54, 8  ;;  %vm2024_vm3 = vcmp.lt.s32.totalorder %v2004_v52, 2 }
 0x280   :  { %v1873_v8 = vsel %vm5439_vm5, %v5219_v15, %v1870_v30  ;;  %v2022_v44 = vor.u32 %v2021_v27, %v2020_v13  ;;  %vm2025_vm8 = vcmp.lt.s32.totalorder %v2004_v52, 3  ;;  %vm2026_vm9 = vcmp.lt.s32.totalorder %v2004_v52, 4 }
 0x281   :  { %3683 = vcosq.f32 %v1873_v8  ;;  %v2162_v23 = vclz %v3238_v31  ;;  %v2027_v56 = vsel %vm2023_vm7, %v2007_v4, %v2010_v42  ;;  %v2028_v0 = vsel %vm2026_vm9, %v2016_v36, 2102212464 }
 0x282   :  { %3685 = vsinq.f32 %v1873_v8  ;;  %v2031_v2 = vsel %vm2023_vm7, %v2010_v42, %v2013_v50  ;;  %v2032_v28 = vsel %vm2026_vm9, %v2019_v45, 920167782  ;;  %v2035_v10 = vsel %vm2023_vm7, %v2013_v50, %v2016_v36 }
 0x283   :  { %v3239_v22 = vadd.s32 4294967294, %v2162_v23  ;;  %v2029_v26 = vsel %vm2025_vm8, %v2013_v50, %v2028_v0  ;;  %v2033_v25 = vsel %vm2025_vm8, %v2016_v36, %v2032_v28  ;;  %v2036_v55 = vsel %vm2026_vm9, %v2022_v44, 1326507024 }
 0x284   :  { %v2150_v40 = vadd.s32 %v5411_v17, %v5416_v29  ;;  %v2030_v6 = vsel %vm2024_vm3, %v2027_v56, %v2029_v26  ;;  %v2034_v19 = vsel %vm2024_vm3, %v2031_v2, %v2033_v25  ;;  %v2037_v14 = vsel %vm2025_vm8, %v2019_v45, %v2036_v55 }
 0x285   :  { %vm1877_vm4 = vweird.f32 %v5219_v15  ;;  %vm3240_vm10 = vcmp.lt.s32.totalorder %v3239_v22, 0  ;;  %v2038_v41 = vsel %vm2024_vm3, %v2035_v10, %v2037_v14  ;;  %vm2096_vm11 = vcmp.lt.s32.totalorder %v5249_v9, 0 }
 0x286   :  { %v5486_v49 = vmul.u32.u64.low %v2039_v51, %v2034_v19  ;;  %v5487_v1 = vmul.u32.u64.high %v2039_v51, %v2034_v19, %v5486_v49  ;;  %v2165_v59 = vsel %vm3240_vm10, 0, %v3239_v22  ;;  %v2303_v62 = vand.u32 2139095040, %v5466_v58 }
 0x287   :  { %v5490_v3 = vmul.u32.u64.low %v2039_v51, %v2038_v41  ;;  %v5491_v61 = vmul.u32.u64.high %v2039_v51, %v2038_v41, %v5490_v3  ;;  %v2166_v17 = vsub.s32 32, %v2165_v59  ;;  %v2167_v29 = vshll.u32 %v5460_v33, %v2165_v59 }
 0x288   :  { %v2170_v34 = vsub.s32 4294967266, %v2165_v59  ;;  %vm1879_vm12 = vcmp.lt.s32.totalorder %v5463_v46, 2  ;;  %vm1880_vm13 = vcmp.eq.s32.totalorder %v5463_v46, 0  ;;  %v2180_v63 = vsub.s32 4, %v5445_v43 }
 0x289   :  { %v2046_v7 = vmul.u32 %v2039_v51, %v2030_v6  ;;  %v2168_v38 = vshrl.u32 %v2150_v40, %v2166_v17  ;;  %v2049_v37 = vadd.s32 1, %v5487_v1  ;;  %v2304_v12 = vshrl.u32 %v2303_v62, 23 }
 0x28a   :  { %v2171_v35 = vadd.s32 127, %v2170_v34  ;;  %vm1883_vm14 = vcmp.eq.s32.totalorder %v5463_v46, 2  ;;  %vm2048_vm15 = vc.u32 %v5491_v61, %v5486_v49  ;;  %v2300_v33 = vand.u32 2147483647, %v5466_v58 }
 0x28b   :  { %v3684_v11 = vpop.eup %3683  ;;  %v5505_v54 = vmul.f32 0.31415927, %v941_v39  ;;  %v2169_v16 = vor.u32 %v2168_v38, %v2167_v29  ;;  %v2050_v47 = vsel %vm2048_vm15, %v2049_v37, %v5487_v1  ;;  %v2181_v50 = vsel %vm2096_vm11, %v2180_v63, %v5445_v43 }
 0x28c   :  { %v3686_v52 = vpop.eup %3685  ;;  %v1884_v5 = vxor.u32 2147483648, %v3684_v11  ;;  %v2172_v4 = vshll.u32 %v2171_v35, 23  ;;  %v2051_v13 = vadd.s32 %v2050_v47, %v2046_v7  ;;  %v3245_v30 = vadd.s32 4294967169, %v2304_v12 }
 0x28d   :  { %v1881_v42 = vxor.u32 2147483648, %v3686_v52  ;;  %vm5513_vm1 = vcmp.le.f32.partialorder %v2094_v21, 0.7853982  ;;  %v2176_v8 = vcvt.s32.f32 %v2169_v16  ;;  %v2200_v23 = vand.u32 2139095040, %v5505_v54 }
 0x28e   :  { %v1885_v36 = vsel %vm1883_vm14, %v1884_v5, %v3686_v52  ;;  %v2173_v27 = vor.u32 4788187, %v2172_v4  ;;  %v2052_v51 = vadd.s32 536870912, %v2051_v13  ;;  %v2310_v44 = vadd.s32 1, %v3245_v30 }
 0x28f   :  { %v1882_v31 = vsel %vm1880_vm13, %v3684_v11, %v1881_v42  ;;  %v2183_v0 = vsel %vm5513_vm1, 0, %v2181_v50  ;;  %v2307_v28 = vand.u32 8388607, %v2300_v33  ;;  %v2201_v55 = vshrl.u32 %v2200_v23, 23 }
 0x290   :  { %v1886_v43 = vsel %vm1879_vm12, %v1882_v31, %v1885_v36  ;;  %v2174_v56 = vand.u32 2147483647, %v2173_v27  ;;  %v5526_v2 = vshrl.u32 %v2052_v51, 30  ;;  %vm2311_vm2 = vcmp.gt.s32.totalorder %v2310_v44, 0 }
 0x291   :  { %v1887_v21 = vsel %vm1877_vm4, nan, %v1886_v43  ;;  %v2312_v26 = vsel %vm2311_vm2, %v2310_v44, 0  ;;  %v5531_v19 = vand.u32 3, %v2183_v0  ;;  %v2197_v15 = vand.u32 2147483647, %v5505_v54 }
 0x292   :  { %v2617_v10 = vadd.f32 1.0, %v1887_v21  ;;  %v2177_v22 = vmul.f32 %v2176_v8, %v2174_v56  ;;  %v2054_v25 = vshll.u32 %v5526_v2, 30  ;;  %v2314_v46 = vand.u32 31, %v2312_v26 }
 0x293   :  { %v5535_v14 = vadd.s32 %v5486_v49, %v5491_v61  ;;  %v2308_v1 = vor.u32 8388608, %v2307_v28  ;;  %v2313_v49 = vshrl.u32 %v2312_v26, 5  ;;  %v3241_v61 = vadd.s32 4294967169, %v2201_v55 }
 0x294   :  { %v2633_v40 = vmul.f32 0.5, %v2617_v10  ;;  %v2178_v6 = vxor.u32 2147483648, %v2177_v22  ;;  %v5537_v41 = vsub.s32 %v2051_v13, %v2054_v25  ;;  %v2315_v59 = vsub.s32 32, %v2314_v46 }
 0x295   :  { %v2317_v29 = vshll.u32 %v6023_v53, %v2314_v46  ;;  %v2320_v34 = vshll.u32 %v6014_v20, %v2314_v46  ;;  %v2323_v38 = vshll.u32 %v6016_v48, %v2314_v46  ;;  %v5551_v37 = vshll.u32 %v2308_v1, 8 }
 0x296   :  { %v2732_v3 = vmul.f32 0.0, %v2633_v40  ;;  %v2179_v17 = vsel %vm2096_vm11, %v2178_v6, %v2177_v22  ;;  %v2057_v39 = vsub.s32 0, %v5537_v41  ;;  %v2318_v63 = vshrl.u32 %v6014_v20, %v2315_v59 }
 0x297   :  { %v2182_v62 = vsel %vm5513_vm1, %v5249_v9, %v2179_v17  ;;  %v2321_v7 = vshrl.u32 %v6016_v48, %v2315_v59  ;;  %v5555_v12 = vand.u32 8388607, %v2197_v15  ;;  %vm2192_vm6 = vcmp.eq.s32.totalorder %v5531_v19, 2 }
 0x298   :  { %2782 = vperm.xlu0 %3549, %v2732_v3   ;;  %3687 = vcosq.f32 %v2182_v62  ;;  %v3234_v35 = vmin.u32 %v2057_v39, %v5537_v41  ;;  %v2316_v11 = vshrl.u32 %v6023_v53, %v2315_v59  ;;  %v2319_v52 = vor.u32 %v2318_v63, %v2317_v29 }
 0x299   :  { %3689 = vsinq.f32 %v2182_v62  ;;  %v2322_v5 = vor.u32 %v2321_v7, %v2320_v34  ;;  %v2324_v16 = vshrl.u32 %v6021_v60, %v2315_v59  ;;  %vm2189_vm5 = vcmp.eq.s32.totalorder %v5531_v19, 0 }
 0x29a   :  { %v2059_v4 = vclz %v3234_v35  ;;  %v2326_v47 = vshll.u32 %v6021_v60, %v2314_v46  ;;  %v2327_v42 = vshrl.u32 %v6022_v57, %v2315_v59  ;;  %v2329_v50 = vshll.u32 %v6022_v57, %v2314_v46 }
 0x29b   :  { %vm2188_vm7 = vcmp.lt.s32.totalorder %v5531_v19, 2  ;;  %v2325_v13 = vor.u32 %v2324_v16, %v2323_v38  ;;  %v2330_v30 = vshrl.u32 %v6025_v32, %v2315_v59  ;;  %vm2332_vm3 = vcmp.lt.s32.totalorder %v2313_v49, 1 }
 0x29c   :  { %v2207_v36 = vadd.s32 1, %v3241_v61  ;;  %vm2186_vm8 = vweird.f32 %v5249_v9  ;;  %v3235_v45 = vadd.s32 4294967294, %v2059_v4  ;;  %v2328_v27 = vor.u32 %v2327_v42, %v2326_v47 }
 0x29d   :  { %vm2334_vm9 = vcmp.lt.s32.totalorder %v2313_v49, 3  ;;  %vm2335_vm4 = vcmp.lt.s32.totalorder %v2313_v49, 4  ;;  %v2331_v8 = vor.u32 %v2330_v30, %v2329_v50  ;;  %vm2333_vm10 = vcmp.lt.s32.totalorder %v2313_v49, 2 }
 0x29e   :  { %v2337_v31 = vsel %vm2335_vm4, %v2325_v13, 2102212464  ;;  %v2340_v51 = vsel %vm2332_vm3, %v2319_v52, %v2322_v5  ;;  %vm3236_vm11 = vcmp.lt.s32.totalorder %v3235_v45, 0  ;;  %v2336_v44 = vsel %vm2332_vm3, %v2316_v11, %v2319_v52 }
 0x29f   :  { %v2338_v23 = vsel %vm2334_vm9, %v2322_v5, %v2337_v31  ;;  %v2341_v43 = vsel %vm2335_vm4, %v2328_v27, 920167782  ;;  %v2062_v56 = vsel %vm3236_vm11, 0, %v3235_v45  ;;  %v2344_v21 = vsel %vm2332_vm3, %v2322_v5, %v2325_v13  ;;  %v943_v5 = vld [vmem:[%s5923_s3 + $0x70] sm:$0xff] }
 0x2a0   :  { %v2342_v0 = vsel %vm2334_vm9, %v2325_v13, %v2341_v43  ;;  %v2345_v28 = vsel %vm2335_vm4, %v2331_v8, 1326507024  ;;  %v2063_v10 = vsub.s32 32, %v2062_v56  ;;  %v2064_v22 = vshll.u32 %v5537_v41, %v2062_v56 }
 0x2a1   :  { %v2067_v26 = vsub.s32 4294967266, %v2062_v56  ;;  %v2343_v25 = vsel %vm2333_vm10, %v2340_v51, %v2342_v0  ;;  %v2339_v55 = vsel %vm2333_vm10, %v2336_v44, %v2338_v23  ;;  %v2346_v40 = vsel %vm2334_vm9, %v2328_v27, %v2345_v28 }
 0x2a2   :  { %v3688_v46 = vpop.eup %3687  ;;  %v5577_v6 = vmul.u32.u64.low %v5551_v37, %v2343_v25  ;;  %v5578_v1 = vmul.u32.u64.high %v5551_v37, %v2343_v25, %v5577_v6  ;;  %v2065_v17 = vshrl.u32 %v5535_v14, %v2063_v10  ;;  %v2347_v41 = vsel %vm2333_vm10, %v2344_v21, %v2346_v40 }
 0x2a3   :  { %v3690_v59 = vpop.eup %3689  ;;  %v2193_v3 = vxor.u32 2147483648, %v3688_v46  ;;  %v2068_v29 = vadd.s32 127, %v2067_v26  ;;  %vm1993_vm12 = vcmp.lt.s32.totalorder %v5382_v18, 0  ;;  %vm2208_vm13 = vcmp.gt.s32.totalorder %v2207_v36, 0 }
 0x2a4   :  { %v2190_v34 = vxor.u32 2147483648, %v3690_v59  ;;  %v5585_v62 = vmul.u32.u64.low %v5551_v37, %v2347_v41  ;;  %v5586_v39 = vmul.u32.u64.high %v5551_v37, %v2347_v41, %v5585_v62  ;;  %v2066_v63 = vor.u32 %v2065_v17, %v2064_v22 }
 0x2a5   :  { %v2194_v61 = vsel %vm2192_vm6, %v2193_v3, %v3690_v59  ;;  %v2069_v7 = vshll.u32 %v2068_v29, 23  ;;  %v2209_v38 = vsel %vm2208_vm13, %v2207_v36, 0  ;;  %v2355_v49 = vmul.u32 %v5551_v37, %v2339_v55  ;;  %v209_v59 = vpop.f32.mrb[0].mxu0 }
 0x2a6   :  { %v2191_v14 = vsel %vm2189_vm5, %v3688_v46, %v2190_v34  ;;  %v2358_v35 = vadd.s32 1, %v5578_v1  ;;  %v2211_v11 = vand.u32 31, %v2209_v38  ;;  %vm5598_vm14 = vcmp.le.f32.partialorder %v1991_v24, 0.7853982  ;;  %215 = vst [vmem:[#allocation2] sm:$0xff] %v209_v59  ;;  %v3353_v29 = vpop.f32.mrb[1].mxu0 }
 0x2a7   :  { %v2195_v52 = vsel %vm2188_vm7, %v2191_v14, %v2194_v61  ;;  %v2070_v16 = vor.u32 4788187, %v2069_v7  ;;  %v2073_v4 = vcvt.s32.f32 %v2066_v63  ;;  %vm2357_vm15 = vc.u32 %v5586_v39, %v5577_v6  ;;  %v944_v34 = vld [vmem:[%s5923_s3 + $0x78] sm:$0xff]  ;;  %v212_v62 = vpop.f32.mrb[2].mxu0 }
 0x2a8   :  { %v2196_v47 = vsel %vm2186_vm8, nan, %v2195_v52  ;;  %v2205_v37 = vor.u32 8388608, %v5555_v12  ;;  %v2212_v42 = vsub.s32 32, %v2211_v11  ;;  %v2077_v13 = vsub.s32 4, %v5526_v2  ;;  %v3354_v7 = vpop.f32.mrb[3].mxu0 }
 0x2a9   :  { %v2620_v50 = vadd.f32 1.0, %v2196_v47  ;;  %v2071_v19 = vand.u32 2147483647, %v2070_v16  ;;  %v2359_v24 = vsel %vm2357_vm15, %v2358_v35, %v5578_v1  ;;  %v5609_v36 = vshrl.u32 %v2209_v38, 5 }
 0x2aa   :  { %v2360_v30 = vadd.s32 %v2359_v24, %v2355_v49  ;;  %v2214_v45 = vshll.u32 %v6023_v53, %v2211_v11  ;;  %v2215_v9 = vshrl.u32 %v6014_v20, %v2212_v42  ;;  %v2217_v31 = vshll.u32 %v6014_v20, %v2211_v11 }
 0x2ab   :  { %v2636_v27 = vmul.f32 0.5, %v2620_v50  ;;  %v2074_v8 = vmul.f32 %v2073_v4, %v2071_v19  ;;  %v2218_v12 = vshrl.u32 %v6016_v48, %v2212_v42  ;;  %v2220_v44 = vshll.u32 %v6016_v48, %v2211_v11 }
 0x2ac   :  { %v2361_v51 = vadd.s32 536870912, %v2360_v30  ;;  %v2221_v23 = vshrl.u32 %v6021_v60, %v2212_v42  ;;  %v2223_v43 = vshll.u32 %v6021_v60, %v2211_v11  ;;  %v2224_v21 = vshrl.u32 %v6022_v57, %v2212_v42 }
 0x2ad   :  { %v2735_v56 = vmul.f32 0.0, %v2636_v27  ;;  %v2075_v0 = vxor.u32 2147483648, %v2074_v8  ;;  %v5619_v28 = vshll.u32 %v2205_v37, 8  ;;  %v2078_v10 = vsel %vm1993_vm12, %v2077_v13, %v5526_v2 }
 0x2ae   :  { %v5624_v22 = vshrl.u32 %v2361_v51, 30  ;;  %v2226_v26 = vshll.u32 %v6022_v57, %v2211_v11  ;;  %v2227_v25 = vshrl.u32 %v6025_v32, %v2212_v42  ;;  %v2216_v55 = vor.u32 %v2215_v9, %v2214_v45 }
 0x2af   :  { %2797 = vperm.xlu1 %3550, %v2735_v56   ;;  %v2076_v46 = vsel %vm1993_vm12, %v2075_v0, %v2074_v8  ;;  %v2219_v40 = vor.u32 %v2218_v12, %v2217_v31  ;;  %v2225_v1 = vor.u32 %v2224_v21, %v2223_v43  ;;  %v2222_v17 = vor.u32 %v2221_v23, %v2220_v44 }
 0x2b0   :  { %v2079_v3 = vsel %vm5598_vm14, %v5382_v18, %v2076_v46  ;;  %v2363_v2 = vshll.u32 %v5624_v22, 30  ;;  %vm2229_vm1 = vcmp.lt.s32.totalorder %v5609_v36, 1  ;;  %v2228_v41 = vor.u32 %v2227_v25, %v2226_v26 }
 0x2b1   :  { %3691 = vcosq.f32 %v2079_v3  ;;  %vm2231_vm2 = vcmp.lt.s32.totalorder %v5609_v36, 3  ;;  %vm2232_vm6 = vcmp.lt.s32.totalorder %v5609_v36, 4  ;;  %v2213_v63 = vshrl.u32 %v6023_v53, %v2212_v42 }
 0x2b2   :  { %3693 = vsinq.f32 %v2079_v3  ;;  %v5640_v61 = vsub.s32 %v2360_v30, %v2363_v2  ;;  %vm2230_vm5 = vcmp.lt.s32.totalorder %v5609_v36, 2  ;;  %v2080_v38 = vsel %vm5598_vm14, 0, %v2078_v10 }
 0x2b3   :  { %v2234_v14 = vsel %vm2232_vm6, %v2222_v17, 2102212464  ;;  %v2237_v49 = vsel %vm2229_vm1, %v2216_v55, %v2219_v40  ;;  %v2238_v35 = vsel %vm2232_vm6, %v2225_v1, 920167782  ;;  %v5655_v16 = vmul.f32 0.31415927, %v944_v34 }
 0x2b4   :  { %v2366_v11 = vsub.s32 0, %v5640_v61  ;;  %v2239_v52 = vsel %vm2231_vm2, %v2222_v17, %v2238_v35  ;;  %v2241_v47 = vsel %vm2229_vm1, %v2219_v40, %v2222_v17  ;;  %v2242_v37 = vsel %vm2232_vm6, %v2228_v41, 1326507024 }
 0x2b5   :  { %v2240_v4 = vsel %vm2230_vm5, %v2237_v49, %v2239_v52  ;;  %vm2083_vm7 = vweird.f32 %v5382_v18  ;;  %v2084_v42 = vand.u32 3, %v2080_v38  ;;  %v2233_v19 = vsel %vm2229_vm1, %v2213_v63, %v2216_v55 }
 0x2b6   :  { %v3246_v50 = vmin.u32 %v2366_v11, %v5640_v61  ;;  %v2235_v13 = vsel %vm2231_vm2, %v2219_v40, %v2234_v14  ;;  %v2243_v24 = vsel %vm2231_vm2, %v2225_v1, %v2242_v37  ;;  %v5678_v9 = vmul.f32 0.31415927, %v943_v5 }
 0x2b7   :  { %v5675_v30 = vmul.u32.u64.low %v5619_v28, %v2240_v4  ;;  %v5676_v45 = vmul.u32.u64.high %v5619_v28, %v2240_v4, %v5675_v30  ;;  %vm5682_vm3 = vcmp.le.f32.partialorder %v2300_v33, 0.7853982  ;;  %v2244_v31 = vsel %vm2230_vm5, %v2241_v47, %v2243_v24 }
 0x2b8   :  { %v2368_v8 = vclz %v3246_v50  ;;  %v2509_v12 = vand.u32 2139095040, %v5655_v16  ;;  %v2386_v51 = vsub.s32 4, %v5624_v22  ;;  %v2236_v44 = vsel %vm2230_vm5, %v2233_v19, %v2235_v13 }
 0x2b9   :  { %v5693_v23 = vmul.u32.u64.low %v5619_v28, %v2244_v31  ;;  %v5694_v43 = vmul.u32.u64.high %v5619_v28, %v2244_v31, %v5693_v23  ;;  %vm2085_vm8 = vcmp.lt.s32.totalorder %v2084_v42, 2  ;;  %vm2302_vm9 = vcmp.lt.s32.totalorder %v5466_v58, 0 }
 0x2ba   :  { %v3247_v33 = vadd.s32 4294967294, %v2368_v8  ;;  %v2510_v56 = vshrl.u32 %v2509_v12, 23  ;;  %vm2086_vm4 = vcmp.eq.s32.totalorder %v2084_v42, 0  ;;  %vm2089_vm10 = vcmp.eq.s32.totalorder %v2084_v42, 2 }
 0x2bb   :  { %v3692_v0 = vpop.eup %3691  ;;  %v2356_v21 = vadd.s32 %v5577_v6, %v5586_v39  ;;  %v2255_v10 = vadd.s32 1, %v5676_v45  ;;  %v2252_v25 = vmul.u32 %v5619_v28, %v2236_v44  ;;  %v2387_v1 = vsel %vm2302_vm9, %v2386_v51, %v5624_v22 }
 0x2bc   :  { %v3694_v26 = vpop.eup %3693  ;;  %v2090_v36 = vxor.u32 2147483648, %v3692_v0  ;;  %vm3248_vm11 = vcmp.lt.s32.totalorder %v3247_v33, 0  ;;  %v3253_v46 = vadd.s32 4294967169, %v2510_v56  ;;  %vm2254_vm12 = vc.u32 %v5694_v43, %v5675_v30 }
 0x2bd   :  { %v2087_v55 = vxor.u32 2147483648, %v3694_v26  ;;  %v2371_v40 = vsel %vm3248_vm11, 0, %v3247_v33  ;;  %v2256_v17 = vsel %vm2254_vm12, %v2255_v10, %v5676_v45  ;;  %v2506_v28 = vand.u32 2147483647, %v5655_v16 }
 0x2be   :  { %v2091_v59 = vsel %vm2089_vm10, %v2090_v36, %v3694_v26  ;;  %v2372_v3 = vsub.s32 32, %v2371_v40  ;;  %v2373_v6 = vshll.u32 %v5640_v61, %v2371_v40  ;;  %v2376_v39 = vsub.s32 4294967266, %v2371_v40 }
 0x2bf   :  { %v2088_v2 = vsel %vm2086_vm4, %v3692_v0, %v2087_v55  ;;  %v2516_v29 = vadd.s32 1, %v3253_v46  ;;  %v2257_v63 = vadd.s32 %v2256_v17, %v2252_v25  ;;  %v2389_v7 = vsel %vm5682_vm3, 0, %v2387_v1 }
 0x2c0   :  { %v2092_v41 = vsel %vm2085_vm8, %v2088_v2, %v2091_v59  ;;  %v2374_v34 = vshrl.u32 %v2356_v21, %v2372_v3  ;;  %v2377_v62 = vadd.s32 127, %v2376_v39  ;;  %v2513_v35 = vand.u32 8388607, %v2506_v28 }
 0x2c1   :  { %v2093_v22 = vsel %vm2083_vm7, nan, %v2092_v41  ;;  %vm2517_vm13 = vcmp.gt.s32.totalorder %v2516_v29, 0  ;;  %v2258_v49 = vadd.s32 536870912, %v2257_v63  ;;  %v2406_v52 = vand.u32 2139095040, %v5678_v9 }
 0x2c2   :  { %v2619_v61 = vadd.f32 1.0, %v2093_v22  ;;  %v2375_v38 = vor.u32 %v2374_v34, %v2373_v6  ;;  %v2378_v14 = vshll.u32 %v2377_v62, 23  ;;  %v2518_v11 = vsel %vm2517_vm13, %v2516_v29, 0 }
 0x2c3   :  { %v5717_v37 = vshrl.u32 %v2258_v49, 30  ;;  %v5719_v18 = vand.u32 3, %v2389_v7  ;;  %v2520_v42 = vand.u32 31, %v2518_v11  ;;  %v2403_v24 = vand.u32 2147483647, %v5678_v9 }
 0x2c4   :  { %v2635_v5 = vmul.f32 0.5, %v2619_v61  ;;  %v2379_v4 = vor.u32 4788187, %v2378_v14  ;;  %v2382_v47 = vcvt.s32.f32 %v2375_v38  ;;  %v2253_v45 = vadd.s32 %v5675_v30, %v5694_v43 }
 0x2c5   :  { %v2260_v13 = vshll.u32 %v5717_v37, 30  ;;  %v2514_v8 = vor.u32 8388608, %v2513_v35  ;;  %v2521_v31 = vsub.s32 32, %v2520_v42  ;;  %v2407_v12 = vshrl.u32 %v2406_v52, 23 }
 0x2c6   :  { %v2734_v50 = vmul.f32 0.0, %v2635_v5  ;;  %v2380_v19 = vand.u32 2147483647, %v2379_v4  ;;  %v2523_v23 = vshll.u32 %v6023_v53, %v2520_v42  ;;  %v2526_v33 = vshll.u32 %v6014_v20, %v2520_v42 }
 0x2c7   :  { %v5724_v44 = vsub.s32 %v2257_v63, %v2260_v13  ;;  %v2524_v56 = vshrl.u32 %v6014_v20, %v2521_v31  ;;  %v2527_v0 = vshrl.u32 %v6016_v48, %v2521_v31  ;;  %v2529_v21 = vshll.u32 %v6016_v48, %v2520_v42 }
 0x2c8   :  { %2792 = vperm.xlu0 %3549, %v2734_v50   ;;  %v2383_v51 = vmul.f32 %v2382_v47, %v2380_v19  ;;  %v2532_v10 = vshll.u32 %v6021_v60, %v2520_v42  ;;  %v2519_v26 = vshrl.u32 %v2518_v11, 5  ;;  %v2530_v36 = vshrl.u32 %v6021_v60, %v2521_v31 }
 0x2c9   :  { %v2263_v43 = vsub.s32 0, %v5724_v44  ;;  %v2522_v25 = vshrl.u32 %v6023_v53, %v2521_v31  ;;  %v2533_v46 = vshrl.u32 %v6022_v57, %v2521_v31  ;;  %v5736_v55 = vshll.u32 %v2514_v8, 8 }
 0x2ca   :  { %v2384_v30 = vxor.u32 2147483648, %v2383_v51  ;;  %v3249_v40 = vadd.s32 4294967169, %v2407_v12  ;;  %v2525_v3 = vor.u32 %v2524_v56, %v2523_v23  ;;  %v2535_v6 = vshll.u32 %v6022_v57, %v2520_v42 }
 0x2cb   :  { %v3242_v59 = vmin.u32 %v2263_v43, %v5724_v44  ;;  %v2528_v2 = vor.u32 %v2527_v0, %v2526_v33  ;;  %v2531_v17 = vor.u32 %v2530_v36, %v2529_v21  ;;  %v2534_v29 = vor.u32 %v2533_v46, %v2532_v10 }
 0x2cc   :  { %v2385_v1 = vsel %vm2302_vm9, %v2384_v30, %v2383_v51  ;;  %v2536_v34 = vshrl.u32 %v6025_v32, %v2521_v31  ;;  %vm2538_vm14 = vcmp.lt.s32.totalorder %v2519_v26, 1  ;;  %vm2539_vm15 = vcmp.lt.s32.totalorder %v2519_v26, 2 }
 0x2cd   :  { %v2388_v39 = vsel %vm5682_vm3, %v5466_v58, %v2385_v1  ;;  %v2265_v41 = vclz %v3242_v59  ;;  %vm2540_vm1 = vcmp.lt.s32.totalorder %v2519_v26, 3  ;;  %vm2541_vm2 = vcmp.lt.s32.totalorder %v2519_v26, 4 }
 0x2ce   :  { %3695 = vcosq.f32 %v2388_v39  ;;  %v2537_v63 = vor.u32 %v2536_v34, %v2535_v6  ;;  %v2542_v22 = vsel %vm2538_vm14, %v2522_v25, %v2525_v3  ;;  %v2543_v7 = vsel %vm2541_vm2, %v2531_v17, 2102212464 }
 0x2cf   :  { %3697 = vsinq.f32 %v2388_v39  ;;  %v3243_v62 = vadd.s32 4294967294, %v2265_v41  ;;  %v2544_v61 = vsel %vm2540_vm1, %v2528_v2, %v2543_v7  ;;  %v2546_v27 = vsel %vm2538_vm14, %v2525_v3, %v2528_v2 }
 0x2d0   :  { %v2547_v38 = vsel %vm2541_vm2, %v2534_v29, 920167782  ;;  %v2550_v14 = vsel %vm2538_vm14, %v2528_v2, %v2531_v17  ;;  %v2551_v35 = vsel %vm2541_vm2, %v2537_v63, 1326507024  ;;  %v2413_v11 = vadd.s32 1, %v3249_v40 }
 0x2d1   :  { %vm3244_vm6 = vcmp.lt.s32.totalorder %v3243_v62, 0  ;;  %v2548_v49 = vsel %vm2540_vm1, %v2531_v17, %v2547_v38  ;;  %vm2392_vm5 = vweird.f32 %v5466_v58  ;;  %v2545_v5 = vsel %vm2539_vm15, %v2542_v22, %v2544_v61 }
 0x2d2   :  { %v2268_v52 = vsel %vm3244_vm6, 0, %v3243_v62  ;;  %v2549_v4 = vsel %vm2539_vm15, %v2546_v27, %v2548_v49  ;;  %v2552_v47 = vsel %vm2540_vm1, %v2534_v29, %v2551_v35  ;;  %vm2199_vm7 = vcmp.lt.s32.totalorder %v5505_v54, 0 }
 0x2d3   :  { %v2269_v42 = vsub.s32 32, %v2268_v52  ;;  %v2270_v50 = vshll.u32 %v5724_v44, %v2268_v52  ;;  %v2273_v19 = vsub.s32 4294967266, %v2268_v52  ;;  %v2553_v13 = vsel %vm2539_vm15, %v2550_v14, %v2552_v47 }
 0x2d4   :  { %v5755_v8 = vmul.u32.u64.low %v5736_v55, %v2553_v13  ;;  %v5756_v31 = vmul.u32.u64.high %v5736_v55, %v2553_v13, %v5755_v8  ;;  %v5759_v12 = vmul.u32.u64.low %v5736_v55, %v2549_v4  ;;  %v5760_v51 = vmul.u32.u64.high %v5736_v55, %v2549_v4, %v5759_v12 }
 0x2d5   :  { %v2271_v23 = vshrl.u32 %v2253_v45, %v2269_v42  ;;  %v2274_v33 = vadd.s32 127, %v2273_v19  ;;  %vm2414_vm3 = vcmp.gt.s32.totalorder %v2413_v11, 0  ;;  %vm2394_vm8 = vcmp.lt.s32.totalorder %v5719_v18, 2 }
 0x2d6   :  { %vm2395_vm9 = vcmp.eq.s32.totalorder %v5719_v18, 0  ;;  %vm2398_vm4 = vcmp.eq.s32.totalorder %v5719_v18, 2  ;;  %v2415_v44 = vsel %vm2414_vm3, %v2413_v11, 0  ;;  %vm5769_vm10 = vcmp.le.f32.partialorder %v2197_v15, 0.7853982 }
 0x2d7   :  { %v2272_v21 = vor.u32 %v2271_v23, %v2270_v50  ;;  %v2275_v10 = vshll.u32 %v2274_v33, 23  ;;  %v2561_v45 = vmul.u32 %v5736_v55, %v2545_v5  ;;  %v2417_v30 = vand.u32 31, %v2415_v44 }
 0x2d8   :  { %v3696_v56 = vpop.eup %3695  ;;  %vm2563_vm11 = vc.u32 %v5756_v31, %v5759_v12  ;;  %v2564_v36 = vadd.s32 1, %v5760_v51  ;;  %v2410_v25 = vand.u32 8388607, %v2403_v24  ;;  %v2283_v55 = vsub.s32 4, %v5717_v37 }
 0x2d9   :  { %v3698_v43 = vpop.eup %3697  ;;  %v2399_v26 = vxor.u32 2147483648, %v3696_v56  ;;  %v2276_v15 = vor.u32 4788187, %v2275_v10  ;;  %v2279_v40 = vcvt.s32.f32 %v2272_v21  ;;  %v2418_v1 = vsub.s32 32, %v2417_v30 }
 0x2da   :  { %v2396_v46 = vxor.u32 2147483648, %v3698_v43  ;;  %v2565_v3 = vsel %vm2563_vm11, %v2564_v36, %v5760_v51  ;;  %v2420_v6 = vshll.u32 %v6023_v53, %v2417_v30  ;;  %v2423_v29 = vshll.u32 %v6014_v20, %v2417_v30 }
 0x2db   :  { %v2400_v59 = vsel %vm2398_vm4, %v2399_v26, %v3698_v43  ;;  %v2277_v2 = vand.u32 2147483647, %v2276_v15  ;;  %v2566_v17 = vadd.s32 %v2565_v3, %v2561_v45  ;;  %v2421_v34 = vshrl.u32 %v6014_v20, %v2418_v1 }
 0x2dc   :  { %v2397_v39 = vsel %vm2395_vm9, %v3696_v56, %v2396_v46  ;;  %v2424_v62 = vshrl.u32 %v6016_v48, %v2418_v1  ;;  %v2426_v63 = vshll.u32 %v6016_v48, %v2417_v30  ;;  %v2427_v27 = vshrl.u32 %v6021_v60, %v2418_v1 }
 0x2dd   :  { %v2401_v41 = vsel %vm2394_vm8, %v2397_v39, %v2400_v59  ;;  %v2280_v7 = vmul.f32 %v2279_v40, %v2277_v2  ;;  %v2567_v61 = vadd.s32 536870912, %v2566_v17  ;;  %v2284_v14 = vsel %vm2199_vm7, %v2283_v55, %v5717_v37 }
 0x2de   :  { %v2402_v22 = vsel %vm2392_vm5, nan, %v2401_v41  ;;  %v2411_v18 = vor.u32 8388608, %v2410_v25  ;;  %v2429_v49 = vshll.u32 %v6021_v60, %v2417_v30  ;;  %v2416_v11 = vshrl.u32 %v2415_v44, 5 }
 0x2df   :  { %v2622_v38 = vadd.f32 1.0, %v2402_v22  ;;  %v2281_v20 = vxor.u32 2147483648, %v2280_v7  ;;  %v5799_v35 = vshrl.u32 %v2567_v61, 30  ;;  %v2430_v48 = vshrl.u32 %v6022_v57, %v2418_v1 }
 0x2e0   :  { %v2422_v52 = vor.u32 %v2421_v34, %v2420_v6  ;;  %v2432_v5 = vshll.u32 %v6022_v57, %v2417_v30  ;;  %v2433_v4 = vshrl.u32 %v6025_v32, %v2418_v1  ;;  %v2425_v42 = vor.u32 %v2424_v62, %v2423_v29 }
 0x2e1   :  { %v2638_v58 = vmul.f32 0.5, %v2622_v38  ;;  %v2282_v47 = vsel %vm2199_vm7, %v2281_v20, %v2280_v7  ;;  %v2569_v37 = vshll.u32 %v5799_v35, 30  ;;  %v2428_v50 = vor.u32 %v2427_v27, %v2426_v63 }
 0x2e2   :  { %v2285_v19 = vsel %vm5769_vm10, %v5505_v54, %v2282_v47  ;;  %v2431_v13 = vor.u32 %v2430_v48, %v2429_v49  ;;  %v2434_v8 = vor.u32 %v2433_v4, %v2432_v5  ;;  %vm2435_vm12 = vcmp.lt.s32.totalorder %v2416_v11, 1 }
 0x2e3   :  { %v2737_v60 = vmul.f32 0.0, %v2638_v58  ;;  %3699 = vcosq.f32 %v2285_v19  ;;  %v2570_v51 = vsub.s32 %v2566_v17, %v2569_v37  ;;  %v2451_v57 = vshll.u32 %v2411_v18, 8 }
 0x2e4   :  { %v2286_v32 = vsel %vm5769_vm10, 0, %v2284_v14  ;;  %3701 = vsinq.f32 %v2285_v19  ;;  %v2419_v23 = vshrl.u32 %v6023_v53, %v2418_v1  ;;  %vm2438_vm13 = vcmp.lt.s32.totalorder %v2416_v11, 4  ;;  %v3405_v19 = vpop.f32.mrb[4].mxu0 }
 0x2e5   :  { %2807 = vperm.xlu1 %3550, %v2737_v60   ;;  %v2572_v33 = vsub.s32 0, %v2570_v51  ;;  %vm2436_vm14 = vcmp.lt.s32.totalorder %v2416_v11, 2  ;;  %vm2437_vm15 = vcmp.lt.s32.totalorder %v2416_v11, 3  ;;  %v2440_v44 = vsel %vm2438_vm13, %v2428_v50, 2102212464 }
 0x2e6   :  { %v2443_v56 = vsel %vm2435_vm12, %v2422_v52, %v2425_v42  ;;  %v2444_v21 = vsel %vm2438_vm13, %v2431_v13, 920167782  ;;  %v2447_v10 = vsel %vm2435_vm12, %v2425_v42, %v2428_v50  ;;  %v2448_v45 = vsel %vm2438_vm13, %v2434_v8, 1326507024 }
 0x2e7   :  { %v2290_v30 = vand.u32 3, %v2286_v32  ;;  %v3254_v43 = vmin.u32 %v2572_v33, %v2570_v51  ;;  %v2439_v26 = vsel %vm2435_vm12, %v2419_v23, %v2422_v52  ;;  %v2441_v0 = vsel %vm2437_vm15, %v2425_v42, %v2440_v44  ;;  %v2753_v33 = vpop.permute.xlu1 %2752 }
 0x2e8   :  { %v2445_v36 = vsel %vm2437_vm15, %v2428_v50, %v2444_v21  ;;  %v2449_v25 = vsel %vm2437_vm15, %v2431_v13, %v2448_v45  ;;  %v2442_v6 = vsel %vm2436_vm14, %v2439_v26, %v2441_v0  ;;  %v2562_v2 = vadd.s32 %v5759_v12, %v5756_v31  ;;  %v5841_v13 = vld [vmem:[%s5928_s8] ss:$0 sm:$0xff]  ;;  %s3875_s8 = smov 0  }
 0x2e9   :  { %v2574_v46 = vclz %v3254_v43  ;;  %v2446_v53 = vsel %vm2436_vm14, %v2443_v56, %v2445_v36  ;;  %v2450_v15 = vsel %vm2436_vm14, %v2447_v10, %v2449_v25  ;;  %vm2291_vm1 = vcmp.lt.s32.totalorder %v2290_v30, 2 }
 0x2ea   :  { %v5818_v40 = vmul.u32.u64.low %v2451_v57, %v2450_v15  ;;  %v5819_v1 = vmul.u32.u64.high %v2451_v57, %v2450_v15, %v5818_v40  ;;  %v5821_v59 = vmul.u32.u64.low %v2451_v57, %v2446_v53  ;;  %v5822_v55 = vmul.u32.u64.high %v2451_v57, %v2446_v53, %v5821_v59 }
 0x2eb   :  { %v3255_v3 = vadd.s32 4294967294, %v2574_v46  ;;  %vm2292_vm2 = vcmp.eq.s32.totalorder %v2290_v30, 0  ;;  %vm2295_vm6 = vcmp.eq.s32.totalorder %v2290_v30, 2  ;;  %v2458_v34 = vmul.u32 %v2451_v57, %v2442_v6 }
 0x2ec   :  { %vm2460_vm7 = vc.u32 %v5819_v1, %v5821_v59  ;;  %vm2289_vm3 = vweird.f32 %v5505_v54  ;;  %v2461_v27 = vadd.s32 1, %v5822_v55  ;;  %vm2508_vm8 = vcmp.lt.s32.totalorder %v5655_v16, 0 }
 0x2ed   :  { %v3700_v39 = vpop.eup %3699  ;;  %vm3256_vm5 = vcmp.lt.s32.totalorder %v3255_v3, 0  ;;  %v875_v8 = vadd.f32 %v3405_v19, %v5841_v13  ;;  %vm5847_vm9 = vcmp.le.f32.partialorder %v2506_v28, 0.7853982  ;;  %v2592_v32 = vsub.s32 4, %v5799_v35 }
 0x2ee   :  { %v3702_v17 = vpop.eup %3701  ;;  %v2296_v29 = vxor.u32 2147483648, %v3700_v39  ;;  %v2577_v41 = vsel %vm3256_vm5, 0, %v3255_v3  ;;  %v2462_v18 = vsel %vm2460_vm7, %v2461_v27, %v5822_v55  ;;  %v2459_v36 = vadd.s32 %v5821_v59, %v5819_v1 }
 0x2ef   :  { %v2293_v62 = vxor.u32 2147483648, %v3702_v17  ;;  %v2578_v63 = vsub.s32 32, %v2577_v41  ;;  %v2579_v22 = vshll.u32 %v2570_v51, %v2577_v41  ;;  %v2582_v7 = vsub.s32 4294967266, %v2577_v41 }
 0x2f0   :  { %v2297_v61 = vsel %vm2295_vm6, %v2296_v29, %v3702_v17  ;;  %v2463_v48 = vadd.s32 %v2462_v18, %v2458_v34  ;;  %v2822_v44 = vmul.f32 %v2753_v33, %v875_v8  ;;  %v2593_v45 = vsel %vm2508_vm8, %v2592_v32, %v5799_v35 }
 0x2f1   :  { %v2294_v38 = vsel %vm2292_vm2, %v3700_v39, %v2293_v62  ;;  %v2580_v31 = vshrl.u32 %v2562_v2, %v2578_v63  ;;  %v2583_v12 = vadd.s32 127, %v2582_v7  ;;  %v2595_v43 = vsel %vm5847_vm9, 0, %v2593_v45 }
 0x2f2   :  { %v2298_v14 = vsel %vm2291_vm1, %v2294_v38, %v2297_v61  ;;  %v2464_v4 = vadd.s32 536870912, %v2463_v48  ;;  %2838 = vst [vmem:[#allocation4 + $0x10] sm:$0xff] %v2822_v44  ;;  %v2599_v0 = vand.u32 3, %v2595_v43  ;;  %vm2598_vm13 = vweird.f32 %v5655_v16 }
 0x2f3   :  { %v2299_v49 = vsel %vm2289_vm3, nan, %v2298_v14  ;;  %v2581_v20 = vor.u32 %v2580_v31, %v2579_v22  ;;  %v2584_v11 = vshll.u32 %v2583_v12, 23  ;;  %vm2405_vm14 = vcmp.lt.s32.totalorder %v5678_v9, 0 }
 0x2f4   :  { %v2621_v58 = vadd.f32 1.0, %v2299_v49  ;;  %v5835_v37 = vshrl.u32 %v2464_v4, 30  ;;  %vm2604_vm10 = vcmp.eq.s32.totalorder %v2599_v0, 2  ;;  %vm2601_vm11 = vcmp.eq.s32.totalorder %v2599_v0, 0 }
 0x2f5   :  { %v2585_v52 = vor.u32 4788187, %v2584_v11  ;;  %v2588_v5 = vcvt.s32.f32 %v2581_v20  ;;  %vm2600_vm12 = vcmp.lt.s32.totalorder %v2599_v0, 2  ;;  %vm2404_vm15 = vcmp.le.f32.partialorder %v2403_v24, 0.7853982  ;;  %v2743_v20 = vpop.permute.xlu0 %2742  ;;  %v2758_v11 = vpop.permute.xlu1 %2757 }
 0x2f6   :  { %v2637_v54 = vmul.f32 0.5, %v2621_v58  ;;  %v2466_v60 = vshll.u32 %v5835_v37, 30  ;;  %v2489_v38 = vsub.s32 4, %v5835_v37  ;;  %vm2495_vm5 = vweird.f32 %v5678_v9 }
 0x2f7   :  { %v2586_v47 = vand.u32 2147483647, %v2585_v52 }
 0x2f8   :  { %v2736_v42 = vmul.f32 0.0, %v2637_v54  ;;  %v2467_v23 = vsub.s32 %v2463_v48, %v2466_v60  ;;  %v2490_v14 = vsel %vm2405_vm14, %v2489_v38, %v5835_v37 }
 0x2f9   :  { %v2589_v50 = vmul.f32 %v2588_v5, %v2586_v47  ;;  %v2492_v18 = vsel %vm2404_vm15, 0, %v2490_v14  ;;  %v2748_v54 = vpop.permute.xlu0 %2747  ;;  %v2768_v37 = vpop.permute.xlu1 %2767 }
 0x2fa   :  { %2802 = vperm.xlu0 %3549, %v2736_v42   ;;  %v2469_v21 = vsub.s32 0, %v2467_v23  ;;  %v2496_v49 = vand.u32 3, %v2492_v18 }
 0x2fb   :  { %v2590_v57 = vxor.u32 2147483648, %v2589_v50 }
 0x2fc   :  { %v3250_v28 = vmin.u32 %v2469_v21, %v2467_v23  ;;  %vm2501_vm1 = vcmp.eq.s32.totalorder %v2496_v49, 2  ;;  %vm2498_vm2 = vcmp.eq.s32.totalorder %v2496_v49, 0  ;;  %vm2497_vm6 = vcmp.lt.s32.totalorder %v2496_v49, 2 }
 0x2fd   :  { %v2591_v56 = vsel %vm2508_vm8, %v2590_v57, %v2589_v50  ;;  %v2763_v19 = vpop.permute.xlu0 %2762  ;;  %v2778_v51 = vpop.permute.xlu1 %2777 }
 0x2fe   :  { %v2594_v10 = vsel %vm5847_vm9, %v5655_v16, %v2591_v56  ;;  %v2471_v30 = vclz %v3250_v28  ;;  %v866_v57 = vpop.f32.mrb[5].mxu0 }
 0x2ff   :  { %3703 = vcosq.f32 %v2594_v10  ;;  %v867_v32 = vadd.f32 %v5841_v13, %v866_v57 }
 0x300   :  { %3705 = vsinq.f32 %v2594_v10  ;;  %v3251_v26 = vadd.s32 4294967294, %v2471_v30 }
 0x301   :  { %v2773_v10 = vpop.permute.xlu0 %2772  ;;  %v2788_v43 = vpop.permute.xlu1 %2787 }
 0x302   :  { %vm3252_vm4 = vcmp.lt.s32.totalorder %v3251_v26, 0 }
 0x303   :  { %v2474_v25 = vsel %vm3252_vm4, 0, %v3251_v26 }
 0x304   :  { %v2475_v46 = vsub.s32 32, %v2474_v25  ;;  %v2476_v53 = vshll.u32 %v2467_v23, %v2474_v25  ;;  %v2479_v15 = vsub.s32 4294967266, %v2474_v25  ;;  %v3406_v23 = vpop.f32.mrb[6].mxu0 }
 0x305   :  { %v878_v33 = vadd.f32 %v3406_v23, %v5841_v13  ;;  %v869_v44 = vpop.f32.mrb[7].mxu0 }
 0x306   :  { %v2477_v35 = vshrl.u32 %v2459_v36, %v2475_v46  ;;  %v2480_v55 = vadd.s32 127, %v2479_v15  ;;  %v870_v56 = vadd.f32 %v5841_v13, %v869_v44  ;;  %v3409_v21 = vpop.f32.mrb[8].mxu0 }
 0x307   :  { %v2823_v45 = vmul.f32 %v2758_v11, %v878_v33  ;;  %v891_v28 = vadd.f32 %v3409_v21, %v5841_v13  ;;  %v882_v30 = vpop.f32.mrb[9].mxu0 }
 0x308   :  { %v2478_v2 = vor.u32 %v2477_v35, %v2476_v53  ;;  %v2481_v17 = vshll.u32 %v2480_v55, 23  ;;  %v2821_v26 = vmul.f32 %v2748_v54, %v870_v56  ;;  %v883_v0 = vadd.f32 %v5841_v13, %v882_v30  ;;  %v3410_v36 = vpop.f32.mrb[10].mxu0 }
 0x309   :  { %v3704_v40 = vpop.eup %3703  ;;  %2839 = vst [vmem:[#allocation4 + $0x18] sm:$0xff] %v2823_v45  ;;  %v2826_v25 = vmul.f32 %v2773_v10, %v891_v28  ;;  %v894_v46 = vadd.f32 %v3410_v36, %v5841_v13  ;;  %v885_v53 = vpop.f32.mrb[11].mxu0 }
 0x30a   :  { %v3706_v3 = vpop.eup %3705  ;;  %v2605_v6 = vxor.u32 2147483648, %v3704_v40  ;;  %v2482_v59 = vor.u32 4788187, %v2481_v17  ;;  %v2485_v41 = vcvt.s32.f32 %v2478_v2  ;;  %2837 = vst [vmem:[#allocation4 + $0x8] sm:$0xff] %v2821_v26  ;;  %v2824_v15 = vmul.f32 %v2763_v19, %v883_v0  ;;  %v3413_v35 = vpop.f32.mrb[12].mxu0 }
 0x30b   :  { %v2602_v39 = vxor.u32 2147483648, %v3706_v3  ;;  %2842 = vst [vmem:[#allocation4 + $0x30] sm:$0xff] %v2826_v25  ;;  %v2827_v55 = vmul.f32 %v2778_v51, %v894_v46  ;;  %v907_v38 = vadd.f32 %v3413_v35, %v5841_v13 }
 0x30c   :  { %v2606_v29 = vsel %vm2604_vm10, %v2605_v6, %v3706_v3  ;;  %v2483_v63 = vand.u32 2147483647, %v2482_v59  ;;  %v898_v3 = vpop.f32.mrb[13].mxu0  ;;  %2840 = vst [vmem:[#allocation4 + $0x20] sm:$0xff] %v2824_v15 }
 0x30d   :  { %v2603_v1 = vsel %vm2601_vm11, %v3704_v40, %v2602_v39  ;;  %v886_v40 = vadd.f32 %v5841_v13, %v885_v53  ;;  %v899_v39 = vadd.f32 %v5841_v13, %v898_v3  ;;  %v3414_v2 = vpop.f32.mrb[14].mxu0  ;;  %2843 = vst [vmem:[#allocation4 + $0x38] sm:$0xff] %v2827_v55 }
 0x30e   :  { %v2607_v34 = vsel %vm2600_vm12, %v2603_v1, %v2606_v29  ;;  %v2486_v7 = vmul.f32 %v2485_v41, %v2483_v63  ;;  %v910_v29 = vadd.f32 %v3414_v2, %v5841_v13  ;;  %v901_v1 = vpop.f32.mrb[15].mxu0 }
 0x30f   :  { %v2608_v62 = vsel %vm2598_vm13, nan, %v2607_v34  ;;  %v2825_v6 = vmul.f32 %v2768_v37, %v886_v40  ;;  %v902_v34 = vadd.f32 %v5841_v13, %v901_v1 }
 0x310   :  { %v2624_v22 = vadd.f32 1.0, %v2608_v62  ;;  %v2487_v27 = vxor.u32 2147483648, %v2486_v7  ;;  %v3417_v62 = vpop.f32.mrb[16].mxu0 }
 0x311   :  { %2841 = vst [vmem:[#allocation4 + $0x28] sm:$0xff] %v2825_v6 }
 0x312   :  { %v2640_v61 = vmul.f32 0.5, %v2624_v22  ;;  %v2488_v16 = vsel %vm2405_vm14, %v2487_v27, %v2486_v7  ;;  %v914_v22 = vpop.f32.mrb[17].mxu0  ;;  %v2829_v7 = vmul.f32 %v2788_v43, %v902_v34 }
 0x313   :  { %v2491_v12 = vsel %vm2404_vm15, %v5678_v9, %v2488_v16  ;;  %v2820_v9 = vmul.f32 %v2743_v20, %v867_v32  ;;  %v915_v49 = vadd.f32 %v5841_v13, %v914_v22 }
 0x314   :  { %v2739_v31 = vmul.f32 0.0, %v2640_v61  ;;  %3707 = vcosq.f32 %v2491_v12  ;;  %v3418_v61 = vpop.f32.mrb[18].mxu0  ;;  %2845 = vst [vmem:[#allocation4 + $0x48] sm:$0xff] %v2829_v7 }
 0x315   :  { %3709 = vsinq.f32 %v2491_v12  ;;  %2836 = vst [vmem:[#allocation4] sm:$0xff] %v2820_v9  ;;  %v917_v27 = vpop.f32.mrb[19].mxu0 }
 0x316   :  { %2817 = vperm.xlu1 %3550, %v2739_v31   ;;  %v918_v12 = vadd.f32 %v5841_v13, %v917_v27 }
 0x317   :  { %v2783_v17 = vpop.permute.xlu0 %2782 }
 0x318   :  { %v2828_v41 = vmul.f32 %v2783_v17, %v899_v39 }
 0x31a   :  { %2844 = vst [vmem:[#allocation4 + $0x40] sm:$0xff] %v2828_v41 }
 0x31e   :  { %v3708_v48 = vpop.eup %3707 }
 0x31f   :  { %v3710_v58 = vpop.eup %3709  ;;  %v2502_v24 = vxor.u32 2147483648, %v3708_v48 }
 0x320   :  { %v2499_v52 = vxor.u32 2147483648, %v3710_v58 }
 0x321   :  { %v2503_v5 = vsel %vm2501_vm1, %v2502_v24, %v3710_v58 }
 0x322   :  { %v2500_v4 = vsel %vm2498_vm2, %v3708_v48, %v2499_v52  ;;  %v926_v48 = vadd.f32 %v3418_v61, %v5841_v13  ;;  %v923_v52 = vadd.f32 %v3417_v62, %v5841_v13 }
 0x323   :  { %v2504_v47 = vsel %vm2497_vm6, %v2500_v4, %v2503_v5 }
 0x324   :  { %v2505_v42 = vsel %vm2495_vm5, nan, %v2504_v47 }
 0x325   :  { %v2623_v50 = vadd.f32 1.0, %v2505_v42 }
 0x327   :  { %v2639_v60 = vmul.f32 0.5, %v2623_v50 }
 0x329   :  { %v2738_v8 = vmul.f32 0.0, %v2639_v60 }
 0x32b   :  { %2812 = vperm.xlu0 %3549, %v2738_v8  }
 0x32e   :  { %v2798_v59 = vpop.permute.xlu1 %2797 }
 0x32f   :  { %v2831_v63 = vmul.f32 %v2798_v59, %v910_v29 }
 0x331   :  { %2847 = vst [vmem:[#allocation4 + $0x58] sm:$0xff] %v2831_v63 }
 0x347   :  { %v2793_v31 = vpop.permute.xlu0 %2792 }
 0x348   :  { %v2830_v16 = vmul.f32 %v2793_v31, %v907_v38 }
 0x34a   :  { %2846 = vst [vmem:[#allocation4 + $0x50] sm:$0xff] %v2830_v16 }
 0x364   :  { %v2808_v14 = vpop.permute.xlu1 %2807 }
 0x365   :  { %v2833_v18 = vmul.f32 %v2808_v14, %v918_v12 }
 0x367   :  { %2849 = vst [vmem:[#allocation4 + $0x68] sm:$0xff] %v2833_v18 }
 0x379   :  { %v2803_v20 = vpop.permute.xlu0 %2802 }
 0x37a   :  { %v2832_v11 = vmul.f32 %v2803_v20, %v915_v49 }
 0x37c   :  { %2848 = vst [vmem:[#allocation4 + $0x60] sm:$0xff] %v2832_v11 }
 0x395   :  { %v2818_v58 = vpop.permute.xlu1 %2817 }
 0x396   :  { %v2835_v24 = vmul.f32 %v2818_v58, %v926_v48 }
 0x398   :  { %2851 = vst [vmem:[#allocation4 + $0x78] sm:$0xff] %v2835_v24 }
 0x3aa   :  { %v2813_v5 = vpop.permute.xlu0 %2812 }
 0x3ab   :  { %v2834_v4 = vmul.f32 %v2813_v5, %v923_v52 }
 0x3ad   :  { %2850 = vst [vmem:[#allocation4 + $0x70] sm:$0xff] %v2834_v4 }
 0x3ae LB: > { %s2859_s29 = sld [smem:[#allocation6 + %s3877_s8]]  ;;  %s2863_s30 = scalar_lea.vmem [#allocation4], %s3877_s8  ;;  %s3877_s8 = sphi %s3875_s8, %s2857_s8  }
 0x3af   : > { %s2860_s6 = sld [smem:[#allocation7 + %s3877_s8]]  ;;  %s2857_s8 = sadd.s32 1, %s3877_s8  }
 0x3b0   : > { %p2854_p10 = scmp.ge.s32.totalorder %s2857_s8, 128  }
 0x3b1   :  { %v6053_v13 = vmov (%p2854_p10), 0.0   ;;  %v3711_v60 = vld [vmem:[#allocation13] sm:$0xff] (%p2854_p10)   ;;  %v3712_v19 = vld [vmem:[#allocation13 + $0x8] sm:$0xff] (%p2854_p10)   ;;  %v3713_v8 = vld [vmem:[#allocation13 + $0x10] sm:$0xff] (%p2854_p10)   ;;  %s3896_s0 = smov (%p2854_p10), [#allocation16]  }
 0x3b2   :  { %3419 = vmatprep.subr.bf16.mxu1 (%p2854_p10), %v6053_v13  ;;  %3435 = vmatprep.mubr.msk.bf16.mxu1 (%p2854_p10), %vm3888_vm0, %v6053_v13  ;;  %v3714_v51 = vld [vmem:[#allocation13 + $0x18] sm:$0xff] (%p2854_p10)   ;;  %v3715_v57 = vld [vmem:[#allocation13 + $0x20] sm:$0xff] (%p2854_p10)   ;;  %v3716_v32 = vld [vmem:[#allocation13 + $0x28] sm:$0xff] (%p2854_p10)   ;;  %s3124_s18 = sshll.u32 (%p2854_p10), %s3896_s0, 4  ;;  %s3125_s18 = int_to_ptr.vmem [resolvable:$true] %s3124_s18 }
 0x3b3   :  { %3439 = vmatprep.subr.bf16.mxu0 (%p2854_p10), %v6053_v13  ;;  %3455 = vmatprep.mubr.msk.bf16.mxu0 (%p2854_p10), %vm3888_vm0, %v6053_v13  ;;  %v3717_v23 = vld [vmem:[#allocation13 + $0x30] sm:$0xff] (%p2854_p10)   ;;  %v3718_v33 = vld [vmem:[#allocation13 + $0x38] sm:$0xff] (%p2854_p10)   ;;  %v3719_v56 = vld [vmem:[#allocation14] sm:$0xff] (%p2854_p10)   ;;  %s3839_s12 = scalar_lea.vmem (%p2854_p10), %s3125_s18, 128  ;;  %p3844_p12 = scmp.lt.s32.totalorder (%p2854_p10), %s3125_s18, %s3125_s18 }
 0x3b4   : > { %v2864_v54 = vld [vmem:[%s2863_s30] sm:$0x1]  ;;  %s2861_s10 = scalar_lea.vmem [#allocation2], %s2859_s29  ;;  %2856 = sbr.rel (!%p2854_p10) target bundleno = 942 (0x3ae), region = 102  ;;  %3420 = vmatpush3.bf16.msra.mxu1 (%p2854_p10), %v3711_v60  ;;  %3440 = vmatpush3.bf16.msra.mxu0 (%p2854_p10), %v3719_v56  ;;  %v3720_v21 = vld [vmem:[#allocation14 + $0x8] sm:$0xff] (%p2854_p10)   ;;  %v3722_v45 = vld [vmem:[#allocation14 + $0x18] sm:$0xff] (%p2854_p10)  }
 0x3b5   : > { %v2862_v47 = vld [vmem:[%s2861_s10] sm:$0x1]  ;;  %s2866_s5 = scalar_lea.vmem [#allocation3], %s2860_s6  ;;  %3421 = vmatprep.subr.bf16.mxu1 (%p2854_p10), %v6053_v13  ;;  %3441 = vmatprep.subr.bf16.mxu0 (%p2854_p10), %v6053_v13  ;;  %v3723_v28 = vld [vmem:[#allocation14 + $0x20] sm:$0xff] (%p2854_p10)   ;;  %v3724_v30 = vld [vmem:[#allocation14 + $0x28] sm:$0xff] (%p2854_p10)   ;;  %p3840_p11 = scmp.ne.s32.totalorder (%p2854_p10), %s3125_s18, %s3839_s12 }
 0x3b6   : > { %v2867_v37 = vld [vmem:[%s2866_s5] sm:$0x1]  ;;  %v2865_v42 = vmul.f32 %v2864_v54, %v2862_v47  ;;  %v3726_v26 = vld [vmem:[#allocation14 + $0x38] sm:$0xff] (%p2854_p10)   ;;  %p3845_p13 = scmp.lt.s32.totalorder (%p2854_p10), %s3839_s12, %s3839_s12 }
 0x3b7   :  { %v3721_v10 = vld [vmem:[#allocation14 + $0x10] sm:$0xff] (%p2854_p10)  }
 0x3b8   : > { %v2868_v50 = vadd.f32 %v2867_v37, %v2865_v42  ;;  %3422 = vmatpush3.bf16.msra.mxu1 (%p2854_p10), %v3712_v19  ;;  %3442 = vmatpush3.bf16.msra.mxu0 (%p2854_p10), %v3720_v21  ;;  %v3725_v43 = vld [vmem:[#allocation14 + $0x30] sm:$0xff] (%p2854_p10)   ;;  %p3846_p0 = por (%p2854_p10), %p3845_p13, %p3844_p12 }
 0x3b9   :  { %3423 = vmatprep.subr.bf16.mxu1 (%p2854_p10), %v6053_v13  ;;  %3443 = vmatprep.subr.bf16.mxu0 (%p2854_p10), %v6053_v13  ;;  %v3257_v0 = vld [vmem:[%s5931_s11] ss:$0 sm:$0xff] (%p2854_p10) }
 0x3ba   : > { %2869 = vst [vmem:[%s2866_s5] sm:$0x1] %v2868_v50  ;;  %v3267_v61 = vld [vmem:[%s5933_s13] ss:$0 sm:$0xff] (%p2854_p10)  ;;  %p3847_p1 = pnand (%p2854_p10), %p3846_p0, %p3840_p11 }
 0x3bc   :  { %3424 = vmatpush3.bf16.msra.mxu1 %v3713_v8  ;;  %3444 = vmatpush3.bf16.msra.mxu0 %v3721_v10 }
 0x3bd   :  { %3425 = vmatprep.subr.bf16.mxu1 %v6053_v13  ;;  %3445 = vmatprep.subr.bf16.mxu0 %v6053_v13 }
 0x3c0   :  { %3426 = vmatpush3.bf16.msra.mxu1 %v3714_v51  ;;  %3446 = vmatpush3.bf16.msra.mxu0 %v3722_v45 }
 0x3c1   :  { %3427 = vmatprep.subr.bf16.mxu1 %v6053_v13  ;;  %v2873_v44 = vld [vmem:[#allocation3] sm:$0xff]  ;;  %3447 = vmatprep.subr.bf16.mxu0 %v6053_v13 }
 0x3c2   :  { %v2874_v9 = vpack.c.bf16 %v2873_v44, %v2873_v44 }
 0x3c4   :  { %3428 = vmatpush3.bf16.msra.mxu1 %v3715_v57  ;;  %3448 = vmatpush3.bf16.msra.mxu0 %v3723_v28 }
 0x3c5   :  { %3429 = vmatprep.subr.bf16.mxu1 %v6053_v13  ;;  %3449 = vmatprep.subr.bf16.mxu0 %v6053_v13 }
 0x3c8   :  { %3430 = vmatpush3.bf16.msra.mxu1 %v3716_v32  ;;  %3450 = vmatpush3.bf16.msra.mxu0 %v3724_v30 }
 0x3c9   :  { %3431 = vmatprep.subr.bf16.mxu1 %v6053_v13  ;;  %3451 = vmatprep.subr.bf16.mxu0 %v6053_v13 }
 0x3cc   :  { %3432 = vmatpush3.bf16.msra.mxu1 %v3717_v23  ;;  %3452 = vmatpush3.bf16.msra.mxu0 %v3725_v43 }
 0x3cd   :  { %3433 = vmatprep.subr.bf16.mxu1 %v6053_v13  ;;  %3453 = vmatprep.subr.bf16.mxu0 %v6053_v13 }
 0x3d0   :  { %3434 = vmatpush3.bf16.msra.mxu1 %v3718_v33  ;;  %3454 = vmatpush3.bf16.msra.mxu0 %v3726_v26 }
 0x3d3   :  { %3436 = vmatmul.mubr.bf16.vlgmr.msra.gmra.mrb[16].mxu1 %v2874_v9 }
 0x4a6   :  { %v2980_v36 = vpop.f32.mrb[16].mxu1 }
 0x4a7   :  { %v2981_v25 = vadd.f32 %v3257_v0, %v2980_v36  ;;  %v3437_v46 = vpop.f32.mrb[17].mxu1 }
 0x4a8   :  { %v2983_v53 = vpop.f32.mrb[18].mxu1 }
 0x4a9   :  { %v2989_v15 = vand.u32 2147483647, %v2981_v25  ;;  %v3438_v40 = vpop.f32.mrb[19].mxu1  ;;  %v2986_v41 = vmax.f32 %v2981_v25, 0.0  ;;  %vm2987_vm7 = vcmp.ne.f32.partialorder %v2981_v25, %v2981_v25 }
 0x4ab   :  { %v2990_v35 = vsub.f32 0.0, %v2989_v15 }
 0x4ad   :  { %v2991_v55 = vmul.f32 1.442695, %v2990_v35 }
 0x4af   :  { %3727 = vpow2.f32 %v2991_v55 }
 0x4b9   :  { %v3728_v3 = vpop.eup %3727 }
 0x4ba   :  { %v2993_v6 = vadd.f32 1.0, %v3728_v3  ;;  %v2996_v39 = vmul.f32 -0.5, %v3728_v3  ;;  %v2999_v17 = vand.u32 2147483647, %v3728_v3 }
 0x4bc   :  { %3729 = vlog2.f32 %v2993_v6  ;;  %v2997_v2 = vadd.f32 1.0, %v2996_v39  ;;  %vm3000_vm0 = vcmp.lt.f32.partialorder %v2999_v17, 0.0004427343 }
 0x4be   :  { %v2998_v59 = vmul.f32 %v3728_v3, %v2997_v2 }
 0x4c6   :  { %v3730_v29 = vpop.eup %3729 }
 0x4c7   :  { %v2995_v1 = vmul.f32 0.6931472, %v3730_v29 }
 0x4c9   :  { %v3001_v34 = vsel %vm3000_vm0, %v2998_v59, %v2995_v1 }
 0x4ca   :  { %v3002_v62 = vadd.f32 %v3001_v34, %v2986_v41 }
 0x4cc   :  { %v3003_v63 = vsel %vm2987_vm7, %v2981_v25, %v3002_v62 }
 0x4cd   :  { %v3266_v22 = vadd.f32 -0.6931472, %v3003_v63 }
 0x4cf   :  { %v3005_v7 = vpack.c.bf16 %v3266_v22, %v3266_v22 }
 0x4d1   :  { %3456 = vmatmul.mubr.bf16.vlgmr.msra.gmra.mrb[20].mxu0 %v3005_v7 }
 0x5a4   :  { %v3111_v27 = vpop.f32.mrb[20].mxu0 }
 0x5a5   :  { %v3112_v38 = vadd.f32 %v3267_v61, %v3111_v27  ;;  %v3457_v31 = vpop.f32.mrb[21].mxu0 }
 0x5a6   :  { %v3114_v16 = vpop.f32.mrb[22].mxu0 }
 0x5a7   :  { %3117 = vst [vmem:[#allocation16] sm:$0xff] %v3112_v38  ;;  %v3458_v12 = vpop.f32.mrb[23].mxu0 }
 0x5a8   :  { %3850 = shalt.err (!%p3847_p1)
}
 0x5a9   :  { %s3851_s13 = scalar_lea.hbm %s5934_s14, 128 }
 0x5aa   :  { %p3852_p2 = scmp.ne.s32.totalorder %s5934_s14, %s3851_s13  ;;  %p3855_p3 = scmp.lt.u32.totalorder %s3851_s13, %s5934_s14 }
 0x5ac   :  { %p3857_p4 = pnand %p3855_p3, %p3852_p2 }
 0x5ae   :  { %3860 = shalt.err (!%p3857_p4)
}
 0x5af   :  { %3127 = dma.vmem_to_hbm [thread:$0]  %s3125_s18, 128, %s5934_s14, [#allocation10]  }
 0x5b0   :  { %3873 = dma.done.wait [#allocation10], 128  }
 0x5b1   :  { %3874 = vsyncadd [#allocation10], 4294967168 }
 0x5b2   :  { %3131 = vsyncpa [#allocation9], 1 }
 0x5b3   :  { %3132 = vsyncpa [#allocation12], 1 }
 0x5b4   :  { %3133 = vsyncpa [#allocation15], 1 }
 0x5b5   :  { %3134 = vsyncpa [#allocation10], 1 }

</bundles_post_ra>
